<compile_context>
chip_gen: v7x
topology: tpu7x:2x2x1
jax: 0.10.0
libtpu: 0.0.40
codegen_flags: <defaults>
</compile_context>

<pallas_src>
import jax
import jax.numpy as jnp
from jax.experimental import pallas as pl
from jax.experimental.pallas import tpu as pltpu


def _round_up(x, m):
    return (x + m - 1) // m * m


def _make_kernel(C, H, W, K, pad, tile_b, n_acc=4):
    """Builds the fused pool -> conv -> sigmoid kernel for static shapes."""
    HW = H * W

    def kernel(w_ref, x_ref, o_ref, sum_acc, max_acc, pad_ref):
        c_idx = pl.program_id(1)

        # --- init at the first channel tile of this batch block -------------
        @pl.when(c_idx == 0)
        def _init():
            sum_acc[...] = jnp.zeros_like(sum_acc)
            max_acc[...] = jnp.full_like(max_acc, -jnp.inf)
            # Border of the padded conv scratch must be zero; the interior is
            # fully overwritten in the finalize step.  Re-zeroing per batch
            # block keeps it correct when the parallel batch axis is sharded
            # across TensorCores (each core has its own scratch copy).
            pad_ref[...] = jnp.zeros_like(pad_ref)

        # --- accumulate this channel tile (lane-dense over H*W) -------------
        x = x_ref[...].astype(jnp.float32)                  # (tile_b, tile_c, HW)
        sum_acc[...] = sum_acc[...] + jnp.sum(x, axis=1)
        max_acc[...] = jnp.maximum(max_acc[...], jnp.max(x, axis=1))

        # --- finalize: mean, KxK 'same' conv over [avg, max], sigmoid -------
        @pl.when(c_idx == pl.num_programs(1) - 1)
        def _finalize():
            avg_map = (sum_acc[...] * (1.0 / float(C))).reshape(tile_b, H, W)
            max_map = max_acc[...].reshape(tile_b, H, W)

            # Write interiors of the pre-zeroed padded maps (border stays 0).
            pad_ref[0, :, pad:pad + H, pad:pad + W] = avg_map
            pad_ref[1, :, pad:pad + H, pad:pad + W] = max_map

            # Cross-correlation, restructured for the VLIW units:
            #   * kx (lane shift) is the outer spatial loop -> K lane
            #     relayouts per input map instead of K*K,
            #   * n_acc independent accumulators expose ILP instead of one
            #     2*K*K-long dependent add chain.
            accs = [jnp.zeros((tile_b, H, W), jnp.float32) for _ in range(n_acc)]
            for ci in range(2):
                m = pad_ref[ci]                             # (tile_b, Hp_r, Wp_r)
                for kx in range(K):
                    m_kx = m[:, :, kx:kx + W]               # one lane shift per kx
                    for ky in range(K):
                        wgt = w_ref[ci * K * K + ky * K + kx]   # SMEM scalar
                        a = ky % n_acc
                        accs[a] = accs[a] + m_kx[:, ky:ky + H, :] * wgt
            acc = accs[0]
            for extra in accs[1:]:
                acc = acc + extra

            y = jax.nn.sigmoid(acc)                         # (tile_b, H, W)
            o_ref[...] = y.reshape(tile_b, 1, HW).astype(o_ref.dtype)

    return kernel


def _vmem_budget():
    """Generation-aware (vmem_limit_bytes, target_block_bytes)."""
    try:
        cap = int(pltpu.get_tpu_info().vmem_capacity_bytes)
    except Exception:
        cap = 64 * 1024 * 1024                              # conservative default
    if cap >= 128 * 1024 * 1024:                            # v5e / v6e
        return 64 * 1024 * 1024, 4 * 1024 * 1024
    return 40 * 1024 * 1024, 3 * 1024 * 1024                # v7x (64 MiB / TC)


def _pick_tiles(B, C, HW, itemsize, target_bytes):
    """Pick (tile_c, tile_b): layout-friendly, ~target_bytes per x block."""
    sub = max(8, 32 // itemsize)          # sublane multiple for this dtype
    row = HW * itemsize                   # bytes per (channel, H*W) row
    # tile_c must divide C and be sublane-friendly (multiple of `sub` or == C).
    cands = [d for d in range(1, C + 1) if C % d == 0 and (d == C or d % sub == 0)]
    fitting = [d for d in cands if d * row <= target_bytes]
    tile_c = max(fitting) if fitting else min(cands)
    # Fuse batches only when a whole channel stack fits well under budget,
    # keeping >= 2 parallel batch grid steps (megacore on v7x) when B >= 2.
    tile_b = 1
    if tile_c == C:
        max_b = max(1, B // 2) if B >= 2 else 1
        for d in range(max_b, 0, -1):
            if B % d == 0 and d * C * row <= target_bytes:
                tile_b = d
                break
    return tile_c, tile_b


def spatial_attention_forward(x, weight, *, tile_c=None, tile_b=None):
    """x: (B, C, H, W); weight: (1, 2, K, K) conv weight (PyTorch OIHW layout).

    Returns sigmoid(conv2d(cat[mean_c(x), max_c(x)], weight, padding=K//2)),
    shape (B, 1, H, W), dtype of x.
    """
    B, C, H, W = x.shape
    assert weight.shape[0] == 1 and weight.shape[1] == 2
    K = int(weight.shape[2])
    assert weight.shape[3] == K
    pad = K // 2
    HW = H * W
    itemsize = jnp.dtype(x.dtype).itemsize

    vmem_limit, target_block = _vmem_budget()
    auto_c, auto_b = _pick_tiles(B, C, HW, itemsize, target_block)
    if tile_c is None:
        tile_c = auto_c
    if tile_b is None:
        tile_b = auto_b if tile_c == C else 1

    sub = max(8, 32 // itemsize)
    assert C % tile_c == 0, "tile_c must divide C"
    assert tile_c == C or tile_c % sub == 0, (
        "tile_c must be the full C or a multiple of the sublane packing")
    assert B % tile_b == 0, "tile_b must divide B"
    num_c = C // tile_c
    num_b = B // tile_b

    # Lane-dense layouts: spatial plane on the 128-lane axis.
    x_flat = x.reshape(B, C, HW)
    w_flat = weight.astype(jnp.float32).reshape(-1)         # (2*K*K,) scalars

    # Padded conv scratch, rounded up to (mult-of-8, mult-of-128) f32 tiles.
    hp_r = _round_up(H + 2 * pad, 8)
    wp_r = _round_up(W + 2 * pad, 128)

    kernel = _make_kernel(C, H, W, K, pad, tile_b)

    out = pl.pallas_call(
        kernel,
        out_shape=jax.ShapeDtypeStruct((B, 1, HW), x.dtype),
        grid=(num_b, num_c),
        in_specs=[
            # conv weights: whole array resident in SMEM (scalar reads)
            pl.BlockSpec(memory_space=pltpu.MemorySpace.SMEM),
            # x: streamed (tile_b, tile_c, H*W) blocks, auto double-buffered
            pl.BlockSpec((tile_b, tile_c, HW), lambda b, c: (b, c, 0)),
        ],
        out_specs=pl.BlockSpec((tile_b, 1, HW), lambda b, c: (b, 0, 0)),
        scratch_shapes=[
            pltpu.VMEM((tile_b, HW), jnp.float32),           # running channel sum
            pltpu.VMEM((tile_b, HW), jnp.float32),           # running channel max
            pltpu.VMEM((2, tile_b, hp_r, wp_r), jnp.float32),  # padded conv maps
        ],
        compiler_params=pltpu.CompilerParams(
            dimension_semantics=("parallel", "arbitrary"),
            vmem_limit_bytes=vmem_limit,
        ),
    )(w_flat, x_flat)
    return out.reshape(B, 1, H, W)


def reference_forward(x, weight):
    """Pure-JAX reference of the same forward pass (sanity check)."""
    avg = jnp.mean(x, axis=1, keepdims=True)
    mx = jnp.max(x, axis=1, keepdims=True)
    h = jnp.concatenate([avg, mx], axis=1)                   # (B, 2, H, W)
    p = weight.shape[-1] // 2
    y = jax.lax.conv_general_dilated(
        h.astype(jnp.float32), weight.astype(jnp.float32),
        window_strides=(1, 1), padding=((p, p), (p, p)),
        dimension_numbers=("NCHW", "OIHW", "NCHW"),
        precision=jax.lax.Precision.HIGHEST)
    return (1.0 / (1.0 + jnp.exp(-y))).astype(x.dtype)


if __name__ == "__main__":
    B, C, H, W = 2, 16, 16, 16
    K = 7

    key = jax.random.PRNGKey(0)
    k_x, k_w = jax.random.split(key)
    x = jax.random.normal(k_x, (B, C, H, W), jnp.float32)
    bound = 1.0 / (2 * K * K) ** 0.5                         # Conv2d default-ish init
    weight = jax.random.uniform(k_w, (1, 2, K, K), jnp.float32, -bound, bound)

    # Auto tiling (whole channel stack per step) and an explicit multi-step
    # channel reduction (tile_c=8 -> 2 accumulation steps) to exercise the
    # running sum/max path.
    out_auto = jax.block_until_ready(spatial_attention_forward(x, weight))
    out_tiled = jax.block_until_ready(
        spatial_attention_forward(x, weight, tile_c=8))

    ref = reference_forward(x, weight)

    assert out_auto.shape == (B, 1, H, W)
    assert out_tiled.shape == (B, 1, H, W)
    assert jnp.allclose(out_auto, ref, atol=1e-4, rtol=1e-4)
    assert jnp.allclose(out_tiled, ref, atol=1e-4, rtol=1e-4)

    print("KERNEL_OK")
</pallas_src>

<mosaic_0001>
module attributes {stable_mosaic.version = 11 : i64} {
  func.func @kernel(%arg0: i32, %arg1: i32, %arg2: memref<98xf32, #tpu.memory_space<smem>>, %arg3: memref<1x16x256xf32, #tpu.memory_space<vmem>>, %arg4: memref<1x1x256xf32, #tpu.memory_space<vmem>>, %arg5: memref<1x256xf32, #tpu.memory_space<vmem>>, %arg6: memref<1x256xf32, #tpu.memory_space<vmem>>, %arg7: memref<2x1x24x128xf32, #tpu.memory_space<vmem>>) attributes {dimension_semantics = [#tpu.dimension_semantics<parallel>, #tpu.dimension_semantics<arbitrary>], iteration_bounds = array<i64: 2, 1>, scalar_prefetch = 0 : i64, scratch_operands = 3 : i64, tpu.core_type = #tpu.core_type<tc>, window_params = [{transform_indices = @transform_0, window_bounds = array<i64: 98>}, {transform_indices = @transform_1, window_bounds = array<i64: 1, 16, 256>}, {transform_indices = @transform_2, window_bounds = array<i64: 1, 1, 256>}]} {
    %c0_i32 = arith.constant 0 : i32
    %0 = arith.cmpi eq, %arg1, %c0_i32 : i32
    %1 = arith.extui %0 : i1 to i32
    %c0_i32_0 = arith.constant 0 : i32
    %2 = arith.cmpi ne, %1, %c0_i32_0 : i32
    scf.if %2 {
      %cst_14 = arith.constant 0.000000e+00 : f32
      %15 = vector.broadcast %cst_14 : f32 to vector<1x256xf32>
      %c0_15 = arith.constant 0 : index
      %c0_16 = arith.constant 0 : index
      %16 = vector.load %arg5[%c0_15, %c0_16] : memref<1x256xf32, #tpu.memory_space<vmem>>, vector<1x256xf32>
      tpu.vector_store %arg5[%c0_15, %c0_16], %15 {strides = array<i32>} : memref<1x256xf32, #tpu.memory_space<vmem>>, vector<1x256xf32>,
      %cst_17 = arith.constant 0xFF800000 : f32
      %17 = vector.broadcast %cst_17 : f32 to vector<1x256xf32>
      %c0_18 = arith.constant 0 : index
      %c0_19 = arith.constant 0 : index
      %18 = vector.load %arg6[%c0_18, %c0_19] : memref<1x256xf32, #tpu.memory_space<vmem>>, vector<1x256xf32>
      tpu.vector_store %arg6[%c0_18, %c0_19], %17 {strides = array<i32>} : memref<1x256xf32, #tpu.memory_space<vmem>>, vector<1x256xf32>,
      %cst_20 = arith.constant 0.000000e+00 : f32
      %19 = vector.broadcast %cst_20 : f32 to vector<2x1x24x128xf32>
      %c0_21 = arith.constant 0 : index
      %c0_22 = arith.constant 0 : index
      %c0_23 = arith.constant 0 : index
      %c0_24 = arith.constant 0 : index
      %20 = vector.load %arg7[%c0_21, %c0_22, %c0_23, %c0_24] : memref<2x1x24x128xf32, #tpu.memory_space<vmem>>, vector<2x1x24x128xf32>
      tpu.vector_store %arg7[%c0_21, %c0_22, %c0_23, %c0_24], %19 {strides = array<i32>} : memref<2x1x24x128xf32, #tpu.memory_space<vmem>>, vector<2x1x24x128xf32>,
    } else {
    }
    %c0 = arith.constant 0 : index
    %c0_1 = arith.constant 0 : index
    %c0_2 = arith.constant 0 : index
    %3 = vector.load %arg3[%c0, %c0_1, %c0_2] : memref<1x16x256xf32, #tpu.memory_space<vmem>>, vector<1x16x256xf32>
    %c0_3 = arith.constant 0 : index
    %c0_4 = arith.constant 0 : index
    %4 = vector.load %arg5[%c0_3, %c0_4] : memref<1x256xf32, #tpu.memory_space<vmem>>, vector<1x256xf32>
    %cst = arith.constant dense<0.000000e+00> : vector<1x256xf32>
    %5 = vector.multi_reduction <add>, %3, %cst [1] : vector<1x16x256xf32> to vector<1x256xf32>
    %6 = arith.addf %4, %5 : vector<1x256xf32>
    %c0_5 = arith.constant 0 : index
    %c0_6 = arith.constant 0 : index
    %7 = vector.load %arg5[%c0_5, %c0_6] : memref<1x256xf32, #tpu.memory_space<vmem>>, vector<1x256xf32>
    tpu.vector_store %arg5[%c0_5, %c0_6], %6 {strides = array<i32>} : memref<1x256xf32, #tpu.memory_space<vmem>>, vector<1x256xf32>,
    %c0_7 = arith.constant 0 : index
    %c0_8 = arith.constant 0 : index
    %8 = vector.load %arg6[%c0_7, %c0_8] : memref<1x256xf32, #tpu.memory_space<vmem>>, vector<1x256xf32>
    %cst_9 = arith.constant dense<0xFF800000> : vector<1x256xf32>
    %9 = vector.multi_reduction <maximumf>, %3, %cst_9 [1] : vector<1x16x256xf32> to vector<1x256xf32>
    %10 = arith.maximumf %8, %9 : vector<1x256xf32>
    %c0_10 = arith.constant 0 : index
    %c0_11 = arith.constant 0 : index
    %11 = vector.load %arg6[%c0_10, %c0_11] : memref<1x256xf32, #tpu.memory_space<vmem>>, vector<1x256xf32>
    tpu.vector_store %arg6[%c0_10, %c0_11], %10 {strides = array<i32>} : memref<1x256xf32, #tpu.memory_space<vmem>>, vector<1x256xf32>,
    %c0_i32_12 = arith.constant 0 : i32
    %12 = arith.cmpi eq, %arg1, %c0_i32_12 : i32
    %13 = arith.extui %12 : i1 to i32
    %c0_i32_13 = arith.constant 0 : i32
    %14 = arith.cmpi ne, %13, %c0_i32_13 : i32
    scf.if %14 {
      %c0_14 = arith.constant 0 : index
      %c0_15 = arith.constant 0 : index
      %15 = vector.load %arg5[%c0_14, %c0_15] : memref<1x256xf32, #tpu.memory_space<vmem>>, vector<1x256xf32>
      %cst_16 = arith.constant 6.250000e-02 : f32
      %16 = vector.broadcast %cst_16 : f32 to vector<1x256xf32>
      %17 = arith.mulf %15, %16 : vector<1x256xf32>
      %18 = vector.shape_cast %17 : vector<1x256xf32> to vector<1x16x16xf32>
      %c0_17 = arith.constant 0 : index
      %c0_18 = arith.constant 0 : index
      %19 = vector.load %arg6[%c0_17, %c0_18] : memref<1x256xf32, #tpu.memory_space<vmem>>, vector<1x256xf32>
      %20 = vector.shape_cast %19 : vector<1x256xf32> to vector<1x16x16xf32>
      %c0_19 = arith.constant 0 : index
      %c0_20 = arith.constant 0 : index
      %c3 = arith.constant 3 : index
      %c3_21 = arith.constant 3 : index
      %21 = vector.load %arg7[%c0_19, %c0_20, %c3, %c3_21] : memref<2x1x24x128xf32, #tpu.memory_space<vmem>>, vector<1x1x16x16xf32>
      %22 = vector.shape_cast %21 : vector<1x1x16x16xf32> to vector<1x16x16xf32>
      %23 = vector.shape_cast %18 : vector<1x16x16xf32> to vector<1x1x16x16xf32>
      tpu.vector_store %arg7[%c0_19, %c0_20, %c3, %c3_21], %23 {strides = array<i32>} : memref<2x1x24x128xf32, #tpu.memory_space<vmem>>, vector<1x1x16x16xf32>,
      %c1 = arith.constant 1 : index
      %c0_22 = arith.constant 0 : index
      %c3_23 = arith.constant 3 : index
      %c3_24 = arith.constant 3 : index
      %24 = vector.load %arg7[%c1, %c0_22, %c3_23, %c3_24] : memref<2x1x24x128xf32, #tpu.memory_space<vmem>>, vector<1x1x16x16xf32>
      %25 = vector.shape_cast %24 : vector<1x1x16x16xf32> to vector<1x16x16xf32>
      %26 = vector.shape_cast %20 : vector<1x16x16xf32> to vector<1x1x16x16xf32>
      tpu.vector_store %arg7[%c1, %c0_22, %c3_23, %c3_24], %26 {strides = array<i32>} : memref<2x1x24x128xf32, #tpu.memory_space<vmem>>, vector<1x1x16x16xf32>,
      %cst_25 = arith.constant 0.000000e+00 : f32
      %27 = vector.broadcast %cst_25 : f32 to vector<1x16x16xf32>
      %cst_26 = arith.constant 0.000000e+00 : f32
      %28 = vector.broadcast %cst_26 : f32 to vector<1x16x16xf32>
      %cst_27 = arith.constant 0.000000e+00 : f32
      %29 = vector.broadcast %cst_27 : f32 to vector<1x16x16xf32>
      %cst_28 = arith.constant 0.000000e+00 : f32
      %30 = vector.broadcast %cst_28 : f32 to vector<1x16x16xf32>
      %c0_29 = arith.constant 0 : index
      %c0_30 = arith.constant 0 : index
      %c0_31 = arith.constant 0 : index
      %c0_32 = arith.constant 0 : index
      %31 = vector.load %arg7[%c0_29, %c0_30, %c0_31, %c0_32] : memref<2x1x24x128xf32, #tpu.memory_space<vmem>>, vector<1x1x24x128xf32>
      %32 = vector.shape_cast %31 : vector<1x1x24x128xf32> to vector<1x24x128xf32>
      %33 = vector.extract_strided_slice %32 {offsets = [0, 0, 0], sizes = [1, 24, 16], strides = [1, 1, 1]} : vector<1x24x128xf32> to vector<1x24x16xf32>
      %c0_33 = arith.constant 0 : index
      %34 = memref.load %arg2[%c0_33] : memref<98xf32, #tpu.memory_space<smem>>
      %35 = vector.extract_strided_slice %33 {offsets = [0, 0, 0], sizes = [1, 16, 16], strides = [1, 1, 1]} : vector<1x24x16xf32> to vector<1x16x16xf32>
      %36 = vector.broadcast %34 : f32 to vector<1x16x16xf32>
      %37 = arith.mulf %35, %36 : vector<1x16x16xf32>
      %38 = arith.addf %27, %37 : vector<1x16x16xf32>
      %c7 = arith.constant 7 : index
      %39 = memref.load %arg2[%c7] : memref<98xf32, #tpu.memory_space<smem>>
      %40 = vector.extract_strided_slice %33 {offsets = [0, 1, 0], sizes = [1, 16, 16], strides = [1, 1, 1]} : vector<1x24x16xf32> to vector<1x16x16xf32>
      %41 = vector.broadcast %39 : f32 to vector<1x16x16xf32>
      %42 = arith.mulf %40, %41 : vector<1x16x16xf32>
      %43 = arith.addf %28, %42 : vector<1x16x16xf32>
      %c14 = arith.constant 14 : index
      %44 = memref.load %arg2[%c14] : memref<98xf32, #tpu.memory_space<smem>>
      %45 = vector.extract_strided_slice %33 {offsets = [0, 2, 0], sizes = [1, 16, 16], strides = [1, 1, 1]} : vector<1x24x16xf32> to vector<1x16x16xf32>
      %46 = vector.broadcast %44 : f32 to vector<1x16x16xf32>
      %47 = arith.mulf %45, %46 : vector<1x16x16xf32>
      %48 = arith.addf %29, %47 : vector<1x16x16xf32>
      %c21 = arith.constant 21 : index
      %49 = memref.load %arg2[%c21] : memref<98xf32, #tpu.memory_space<smem>>
      %50 = vector.extract_strided_slice %33 {offsets = [0, 3, 0], sizes = [1, 16, 16], strides = [1, 1, 1]} : vector<1x24x16xf32> to vector<1x16x16xf32>
      %51 = vector.broadcast %49 : f32 to vector<1x16x16xf32>
      %52 = arith.mulf %50, %51 : vector<1x16x16xf32>
      %53 = arith.addf %30, %52 : vector<1x16x16xf32>
      %c28 = arith.constant 28 : index
      %54 = memref.load %arg2[%c28] : memref<98xf32, #tpu.memory_space<smem>>
      %55 = vector.extract_strided_slice %33 {offsets = [0, 4, 0], sizes = [1, 16, 16], strides = [1, 1, 1]} : vector<1x24x16xf32> to vector<1x16x16xf32>
      %56 = vector.broadcast %54 : f32 to vector<1x16x16xf32>
      %57 = arith.mulf %55, %56 : vector<1x16x16xf32>
      %58 = arith.addf %38, %57 : vector<1x16x16xf32>
      %c35 = arith.constant 35 : index
      %59 = memref.load %arg2[%c35] : memref<98xf32, #tpu.memory_space<smem>>
      %60 = vector.extract_strided_slice %33 {offsets = [0, 5, 0], sizes = [1, 16, 16], strides = [1, 1, 1]} : vector<1x24x16xf32> to vector<1x16x16xf32>
      %61 = vector.broadcast %59 : f32 to vector<1x16x16xf32>
      %62 = arith.mulf %60, %61 : vector<1x16x16xf32>
      %63 = arith.addf %43, %62 : vector<1x16x16xf32>
      %c42 = arith.constant 42 : index
      %64 = memref.load %arg2[%c42] : memref<98xf32, #tpu.memory_space<smem>>
      %65 = vector.extract_strided_slice %33 {offsets = [0, 6, 0], sizes = [1, 16, 16], strides = [1, 1, 1]} : vector<1x24x16xf32> to vector<1x16x16xf32>
      %66 = vector.broadcast %64 : f32 to vector<1x16x16xf32>
      %67 = arith.mulf %65, %66 : vector<1x16x16xf32>
      %68 = arith.addf %48, %67 : vector<1x16x16xf32>
      %69 = vector.extract_strided_slice %32 {offsets = [0, 0, 1], sizes = [1, 24, 16], strides = [1, 1, 1]} : vector<1x24x128xf32> to vector<1x24x16xf32>
      %c1_34 = arith.constant 1 : index
      %70 = memref.load %arg2[%c1_34] : memref<98xf32, #tpu.memory_space<smem>>
      %71 = vector.extract_strided_slice %69 {offsets = [0, 0, 0], sizes = [1, 16, 16], strides = [1, 1, 1]} : vector<1x24x16xf32> to vector<1x16x16xf32>
      %72 = vector.broadcast %70 : f32 to vector<1x16x16xf32>
      %73 = arith.mulf %71, %72 : vector<1x16x16xf32>
      %74 = arith.addf %58, %73 : vector<1x16x16xf32>
      %c8 = arith.constant 8 : index
      %75 = memref.load %arg2[%c8] : memref<98xf32, #tpu.memory_space<smem>>
      %76 = vector.extract_strided_slice %69 {offsets = [0, 1, 0], sizes = [1, 16, 16], strides = [1, 1, 1]} : vector<1x24x16xf32> to vector<1x16x16xf32>
      %77 = vector.broadcast %75 : f32 to vector<1x16x16xf32>
      %78 = arith.mulf %76, %77 : vector<1x16x16xf32>
      %79 = arith.addf %63, %78 : vector<1x16x16xf32>
      %c15 = arith.constant 15 : index
      %80 = memref.load %arg2[%c15] : memref<98xf32, #tpu.memory_space<smem>>
      %81 = vector.extract_strided_slice %69 {offsets = [0, 2, 0], sizes = [1, 16, 16], strides = [1, 1, 1]} : vector<1x24x16xf32> to vector<1x16x16xf32>
      %82 = vector.broadcast %80 : f32 to vector<1x16x16xf32>
      %83 = arith.mulf %81, %82 : vector<1x16x16xf32>
      %84 = arith.addf %68, %83 : vector<1x16x16xf32>
      %c22 = arith.constant 22 : index
      %85 = memref.load %arg2[%c22] : memref<98xf32, #tpu.memory_space<smem>>
      %86 = vector.extract_strided_slice %69 {offsets = [0, 3, 0], sizes = [1, 16, 16], strides = [1, 1, 1]} : vector<1x24x16xf32> to vector<1x16x16xf32>
      %87 = vector.broadcast %85 : f32 to vector<1x16x16xf32>
      %88 = arith.mulf %86, %87 : vector<1x16x16xf32>
      %89 = arith.addf %53, %88 : vector<1x16x16xf32>
      %c29 = arith.constant 29 : index
      %90 = memref.load %arg2[%c29] : memref<98xf32, #tpu.memory_space<smem>>
      %91 = vector.extract_strided_slice %69 {offsets = [0, 4, 0], sizes = [1, 16, 16], strides = [1, 1, 1]} : vector<1x24x16xf32> to vector<1x16x16xf32>
      %92 = vector.broadcast %90 : f32 to vector<1x16x16xf32>
      %93 = arith.mulf %91, %92 : vector<1x16x16xf32>
      %94 = arith.addf %74, %93 : vector<1x16x16xf32>
      %c36 = arith.constant 36 : index
      %95 = memref.load %arg2[%c36] : memref<98xf32, #tpu.memory_space<smem>>
      %96 = vector.extract_strided_slice %69 {offsets = [0, 5, 0], sizes = [1, 16, 16], strides = [1, 1, 1]} : vector<1x24x16xf32> to vector<1x16x16xf32>
      %97 = vector.broadcast %95 : f32 to vector<1x16x16xf32>
      %98 = arith.mulf %96, %97 : vector<1x16x16xf32>
      %99 = arith.addf %79, %98 : vector<1x16x16xf32>
      %c43 = arith.constant 43 : index
      %100 = memref.load %arg2[%c43] : memref<98xf32, #tpu.memory_space<smem>>
      %101 = vector.extract_strided_slice %69 {offsets = [0, 6, 0], sizes = [1, 16, 16], strides = [1, 1, 1]} : vector<1x24x16xf32> to vector<1x16x16xf32>
      %102 = vector.broadcast %100 : f32 to vector<1x16x16xf32>
      %103 = arith.mulf %101, %102 : vector<1x16x16xf32>
      %104 = arith.addf %84, %103 : vector<1x16x16xf32>
      %105 = vector.extract_strided_slice %32 {offsets = [0, 0, 2], sizes = [1, 24, 16], strides = [1, 1, 1]} : vector<1x24x128xf32> to vector<1x24x16xf32>
      %c2 = arith.constant 2 : index
      %106 = memref.load %arg2[%c2] : memref<98xf32, #tpu.memory_space<smem>>
      %107 = vector.extract_strided_slice %105 {offsets = [0, 0, 0], sizes = [1, 16, 16], strides = [1, 1, 1]} : vector<1x24x16xf32> to vector<1x16x16xf32>
      %108 = vector.broadcast %106 : f32 to vector<1x16x16xf32>
      %109 = arith.mulf %107, %108 : vector<1x16x16xf32>
      %110 = arith.addf %94, %109 : vector<1x16x16xf32>
      %c9 = arith.constant 9 : index
      %111 = memref.load %arg2[%c9] : memref<98xf32, #tpu.memory_space<smem>>
      %112 = vector.extract_strided_slice %105 {offsets = [0, 1, 0], sizes = [1, 16, 16], strides = [1, 1, 1]} : vector<1x24x16xf32> to vector<1x16x16xf32>
      %113 = vector.broadcast %111 : f32 to vector<1x16x16xf32>
      %114 = arith.mulf %112, %113 : vector<1x16x16xf32>
      %115 = arith.addf %99, %114 : vector<1x16x16xf32>
      %c16 = arith.constant 16 : index
      %116 = memref.load %arg2[%c16] : memref<98xf32, #tpu.memory_space<smem>>
      %117 = vector.extract_strided_slice %105 {offsets = [0, 2, 0], sizes = [1, 16, 16], strides = [1, 1, 1]} : vector<1x24x16xf32> to vector<1x16x16xf32>
      %118 = vector.broadcast %116 : f32 to vector<1x16x16xf32>
      %119 = arith.mulf %117, %118 : vector<1x16x16xf32>
      %120 = arith.addf %104, %119 : vector<1x16x16xf32>
      %c23 = arith.constant 23 : index
      %121 = memref.load %arg2[%c23] : memref<98xf32, #tpu.memory_space<smem>>
      %122 = vector.extract_strided_slice %105 {offsets = [0, 3, 0], sizes = [1, 16, 16], strides = [1, 1, 1]} : vector<1x24x16xf32> to vector<1x16x16xf32>
      %123 = vector.broadcast %121 : f32 to vector<1x16x16xf32>
      %124 = arith.mulf %122, %123 : vector<1x16x16xf32>
      %125 = arith.addf %89, %124 : vector<1x16x16xf32>
      %c30 = arith.constant 30 : index
      %126 = memref.load %arg2[%c30] : memref<98xf32, #tpu.memory_space<smem>>
      %127 = vector.extract_strided_slice %105 {offsets = [0, 4, 0], sizes = [1, 16, 16], strides = [1, 1, 1]} : vector<1x24x16xf32> to vector<1x16x16xf32>
      %128 = vector.broadcast %126 : f32 to vector<1x16x16xf32>
      %129 = arith.mulf %127, %128 : vector<1x16x16xf32>
      %130 = arith.addf %110, %129 : vector<1x16x16xf32>
      %c37 = arith.constant 37 : index
      %131 = memref.load %arg2[%c37] : memref<98xf32, #tpu.memory_space<smem>>
      %132 = vector.extract_strided_slice %105 {offsets = [0, 5, 0], sizes = [1, 16, 16], strides = [1, 1, 1]} : vector<1x24x16xf32> to vector<1x16x16xf32>
      %133 = vector.broadcast %131 : f32 to vector<1x16x16xf32>
      %134 = arith.mulf %132, %133 : vector<1x16x16xf32>
      %135 = arith.addf %115, %134 : vector<1x16x16xf32>
      %c44 = arith.constant 44 : index
      %136 = memref.load %arg2[%c44] : memref<98xf32, #tpu.memory_space<smem>>
      %137 = vector.extract_strided_slice %105 {offsets = [0, 6, 0], sizes = [1, 16, 16], strides = [1, 1, 1]} : vector<1x24x16xf32> to vector<1x16x16xf32>
      %138 = vector.broadcast %136 : f32 to vector<1x16x16xf32>
      %139 = arith.mulf %137, %138 : vector<1x16x16xf32>
      %140 = arith.addf %120, %139 : vector<1x16x16xf32>
      %141 = vector.extract_strided_slice %32 {offsets = [0, 0, 3], sizes = [1, 24, 16], strides = [1, 1, 1]} : vector<1x24x128xf32> to vector<1x24x16xf32>
      %c3_35 = arith.constant 3 : index
      %142 = memref.load %arg2[%c3_35] : memref<98xf32, #tpu.memory_space<smem>>
      %143 = vector.extract_strided_slice %141 {offsets = [0, 0, 0], sizes = [1, 16, 16], strides = [1, 1, 1]} : vector<1x24x16xf32> to vector<1x16x16xf32>
      %144 = vector.broadcast %142 : f32 to vector<1x16x16xf32>
      %145 = arith.mulf %143, %144 : vector<1x16x16xf32>
      %146 = arith.addf %130, %145 : vector<1x16x16xf32>
      %c10 = arith.constant 10 : index
      %147 = memref.load %arg2[%c10] : memref<98xf32, #tpu.memory_space<smem>>
      %148 = vector.extract_strided_slice %141 {offsets = [0, 1, 0], sizes = [1, 16, 16], strides = [1, 1, 1]} : vector<1x24x16xf32> to vector<1x16x16xf32>
      %149 = vector.broadcast %147 : f32 to vector<1x16x16xf32>
      %150 = arith.mulf %148, %149 : vector<1x16x16xf32>
      %151 = arith.addf %135, %150 : vector<1x16x16xf32>
      %c17 = arith.constant 17 : index
      %152 = memref.load %arg2[%c17] : memref<98xf32, #tpu.memory_space<smem>>
      %153 = vector.extract_strided_slice %141 {offsets = [0, 2, 0], sizes = [1, 16, 16], strides = [1, 1, 1]} : vector<1x24x16xf32> to vector<1x16x16xf32>
      %154 = vector.broadcast %152 : f32 to vector<1x16x16xf32>
      %155 = arith.mulf %153, %154 : vector<1x16x16xf32>
      %156 = arith.addf %140, %155 : vector<1x16x16xf32>
      %c24 = arith.constant 24 : index
      %157 = memref.load %arg2[%c24] : memref<98xf32, #tpu.memory_space<smem>>
      %158 = vector.extract_strided_slice %141 {offsets = [0, 3, 0], sizes = [1, 16, 16], strides = [1, 1, 1]} : vector<1x24x16xf32> to vector<1x16x16xf32>
      %159 = vector.broadcast %157 : f32 to vector<1x16x16xf32>
      %160 = arith.mulf %158, %159 : vector<1x16x16xf32>
      %161 = arith.addf %125, %160 : vector<1x16x16xf32>
      %c31 = arith.constant 31 : index
      %162 = memref.load %arg2[%c31] : memref<98xf32, #tpu.memory_space<smem>>
      %163 = vector.extract_strided_slice %141 {offsets = [0, 4, 0], sizes = [1, 16, 16], strides = [1, 1, 1]} : vector<1x24x16xf32> to vector<1x16x16xf32>
      %164 = vector.broadcast %162 : f32 to vector<1x16x16xf32>
      %165 = arith.mulf %163, %164 : vector<1x16x16xf32>
      %166 = arith.addf %146, %165 : vector<1x16x16xf32>
      %c38 = arith.constant 38 : index
      %167 = memref.load %arg2[%c38] : memref<98xf32, #tpu.memory_space<smem>>
      %168 = vector.extract_strided_slice %141 {offsets = [0, 5, 0], sizes = [1, 16, 16], strides = [1, 1, 1]} : vector<1x24x16xf32> to vector<1x16x16xf32>
      %169 = vector.broadcast %167 : f32 to vector<1x16x16xf32>
      %170 = arith.mulf %168, %169 : vector<1x16x16xf32>
      %171 = arith.addf %151, %170 : vector<1x16x16xf32>
      %c45 = arith.constant 45 : index
      %172 = memref.load %arg2[%c45] : memref<98xf32, #tpu.memory_space<smem>>
      %173 = vector.extract_strided_slice %141 {offsets = [0, 6, 0], sizes = [1, 16, 16], strides = [1, 1, 1]} : vector<1x24x16xf32> to vector<1x16x16xf32>
      %174 = vector.broadcast %172 : f32 to vector<1x16x16xf32>
      %175 = arith.mulf %173, %174 : vector<1x16x16xf32>
      %176 = arith.addf %156, %175 : vector<1x16x16xf32>
      %177 = vector.extract_strided_slice %32 {offsets = [0, 0, 4], sizes = [1, 24, 16], strides = [1, 1, 1]} : vector<1x24x128xf32> to vector<1x24x16xf32>
      %c4 = arith.constant 4 : index
      %178 = memref.load %arg2[%c4] : memref<98xf32, #tpu.memory_space<smem>>
      %179 = vector.extract_strided_slice %177 {offsets = [0, 0, 0], sizes = [1, 16, 16], strides = [1, 1, 1]} : vector<1x24x16xf32> to vector<1x16x16xf32>
      %180 = vector.broadcast %178 : f32 to vector<1x16x16xf32>
      %181 = arith.mulf %179, %180 : vector<1x16x16xf32>
      %182 = arith.addf %166, %181 : vector<1x16x16xf32>
      %c11 = arith.constant 11 : index
      %183 = memref.load %arg2[%c11] : memref<98xf32, #tpu.memory_space<smem>>
      %184 = vector.extract_strided_slice %177 {offsets = [0, 1, 0], sizes = [1, 16, 16], strides = [1, 1, 1]} : vector<1x24x16xf32> to vector<1x16x16xf32>
      %185 = vector.broadcast %183 : f32 to vector<1x16x16xf32>
      %186 = arith.mulf %184, %185 : vector<1x16x16xf32>
      %187 = arith.addf %171, %186 : vector<1x16x16xf32>
      %c18 = arith.constant 18 : index
      %188 = memref.load %arg2[%c18] : memref<98xf32, #tpu.memory_space<smem>>
      %189 = vector.extract_strided_slice %177 {offsets = [0, 2, 0], sizes = [1, 16, 16], strides = [1, 1, 1]} : vector<1x24x16xf32> to vector<1x16x16xf32>
      %190 = vector.broadcast %188 : f32 to vector<1x16x16xf32>
      %191 = arith.mulf %189, %190 : vector<1x16x16xf32>
      %192 = arith.addf %176, %191 : vector<1x16x16xf32>
      %c25 = arith.constant 25 : index
      %193 = memref.load %arg2[%c25] : memref<98xf32, #tpu.memory_space<smem>>
      %194 = vector.extract_strided_slice %177 {offsets = [0, 3, 0], sizes = [1, 16, 16], strides = [1, 1, 1]} : vector<1x24x16xf32> to vector<1x16x16xf32>
      %195 = vector.broadcast %193 : f32 to vector<1x16x16xf32>
      %196 = arith.mulf %194, %195 : vector<1x16x16xf32>
      %197 = arith.addf %161, %196 : vector<1x16x16xf32>
      %c32 = arith.constant 32 : index
      %198 = memref.load %arg2[%c32] : memref<98xf32, #tpu.memory_space<smem>>
      %199 = vector.extract_strided_slice %177 {offsets = [0, 4, 0], sizes = [1, 16, 16], strides = [1, 1, 1]} : vector<1x24x16xf32> to vector<1x16x16xf32>
      %200 = vector.broadcast %198 : f32 to vector<1x16x16xf32>
      %201 = arith.mulf %199, %200 : vector<1x16x16xf32>
      %202 = arith.addf %182, %201 : vector<1x16x16xf32>
      %c39 = arith.constant 39 : index
      %203 = memref.load %arg2[%c39] : memref<98xf32, #tpu.memory_space<smem>>
      %204 = vector.extract_strided_slice %177 {offsets = [0, 5, 0], sizes = [1, 16, 16], strides = [1, 1, 1]} : vector<1x24x16xf32> to vector<1x16x16xf32>
      %205 = vector.broadcast %203 : f32 to vector<1x16x16xf32>
      %206 = arith.mulf %204, %205 : vector<1x16x16xf32>
      %207 = arith.addf %187, %206 : vector<1x16x16xf32>
      %c46 = arith.constant 46 : index
      %208 = memref.load %arg2[%c46] : memref<98xf32, #tpu.memory_space<smem>>
      %209 = vector.extract_strided_slice %177 {offsets = [0, 6, 0], sizes = [1, 16, 16], strides = [1, 1, 1]} : vector<1x24x16xf32> to vector<1x16x16xf32>
      %210 = vector.broadcast %208 : f32 to vector<1x16x16xf32>
      %211 = arith.mulf %209, %210 : vector<1x16x16xf32>
      %212 = arith.addf %192, %211 : vector<1x16x16xf32>
      %213 = vector.extract_strided_slice %32 {offsets = [0, 0, 5], sizes = [1, 24, 16], strides = [1, 1, 1]} : vector<1x24x128xf32> to vector<1x24x16xf32>
      %c5 = arith.constant 5 : index
      %214 = memref.load %arg2[%c5] : memref<98xf32, #tpu.memory_space<smem>>
      %215 = vector.extract_strided_slice %213 {offsets = [0, 0, 0], sizes = [1, 16, 16], strides = [1, 1, 1]} : vector<1x24x16xf32> to vector<1x16x16xf32>
      %216 = vector.broadcast %214 : f32 to vector<1x16x16xf32>
      %217 = arith.mulf %215, %216 : vector<1x16x16xf32>
      %218 = arith.addf %202, %217 : vector<1x16x16xf32>
      %c12 = arith.constant 12 : index
      %219 = memref.load %arg2[%c12] : memref<98xf32, #tpu.memory_space<smem>>
      %220 = vector.extract_strided_slice %213 {offsets = [0, 1, 0], sizes = [1, 16, 16], strides = [1, 1, 1]} : vector<1x24x16xf32> to vector<1x16x16xf32>
      %221 = vector.broadcast %219 : f32 to vector<1x16x16xf32>
      %222 = arith.mulf %220, %221 : vector<1x16x16xf32>
      %223 = arith.addf %207, %222 : vector<1x16x16xf32>
      %c19 = arith.constant 19 : index
      %224 = memref.load %arg2[%c19] : memref<98xf32, #tpu.memory_space<smem>>
      %225 = vector.extract_strided_slice %213 {offsets = [0, 2, 0], sizes = [1, 16, 16], strides = [1, 1, 1]} : vector<1x24x16xf32> to vector<1x16x16xf32>
      %226 = vector.broadcast %224 : f32 to vector<1x16x16xf32>
      %227 = arith.mulf %225, %226 : vector<1x16x16xf32>
      %228 = arith.addf %212, %227 : vector<1x16x16xf32>
      %c26 = arith.constant 26 : index
      %229 = memref.load %arg2[%c26] : memref<98xf32, #tpu.memory_space<smem>>
      %230 = vector.extract_strided_slice %213 {offsets = [0, 3, 0], sizes = [1, 16, 16], strides = [1, 1, 1]} : vector<1x24x16xf32> to vector<1x16x16xf32>
      %231 = vector.broadcast %229 : f32 to vector<1x16x16xf32>
      %232 = arith.mulf %230, %231 : vector<1x16x16xf32>
      %233 = arith.addf %197, %232 : vector<1x16x16xf32>
      %c33 = arith.constant 33 : index
      %234 = memref.load %arg2[%c33] : memref<98xf32, #tpu.memory_space<smem>>
      %235 = vector.extract_strided_slice %213 {offsets = [0, 4, 0], sizes = [1, 16, 16], strides = [1, 1, 1]} : vector<1x24x16xf32> to vector<1x16x16xf32>
      %236 = vector.broadcast %234 : f32 to vector<1x16x16xf32>
      %237 = arith.mulf %235, %236 : vector<1x16x16xf32>
      %238 = arith.addf %218, %237 : vector<1x16x16xf32>
      %c40 = arith.constant 40 : index
      %239 = memref.load %arg2[%c40] : memref<98xf32, #tpu.memory_space<smem>>
      %240 = vector.extract_strided_slice %213 {offsets = [0, 5, 0], sizes = [1, 16, 16], strides = [1, 1, 1]} : vector<1x24x16xf32> to vector<1x16x16xf32>
      %241 = vector.broadcast %239 : f32 to vector<1x16x16xf32>
      %242 = arith.mulf %240, %241 : vector<1x16x16xf32>
      %243 = arith.addf %223, %242 : vector<1x16x16xf32>
      %c47 = arith.constant 47 : index
      %244 = memref.load %arg2[%c47] : memref<98xf32, #tpu.memory_space<smem>>
      %245 = vector.extract_strided_slice %213 {offsets = [0, 6, 0], sizes = [1, 16, 16], strides = [1, 1, 1]} : vector<1x24x16xf32> to vector<1x16x16xf32>
      %246 = vector.broadcast %244 : f32 to vector<1x16x16xf32>
      %247 = arith.mulf %245, %246 : vector<1x16x16xf32>
      %248 = arith.addf %228, %247 : vector<1x16x16xf32>
      %249 = vector.extract_strided_slice %32 {offsets = [0, 0, 6], sizes = [1, 24, 16], strides = [1, 1, 1]} : vector<1x24x128xf32> to vector<1x24x16xf32>
      %c6 = arith.constant 6 : index
      %250 = memref.load %arg2[%c6] : memref<98xf32, #tpu.memory_space<smem>>
      %251 = vector.extract_strided_slice %249 {offsets = [0, 0, 0], sizes = [1, 16, 16], strides = [1, 1, 1]} : vector<1x24x16xf32> to vector<1x16x16xf32>
      %252 = vector.broadcast %250 : f32 to vector<1x16x16xf32>
      %253 = arith.mulf %251, %252 : vector<1x16x16xf32>
      %254 = arith.addf %238, %253 : vector<1x16x16xf32>
      %c13 = arith.constant 13 : index
      %255 = memref.load %arg2[%c13] : memref<98xf32, #tpu.memory_space<smem>>
      %256 = vector.extract_strided_slice %249 {offsets = [0, 1, 0], sizes = [1, 16, 16], strides = [1, 1, 1]} : vector<1x24x16xf32> to vector<1x16x16xf32>
      %257 = vector.broadcast %255 : f32 to vector<1x16x16xf32>
      %258 = arith.mulf %256, %257 : vector<1x16x16xf32>
      %259 = arith.addf %243, %258 : vector<1x16x16xf32>
      %c20 = arith.constant 20 : index
      %260 = memref.load %arg2[%c20] : memref<98xf32, #tpu.memory_space<smem>>
      %261 = vector.extract_strided_slice %249 {offsets = [0, 2, 0], sizes = [1, 16, 16], strides = [1, 1, 1]} : vector<1x24x16xf32> to vector<1x16x16xf32>
      %262 = vector.broadcast %260 : f32 to vector<1x16x16xf32>
      %263 = arith.mulf %261, %262 : vector<1x16x16xf32>
      %264 = arith.addf %248, %263 : vector<1x16x16xf32>
      %c27 = arith.constant 27 : index
      %265 = memref.load %arg2[%c27] : memref<98xf32, #tpu.memory_space<smem>>
      %266 = vector.extract_strided_slice %249 {offsets = [0, 3, 0], sizes = [1, 16, 16], strides = [1, 1, 1]} : vector<1x24x16xf32> to vector<1x16x16xf32>
      %267 = vector.broadcast %265 : f32 to vector<1x16x16xf32>
      %268 = arith.mulf %266, %267 : vector<1x16x16xf32>
      %269 = arith.addf %233, %268 : vector<1x16x16xf32>
      %c34 = arith.constant 34 : index
      %270 = memref.load %arg2[%c34] : memref<98xf32, #tpu.memory_space<smem>>
      %271 = vector.extract_strided_slice %249 {offsets = [0, 4, 0], sizes = [1, 16, 16], strides = [1, 1, 1]} : vector<1x24x16xf32> to vector<1x16x16xf32>
      %272 = vector.broadcast %270 : f32 to vector<1x16x16xf32>
      %273 = arith.mulf %271, %272 : vector<1x16x16xf32>
      %274 = arith.addf %254, %273 : vector<1x16x16xf32>
      %c41 = arith.constant 41 : index
      %275 = memref.load %arg2[%c41] : memref<98xf32, #tpu.memory_space<smem>>
      %276 = vector.extract_strided_slice %249 {offsets = [0, 5, 0], sizes = [1, 16, 16], strides = [1, 1, 1]} : vector<1x24x16xf32> to vector<1x16x16xf32>
      %277 = vector.broadcast %275 : f32 to vector<1x16x16xf32>
      %278 = arith.mulf %276, %277 : vector<1x16x16xf32>
      %279 = arith.addf %259, %278 : vector<1x16x16xf32>
      %c48 = arith.constant 48 : index
      %280 = memref.load %arg2[%c48] : memref<98xf32, #tpu.memory_space<smem>>
      %281 = vector.extract_strided_slice %249 {offsets = [0, 6, 0], sizes = [1, 16, 16], strides = [1, 1, 1]} : vector<1x24x16xf32> to vector<1x16x16xf32>
      %282 = vector.broadcast %280 : f32 to vector<1x16x16xf32>
      %283 = arith.mulf %281, %282 : vector<1x16x16xf32>
      %284 = arith.addf %264, %283 : vector<1x16x16xf32>
      %c1_36 = arith.constant 1 : index
      %c0_37 = arith.constant 0 : index
      %c0_38 = arith.constant 0 : index
      %c0_39 = arith.constant 0 : index
      %285 = vector.load %arg7[%c1_36, %c0_37, %c0_38, %c0_39] : memref<2x1x24x128xf32, #tpu.memory_space<vmem>>, vector<1x1x24x128xf32>
      %286 = vector.shape_cast %285 : vector<1x1x24x128xf32> to vector<1x24x128xf32>
      %287 = vector.extract_strided_slice %286 {offsets = [0, 0, 0], sizes = [1, 24, 16], strides = [1, 1, 1]} : vector<1x24x128xf32> to vector<1x24x16xf32>
      %c49 = arith.constant 49 : index
      %288 = memref.load %arg2[%c49] : memref<98xf32, #tpu.memory_space<smem>>
      %289 = vector.extract_strided_slice %287 {offsets = [0, 0, 0], sizes = [1, 16, 16], strides = [1, 1, 1]} : vector<1x24x16xf32> to vector<1x16x16xf32>
      %290 = vector.broadcast %288 : f32 to vector<1x16x16xf32>
      %291 = arith.mulf %289, %290 : vector<1x16x16xf32>
      %292 = arith.addf %274, %291 : vector<1x16x16xf32>
      %c56 = arith.constant 56 : index
      %293 = memref.load %arg2[%c56] : memref<98xf32, #tpu.memory_space<smem>>
      %294 = vector.extract_strided_slice %287 {offsets = [0, 1, 0], sizes = [1, 16, 16], strides = [1, 1, 1]} : vector<1x24x16xf32> to vector<1x16x16xf32>
      %295 = vector.broadcast %293 : f32 to vector<1x16x16xf32>
      %296 = arith.mulf %294, %295 : vector<1x16x16xf32>
      %297 = arith.addf %279, %296 : vector<1x16x16xf32>
      %c63 = arith.constant 63 : index
      %298 = memref.load %arg2[%c63] : memref<98xf32, #tpu.memory_space<smem>>
      %299 = vector.extract_strided_slice %287 {offsets = [0, 2, 0], sizes = [1, 16, 16], strides = [1, 1, 1]} : vector<1x24x16xf32> to vector<1x16x16xf32>
      %300 = vector.broadcast %298 : f32 to vector<1x16x16xf32>
      %301 = arith.mulf %299, %300 : vector<1x16x16xf32>
      %302 = arith.addf %284, %301 : vector<1x16x16xf32>
      %c70 = arith.constant 70 : index
      %303 = memref.load %arg2[%c70] : memref<98xf32, #tpu.memory_space<smem>>
      %304 = vector.extract_strided_slice %287 {offsets = [0, 3, 0], sizes = [1, 16, 16], strides = [1, 1, 1]} : vector<1x24x16xf32> to vector<1x16x16xf32>
      %305 = vector.broadcast %303 : f32 to vector<1x16x16xf32>
      %306 = arith.mulf %304, %305 : vector<1x16x16xf32>
      %307 = arith.addf %269, %306 : vector<1x16x16xf32>
      %c77 = arith.constant 77 : index
      %308 = memref.load %arg2[%c77] : memref<98xf32, #tpu.memory_space<smem>>
      %309 = vector.extract_strided_slice %287 {offsets = [0, 4, 0], sizes = [1, 16, 16], strides = [1, 1, 1]} : vector<1x24x16xf32> to vector<1x16x16xf32>
      %310 = vector.broadcast %308 : f32 to vector<1x16x16xf32>
      %311 = arith.mulf %309, %310 : vector<1x16x16xf32>
      %312 = arith.addf %292, %311 : vector<1x16x16xf32>
      %c84 = arith.constant 84 : index
      %313 = memref.load %arg2[%c84] : memref<98xf32, #tpu.memory_space<smem>>
      %314 = vector.extract_strided_slice %287 {offsets = [0, 5, 0], sizes = [1, 16, 16], strides = [1, 1, 1]} : vector<1x24x16xf32> to vector<1x16x16xf32>
      %315 = vector.broadcast %313 : f32 to vector<1x16x16xf32>
      %316 = arith.mulf %314, %315 : vector<1x16x16xf32>
      %317 = arith.addf %297, %316 : vector<1x16x16xf32>
      %c91 = arith.constant 91 : index
      %318 = memref.load %arg2[%c91] : memref<98xf32, #tpu.memory_space<smem>>
      %319 = vector.extract_strided_slice %287 {offsets = [0, 6, 0], sizes = [1, 16, 16], strides = [1, 1, 1]} : vector<1x24x16xf32> to vector<1x16x16xf32>
      %320 = vector.broadcast %318 : f32 to vector<1x16x16xf32>
      %321 = arith.mulf %319, %320 : vector<1x16x16xf32>
      %322 = arith.addf %302, %321 : vector<1x16x16xf32>
      %323 = vector.extract_strided_slice %286 {offsets = [0, 0, 1], sizes = [1, 24, 16], strides = [1, 1, 1]} : vector<1x24x128xf32> to vector<1x24x16xf32>
      %c50 = arith.constant 50 : index
      %324 = memref.load %arg2[%c50] : memref<98xf32, #tpu.memory_space<smem>>
      %325 = vector.extract_strided_slice %323 {offsets = [0, 0, 0], sizes = [1, 16, 16], strides = [1, 1, 1]} : vector<1x24x16xf32> to vector<1x16x16xf32>
      %326 = vector.broadcast %324 : f32 to vector<1x16x16xf32>
      %327 = arith.mulf %325, %326 : vector<1x16x16xf32>
      %328 = arith.addf %312, %327 : vector<1x16x16xf32>
      %c57 = arith.constant 57 : index
      %329 = memref.load %arg2[%c57] : memref<98xf32, #tpu.memory_space<smem>>
      %330 = vector.extract_strided_slice %323 {offsets = [0, 1, 0], sizes = [1, 16, 16], strides = [1, 1, 1]} : vector<1x24x16xf32> to vector<1x16x16xf32>
      %331 = vector.broadcast %329 : f32 to vector<1x16x16xf32>
      %332 = arith.mulf %330, %331 : vector<1x16x16xf32>
      %333 = arith.addf %317, %332 : vector<1x16x16xf32>
      %c64 = arith.constant 64 : index
      %334 = memref.load %arg2[%c64] : memref<98xf32, #tpu.memory_space<smem>>
      %335 = vector.extract_strided_slice %323 {offsets = [0, 2, 0], sizes = [1, 16, 16], strides = [1, 1, 1]} : vector<1x24x16xf32> to vector<1x16x16xf32>
      %336 = vector.broadcast %334 : f32 to vector<1x16x16xf32>
      %337 = arith.mulf %335, %336 : vector<1x16x16xf32>
      %338 = arith.addf %322, %337 : vector<1x16x16xf32>
      %c71 = arith.constant 71 : index
      %339 = memref.load %arg2[%c71] : memref<98xf32, #tpu.memory_space<smem>>
      %340 = vector.extract_strided_slice %323 {offsets = [0, 3, 0], sizes = [1, 16, 16], strides = [1, 1, 1]} : vector<1x24x16xf32> to vector<1x16x16xf32>
      %341 = vector.broadcast %339 : f32 to vector<1x16x16xf32>
      %342 = arith.mulf %340, %341 : vector<1x16x16xf32>
      %343 = arith.addf %307, %342 : vector<1x16x16xf32>
      %c78 = arith.constant 78 : index
      %344 = memref.load %arg2[%c78] : memref<98xf32, #tpu.memory_space<smem>>
      %345 = vector.extract_strided_slice %323 {offsets = [0, 4, 0], sizes = [1, 16, 16], strides = [1, 1, 1]} : vector<1x24x16xf32> to vector<1x16x16xf32>
      %346 = vector.broadcast %344 : f32 to vector<1x16x16xf32>
      %347 = arith.mulf %345, %346 : vector<1x16x16xf32>
      %348 = arith.addf %328, %347 : vector<1x16x16xf32>
      %c85 = arith.constant 85 : index
      %349 = memref.load %arg2[%c85] : memref<98xf32, #tpu.memory_space<smem>>
      %350 = vector.extract_strided_slice %323 {offsets = [0, 5, 0], sizes = [1, 16, 16], strides = [1, 1, 1]} : vector<1x24x16xf32> to vector<1x16x16xf32>
      %351 = vector.broadcast %349 : f32 to vector<1x16x16xf32>
      %352 = arith.mulf %350, %351 : vector<1x16x16xf32>
      %353 = arith.addf %333, %352 : vector<1x16x16xf32>
      %c92 = arith.constant 92 : index
      %354 = memref.load %arg2[%c92] : memref<98xf32, #tpu.memory_space<smem>>
      %355 = vector.extract_strided_slice %323 {offsets = [0, 6, 0], sizes = [1, 16, 16], strides = [1, 1, 1]} : vector<1x24x16xf32> to vector<1x16x16xf32>
      %356 = vector.broadcast %354 : f32 to vector<1x16x16xf32>
      %357 = arith.mulf %355, %356 : vector<1x16x16xf32>
      %358 = arith.addf %338, %357 : vector<1x16x16xf32>
      %359 = vector.extract_strided_slice %286 {offsets = [0, 0, 2], sizes = [1, 24, 16], strides = [1, 1, 1]} : vector<1x24x128xf32> to vector<1x24x16xf32>
      %c51 = arith.constant 51 : index
      %360 = memref.load %arg2[%c51] : memref<98xf32, #tpu.memory_space<smem>>
      %361 = vector.extract_strided_slice %359 {offsets = [0, 0, 0], sizes = [1, 16, 16], strides = [1, 1, 1]} : vector<1x24x16xf32> to vector<1x16x16xf32>
      %362 = vector.broadcast %360 : f32 to vector<1x16x16xf32>
      %363 = arith.mulf %361, %362 : vector<1x16x16xf32>
      %364 = arith.addf %348, %363 : vector<1x16x16xf32>
      %c58 = arith.constant 58 : index
      %365 = memref.load %arg2[%c58] : memref<98xf32, #tpu.memory_space<smem>>
      %366 = vector.extract_strided_slice %359 {offsets = [0, 1, 0], sizes = [1, 16, 16], strides = [1, 1, 1]} : vector<1x24x16xf32> to vector<1x16x16xf32>
      %367 = vector.broadcast %365 : f32 to vector<1x16x16xf32>
      %368 = arith.mulf %366, %367 : vector<1x16x16xf32>
      %369 = arith.addf %353, %368 : vector<1x16x16xf32>
      %c65 = arith.constant 65 : index
      %370 = memref.load %arg2[%c65] : memref<98xf32, #tpu.memory_space<smem>>
      %371 = vector.extract_strided_slice %359 {offsets = [0, 2, 0], sizes = [1, 16, 16], strides = [1, 1, 1]} : vector<1x24x16xf32> to vector<1x16x16xf32>
      %372 = vector.broadcast %370 : f32 to vector<1x16x16xf32>
      %373 = arith.mulf %371, %372 : vector<1x16x16xf32>
      %374 = arith.addf %358, %373 : vector<1x16x16xf32>
      %c72 = arith.constant 72 : index
      %375 = memref.load %arg2[%c72] : memref<98xf32, #tpu.memory_space<smem>>
      %376 = vector.extract_strided_slice %359 {offsets = [0, 3, 0], sizes = [1, 16, 16], strides = [1, 1, 1]} : vector<1x24x16xf32> to vector<1x16x16xf32>
      %377 = vector.broadcast %375 : f32 to vector<1x16x16xf32>
      %378 = arith.mulf %376, %377 : vector<1x16x16xf32>
      %379 = arith.addf %343, %378 : vector<1x16x16xf32>
      %c79 = arith.constant 79 : index
      %380 = memref.load %arg2[%c79] : memref<98xf32, #tpu.memory_space<smem>>
      %381 = vector.extract_strided_slice %359 {offsets = [0, 4, 0], sizes = [1, 16, 16], strides = [1, 1, 1]} : vector<1x24x16xf32> to vector<1x16x16xf32>
      %382 = vector.broadcast %380 : f32 to vector<1x16x16xf32>
      %383 = arith.mulf %381, %382 : vector<1x16x16xf32>
      %384 = arith.addf %364, %383 : vector<1x16x16xf32>
      %c86 = arith.constant 86 : index
      %385 = memref.load %arg2[%c86] : memref<98xf32, #tpu.memory_space<smem>>
      %386 = vector.extract_strided_slice %359 {offsets = [0, 5, 0], sizes = [1, 16, 16], strides = [1, 1, 1]} : vector<1x24x16xf32> to vector<1x16x16xf32>
      %387 = vector.broadcast %385 : f32 to vector<1x16x16xf32>
      %388 = arith.mulf %386, %387 : vector<1x16x16xf32>
      %389 = arith.addf %369, %388 : vector<1x16x16xf32>
      %c93 = arith.constant 93 : index
      %390 = memref.load %arg2[%c93] : memref<98xf32, #tpu.memory_space<smem>>
      %391 = vector.extract_strided_slice %359 {offsets = [0, 6, 0], sizes = [1, 16, 16], strides = [1, 1, 1]} : vector<1x24x16xf32> to vector<1x16x16xf32>
      %392 = vector.broadcast %390 : f32 to vector<1x16x16xf32>
      %393 = arith.mulf %391, %392 : vector<1x16x16xf32>
      %394 = arith.addf %374, %393 : vector<1x16x16xf32>
      %395 = vector.extract_strided_slice %286 {offsets = [0, 0, 3], sizes = [1, 24, 16], strides = [1, 1, 1]} : vector<1x24x128xf32> to vector<1x24x16xf32>
      %c52 = arith.constant 52 : index
      %396 = memref.load %arg2[%c52] : memref<98xf32, #tpu.memory_space<smem>>
      %397 = vector.extract_strided_slice %395 {offsets = [0, 0, 0], sizes = [1, 16, 16], strides = [1, 1, 1]} : vector<1x24x16xf32> to vector<1x16x16xf32>
      %398 = vector.broadcast %396 : f32 to vector<1x16x16xf32>
      %399 = arith.mulf %397, %398 : vector<1x16x16xf32>
      %400 = arith.addf %384, %399 : vector<1x16x16xf32>
      %c59 = arith.constant 59 : index
      %401 = memref.load %arg2[%c59] : memref<98xf32, #tpu.memory_space<smem>>
      %402 = vector.extract_strided_slice %395 {offsets = [0, 1, 0], sizes = [1, 16, 16], strides = [1, 1, 1]} : vector<1x24x16xf32> to vector<1x16x16xf32>
      %403 = vector.broadcast %401 : f32 to vector<1x16x16xf32>
      %404 = arith.mulf %402, %403 : vector<1x16x16xf32>
      %405 = arith.addf %389, %404 : vector<1x16x16xf32>
      %c66 = arith.constant 66 : index
      %406 = memref.load %arg2[%c66] : memref<98xf32, #tpu.memory_space<smem>>
      %407 = vector.extract_strided_slice %395 {offsets = [0, 2, 0], sizes = [1, 16, 16], strides = [1, 1, 1]} : vector<1x24x16xf32> to vector<1x16x16xf32>
      %408 = vector.broadcast %406 : f32 to vector<1x16x16xf32>
      %409 = arith.mulf %407, %408 : vector<1x16x16xf32>
      %410 = arith.addf %394, %409 : vector<1x16x16xf32>
      %c73 = arith.constant 73 : index
      %411 = memref.load %arg2[%c73] : memref<98xf32, #tpu.memory_space<smem>>
      %412 = vector.extract_strided_slice %395 {offsets = [0, 3, 0], sizes = [1, 16, 16], strides = [1, 1, 1]} : vector<1x24x16xf32> to vector<1x16x16xf32>
      %413 = vector.broadcast %411 : f32 to vector<1x16x16xf32>
      %414 = arith.mulf %412, %413 : vector<1x16x16xf32>
      %415 = arith.addf %379, %414 : vector<1x16x16xf32>
      %c80 = arith.constant 80 : index
      %416 = memref.load %arg2[%c80] : memref<98xf32, #tpu.memory_space<smem>>
      %417 = vector.extract_strided_slice %395 {offsets = [0, 4, 0], sizes = [1, 16, 16], strides = [1, 1, 1]} : vector<1x24x16xf32> to vector<1x16x16xf32>
      %418 = vector.broadcast %416 : f32 to vector<1x16x16xf32>
      %419 = arith.mulf %417, %418 : vector<1x16x16xf32>
      %420 = arith.addf %400, %419 : vector<1x16x16xf32>
      %c87 = arith.constant 87 : index
      %421 = memref.load %arg2[%c87] : memref<98xf32, #tpu.memory_space<smem>>
      %422 = vector.extract_strided_slice %395 {offsets = [0, 5, 0], sizes = [1, 16, 16], strides = [1, 1, 1]} : vector<1x24x16xf32> to vector<1x16x16xf32>
      %423 = vector.broadcast %421 : f32 to vector<1x16x16xf32>
      %424 = arith.mulf %422, %423 : vector<1x16x16xf32>
      %425 = arith.addf %405, %424 : vector<1x16x16xf32>
      %c94 = arith.constant 94 : index
      %426 = memref.load %arg2[%c94] : memref<98xf32, #tpu.memory_space<smem>>
      %427 = vector.extract_strided_slice %395 {offsets = [0, 6, 0], sizes = [1, 16, 16], strides = [1, 1, 1]} : vector<1x24x16xf32> to vector<1x16x16xf32>
      %428 = vector.broadcast %426 : f32 to vector<1x16x16xf32>
      %429 = arith.mulf %427, %428 : vector<1x16x16xf32>
      %430 = arith.addf %410, %429 : vector<1x16x16xf32>
      %431 = vector.extract_strided_slice %286 {offsets = [0, 0, 4], sizes = [1, 24, 16], strides = [1, 1, 1]} : vector<1x24x128xf32> to vector<1x24x16xf32>
      %c53 = arith.constant 53 : index
      %432 = memref.load %arg2[%c53] : memref<98xf32, #tpu.memory_space<smem>>
      %433 = vector.extract_strided_slice %431 {offsets = [0, 0, 0], sizes = [1, 16, 16], strides = [1, 1, 1]} : vector<1x24x16xf32> to vector<1x16x16xf32>
      %434 = vector.broadcast %432 : f32 to vector<1x16x16xf32>
      %435 = arith.mulf %433, %434 : vector<1x16x16xf32>
      %436 = arith.addf %420, %435 : vector<1x16x16xf32>
      %c60 = arith.constant 60 : index
      %437 = memref.load %arg2[%c60] : memref<98xf32, #tpu.memory_space<smem>>
      %438 = vector.extract_strided_slice %431 {offsets = [0, 1, 0], sizes = [1, 16, 16], strides = [1, 1, 1]} : vector<1x24x16xf32> to vector<1x16x16xf32>
      %439 = vector.broadcast %437 : f32 to vector<1x16x16xf32>
      %440 = arith.mulf %438, %439 : vector<1x16x16xf32>
      %441 = arith.addf %425, %440 : vector<1x16x16xf32>
      %c67 = arith.constant 67 : index
      %442 = memref.load %arg2[%c67] : memref<98xf32, #tpu.memory_space<smem>>
      %443 = vector.extract_strided_slice %431 {offsets = [0, 2, 0], sizes = [1, 16, 16], strides = [1, 1, 1]} : vector<1x24x16xf32> to vector<1x16x16xf32>
      %444 = vector.broadcast %442 : f32 to vector<1x16x16xf32>
      %445 = arith.mulf %443, %444 : vector<1x16x16xf32>
      %446 = arith.addf %430, %445 : vector<1x16x16xf32>
      %c74 = arith.constant 74 : index
      %447 = memref.load %arg2[%c74] : memref<98xf32, #tpu.memory_space<smem>>
      %448 = vector.extract_strided_slice %431 {offsets = [0, 3, 0], sizes = [1, 16, 16], strides = [1, 1, 1]} : vector<1x24x16xf32> to vector<1x16x16xf32>
      %449 = vector.broadcast %447 : f32 to vector<1x16x16xf32>
      %450 = arith.mulf %448, %449 : vector<1x16x16xf32>
      %451 = arith.addf %415, %450 : vector<1x16x16xf32>
      %c81 = arith.constant 81 : index
      %452 = memref.load %arg2[%c81] : memref<98xf32, #tpu.memory_space<smem>>
      %453 = vector.extract_strided_slice %431 {offsets = [0, 4, 0], sizes = [1, 16, 16], strides = [1, 1, 1]} : vector<1x24x16xf32> to vector<1x16x16xf32>
      %454 = vector.broadcast %452 : f32 to vector<1x16x16xf32>
      %455 = arith.mulf %453, %454 : vector<1x16x16xf32>
      %456 = arith.addf %436, %455 : vector<1x16x16xf32>
      %c88 = arith.constant 88 : index
      %457 = memref.load %arg2[%c88] : memref<98xf32, #tpu.memory_space<smem>>
      %458 = vector.extract_strided_slice %431 {offsets = [0, 5, 0], sizes = [1, 16, 16], strides = [1, 1, 1]} : vector<1x24x16xf32> to vector<1x16x16xf32>
      %459 = vector.broadcast %457 : f32 to vector<1x16x16xf32>
      %460 = arith.mulf %458, %459 : vector<1x16x16xf32>
      %461 = arith.addf %441, %460 : vector<1x16x16xf32>
      %c95 = arith.constant 95 : index
      %462 = memref.load %arg2[%c95] : memref<98xf32, #tpu.memory_space<smem>>
      %463 = vector.extract_strided_slice %431 {offsets = [0, 6, 0], sizes = [1, 16, 16], strides = [1, 1, 1]} : vector<1x24x16xf32> to vector<1x16x16xf32>
      %464 = vector.broadcast %462 : f32 to vector<1x16x16xf32>
      %465 = arith.mulf %463, %464 : vector<1x16x16xf32>
      %466 = arith.addf %446, %465 : vector<1x16x16xf32>
      %467 = vector.extract_strided_slice %286 {offsets = [0, 0, 5], sizes = [1, 24, 16], strides = [1, 1, 1]} : vector<1x24x128xf32> to vector<1x24x16xf32>
      %c54 = arith.constant 54 : index
      %468 = memref.load %arg2[%c54] : memref<98xf32, #tpu.memory_space<smem>>
      %469 = vector.extract_strided_slice %467 {offsets = [0, 0, 0], sizes = [1, 16, 16], strides = [1, 1, 1]} : vector<1x24x16xf32> to vector<1x16x16xf32>
      %470 = vector.broadcast %468 : f32 to vector<1x16x16xf32>
      %471 = arith.mulf %469, %470 : vector<1x16x16xf32>
      %472 = arith.addf %456, %471 : vector<1x16x16xf32>
      %c61 = arith.constant 61 : index
      %473 = memref.load %arg2[%c61] : memref<98xf32, #tpu.memory_space<smem>>
      %474 = vector.extract_strided_slice %467 {offsets = [0, 1, 0], sizes = [1, 16, 16], strides = [1, 1, 1]} : vector<1x24x16xf32> to vector<1x16x16xf32>
      %475 = vector.broadcast %473 : f32 to vector<1x16x16xf32>
      %476 = arith.mulf %474, %475 : vector<1x16x16xf32>
      %477 = arith.addf %461, %476 : vector<1x16x16xf32>
      %c68 = arith.constant 68 : index
      %478 = memref.load %arg2[%c68] : memref<98xf32, #tpu.memory_space<smem>>
      %479 = vector.extract_strided_slice %467 {offsets = [0, 2, 0], sizes = [1, 16, 16], strides = [1, 1, 1]} : vector<1x24x16xf32> to vector<1x16x16xf32>
      %480 = vector.broadcast %478 : f32 to vector<1x16x16xf32>
      %481 = arith.mulf %479, %480 : vector<1x16x16xf32>
      %482 = arith.addf %466, %481 : vector<1x16x16xf32>
      %c75 = arith.constant 75 : index
      %483 = memref.load %arg2[%c75] : memref<98xf32, #tpu.memory_space<smem>>
      %484 = vector.extract_strided_slice %467 {offsets = [0, 3, 0], sizes = [1, 16, 16], strides = [1, 1, 1]} : vector<1x24x16xf32> to vector<1x16x16xf32>
      %485 = vector.broadcast %483 : f32 to vector<1x16x16xf32>
      %486 = arith.mulf %484, %485 : vector<1x16x16xf32>
      %487 = arith.addf %451, %486 : vector<1x16x16xf32>
      %c82 = arith.constant 82 : index
      %488 = memref.load %arg2[%c82] : memref<98xf32, #tpu.memory_space<smem>>
      %489 = vector.extract_strided_slice %467 {offsets = [0, 4, 0], sizes = [1, 16, 16], strides = [1, 1, 1]} : vector<1x24x16xf32> to vector<1x16x16xf32>
      %490 = vector.broadcast %488 : f32 to vector<1x16x16xf32>
      %491 = arith.mulf %489, %490 : vector<1x16x16xf32>
      %492 = arith.addf %472, %491 : vector<1x16x16xf32>
      %c89 = arith.constant 89 : index
      %493 = memref.load %arg2[%c89] : memref<98xf32, #tpu.memory_space<smem>>
      %494 = vector.extract_strided_slice %467 {offsets = [0, 5, 0], sizes = [1, 16, 16], strides = [1, 1, 1]} : vector<1x24x16xf32> to vector<1x16x16xf32>
      %495 = vector.broadcast %493 : f32 to vector<1x16x16xf32>
      %496 = arith.mulf %494, %495 : vector<1x16x16xf32>
      %497 = arith.addf %477, %496 : vector<1x16x16xf32>
      %c96 = arith.constant 96 : index
      %498 = memref.load %arg2[%c96] : memref<98xf32, #tpu.memory_space<smem>>
      %499 = vector.extract_strided_slice %467 {offsets = [0, 6, 0], sizes = [1, 16, 16], strides = [1, 1, 1]} : vector<1x24x16xf32> to vector<1x16x16xf32>
      %500 = vector.broadcast %498 : f32 to vector<1x16x16xf32>
      %501 = arith.mulf %499, %500 : vector<1x16x16xf32>
      %502 = arith.addf %482, %501 : vector<1x16x16xf32>
      %503 = vector.extract_strided_slice %286 {offsets = [0, 0, 6], sizes = [1, 24, 16], strides = [1, 1, 1]} : vector<1x24x128xf32> to vector<1x24x16xf32>
      %c55 = arith.constant 55 : index
      %504 = memref.load %arg2[%c55] : memref<98xf32, #tpu.memory_space<smem>>
      %505 = vector.extract_strided_slice %503 {offsets = [0, 0, 0], sizes = [1, 16, 16], strides = [1, 1, 1]} : vector<1x24x16xf32> to vector<1x16x16xf32>
      %506 = vector.broadcast %504 : f32 to vector<1x16x16xf32>
      %507 = arith.mulf %505, %506 : vector<1x16x16xf32>
      %508 = arith.addf %492, %507 : vector<1x16x16xf32>
      %c62 = arith.constant 62 : index
      %509 = memref.load %arg2[%c62] : memref<98xf32, #tpu.memory_space<smem>>
      %510 = vector.extract_strided_slice %503 {offsets = [0, 1, 0], sizes = [1, 16, 16], strides = [1, 1, 1]} : vector<1x24x16xf32> to vector<1x16x16xf32>
      %511 = vector.broadcast %509 : f32 to vector<1x16x16xf32>
      %512 = arith.mulf %510, %511 : vector<1x16x16xf32>
      %513 = arith.addf %497, %512 : vector<1x16x16xf32>
      %c69 = arith.constant 69 : index
      %514 = memref.load %arg2[%c69] : memref<98xf32, #tpu.memory_space<smem>>
      %515 = vector.extract_strided_slice %503 {offsets = [0, 2, 0], sizes = [1, 16, 16], strides = [1, 1, 1]} : vector<1x24x16xf32> to vector<1x16x16xf32>
      %516 = vector.broadcast %514 : f32 to vector<1x16x16xf32>
      %517 = arith.mulf %515, %516 : vector<1x16x16xf32>
      %518 = arith.addf %502, %517 : vector<1x16x16xf32>
      %c76 = arith.constant 76 : index
      %519 = memref.load %arg2[%c76] : memref<98xf32, #tpu.memory_space<smem>>
      %520 = vector.extract_strided_slice %503 {offsets = [0, 3, 0], sizes = [1, 16, 16], strides = [1, 1, 1]} : vector<1x24x16xf32> to vector<1x16x16xf32>
      %521 = vector.broadcast %519 : f32 to vector<1x16x16xf32>
      %522 = arith.mulf %520, %521 : vector<1x16x16xf32>
      %523 = arith.addf %487, %522 : vector<1x16x16xf32>
      %c83 = arith.constant 83 : index
      %524 = memref.load %arg2[%c83] : memref<98xf32, #tpu.memory_space<smem>>
      %525 = vector.extract_strided_slice %503 {offsets = [0, 4, 0], sizes = [1, 16, 16], strides = [1, 1, 1]} : vector<1x24x16xf32> to vector<1x16x16xf32>
      %526 = vector.broadcast %524 : f32 to vector<1x16x16xf32>
      %527 = arith.mulf %525, %526 : vector<1x16x16xf32>
      %528 = arith.addf %508, %527 : vector<1x16x16xf32>
      %c90 = arith.constant 90 : index
      %529 = memref.load %arg2[%c90] : memref<98xf32, #tpu.memory_space<smem>>
      %530 = vector.extract_strided_slice %503 {offsets = [0, 5, 0], sizes = [1, 16, 16], strides = [1, 1, 1]} : vector<1x24x16xf32> to vector<1x16x16xf32>
      %531 = vector.broadcast %529 : f32 to vector<1x16x16xf32>
      %532 = arith.mulf %530, %531 : vector<1x16x16xf32>
      %533 = arith.addf %513, %532 : vector<1x16x16xf32>
      %c97 = arith.constant 97 : index
      %534 = memref.load %arg2[%c97] : memref<98xf32, #tpu.memory_space<smem>>
      %535 = vector.extract_strided_slice %503 {offsets = [0, 6, 0], sizes = [1, 16, 16], strides = [1, 1, 1]} : vector<1x24x16xf32> to vector<1x16x16xf32>
      %536 = vector.broadcast %534 : f32 to vector<1x16x16xf32>
      %537 = arith.mulf %535, %536 : vector<1x16x16xf32>
      %538 = arith.addf %518, %537 : vector<1x16x16xf32>
      %539 = arith.addf %528, %533 : vector<1x16x16xf32>
      %540 = arith.addf %539, %538 : vector<1x16x16xf32>
      %541 = arith.addf %540, %523 : vector<1x16x16xf32>
      %542 = arith.negf %541 : vector<1x16x16xf32>
      %543 = math.exp %542 : vector<1x16x16xf32>
      %cst_40 = arith.constant 1.000000e+00 : f32
      %544 = vector.broadcast %cst_40 : f32 to vector<1x16x16xf32>
      %545 = arith.addf %544, %543 : vector<1x16x16xf32>
      %546 = arith.divf %544, %545 : vector<1x16x16xf32>
      %547 = vector.shape_cast %546 : vector<1x16x16xf32> to vector<1x1x256xf32>
      %c0_41 = arith.constant 0 : index
      %c0_42 = arith.constant 0 : index
      %c0_43 = arith.constant 0 : index
      %548 = vector.load %arg4[%c0_41, %c0_42, %c0_43] : memref<1x1x256xf32, #tpu.memory_space<vmem>>, vector<1x1x256xf32>
      tpu.vector_store %arg4[%c0_41, %c0_42, %c0_43], %547 {strides = array<i32>} : memref<1x1x256xf32, #tpu.memory_space<vmem>>, vector<1x1x256xf32>,
    } else {
    }
    return
  }
  func.func @transform_0(%arg0: i32, %arg1: i32) -> i32 {
    %c0_i32 = arith.constant 0 : i32
    %c0_i32_0 = arith.constant 0 : i32
    return %c0_i32 : i32
  }
  func.func @transform_1(%arg0: i32, %arg1: i32) -> (i32, i32, i32) {
    %c0_i32 = arith.constant 0 : i32
    %c0_i32_0 = arith.constant 0 : i32
    return %arg0, %arg1, %c0_i32 : i32, i32, i32
  }
  func.func @transform_2(%arg0: i32, %arg1: i32) -> (i32, i32, i32) {
    %c0_i32 = arith.constant 0 : i32
    %c0_i32_0 = arith.constant 0 : i32
    %c0_i32_1 = arith.constant 0 : i32
    return %arg0, %c0_i32, %c0_i32_0 : i32, i32, i32
  }
}

</mosaic_0001>

<bundles_post_ra>
// kernel: tpu_custom_call.1
= control target key start
LH: loop header
LB: loop body
LE: loop exit
PB: predicated region body
PF: predicated region fallthrough
CT: control target
= control target key end

     0   :  { %s5553_s0 = inlined_call_operand.hbm [shape: f32[98], index: 0, kind: input, shape index: {}]   ;;  %s5554_s1 = inlined_call_operand.hbm [shape: f32[2,16,256], index: 1, kind: input, shape index: {}]   ;;  %s5555_s2 = inlined_call_operand.hbm [shape: f32[2,1,256], index: 2, kind: output, shape index: {}]  }
   0x1   :  { %5644 = sst [smem:[#allocation108_spill]] %s5553_s0 }
   0x2   :  { %5645 = sst [smem:[#allocation109_spill]] %s5554_s1 }
   0x3   :  { %7 = vsyncpa [#allocation8], 0 }
   0x4   :  { %8 = vsyncpa [#allocation6], 0 }
   0x5   :  { %10 = vsyncpa [#allocation6 + $0x1], 0 }
   0x6   :  { %11 = vsyncpa [#allocation7], 0 }
   0x7   :  { %13 = vsyncpa [#allocation7 + $0x1], 0  ;;  %s3223_s9 = smov 0   ;;  %s3225_s10 = smov 0  }
   0x8   :  { %s3227_s11 = smov 0   ;;  %s3229_s12 = smov 0  }
   0x9   :  { %s3231_s13 = smov 0   ;;  %s3233_s14 = smov 0  }
   0xa LB: > { %5646 = sst [smem:[#allocation14_spill]] %s3166_s10  ;;  %s2822_s15 = sadd.s32 4294967295, %s3182_s14   ;;  %s3182_s14 = sphi %s3233_s14, %s19_s14   ;;  %s3178_s13 = sphi %s3231_s13, %s6018_s13   ;;  %s3174_s12 = sphi %s3229_s12, %s6017_s12   ;;  %s3170_s11 = sphi %s3227_s11, %s6016_s11   ;;  %s3166_s10 = sphi %s3225_s10, %s6015_s10   ;;  %s3162_s9 = sphi %s3223_s9, %s6014_s9  }
   0xb   : > { %5647 = sst [smem:[#allocation15_spill]] %s3170_s11  ;;  %s2823_s16 = sadd.s32 4294967294, %s3182_s14  }
   0xc   : > { %5648 = sst [smem:[#allocation16_spill]] %s3178_s13  ;;  %s61_s17 = sadd.s32 1, %s3170_s11 }
   0xd   : > { %5649 = sst [smem:[#allocation17_spill]] %s3182_s14  ;;  %p68_p0 = scmp.ne.s32.totalorder %s3170_s11, %s3166_s10 }
   0xe   : > { %p69_p1 = scmp.eq.s32.totalorder %s3182_s14, 0  ;;  %p74_p2 = scmp.ne.s32.totalorder %s3166_s10, %s3162_s9 }
   0xf   : > { %p3261_p3 = scmp.eq.s32.totalorder %s2822_s15, 0  ;;  %p98_p4 = scmp.eq.s32.totalorder %s2822_s15, 1 }
  0x10   : > { %p70_p5 = por %p69_p1, %p68_p0  ;;  %p104_p6 = scmp.eq.s32.totalorder %s2823_s16, 1 }
  0x11   : > { %s5650_s18 = scalar_select %p3261_p3, 1, 0 }
  0x12   : > { %p3267_p7 = por %p3261_p3, %p74_p2  ;;  %p3271_p8 = por %p98_p4, %p68_p0 }
  0x13   : > { %p3275_p9 = por %p104_p6, %p74_p2  ;;  %p2824_p10 = scmp.ge.s32.totalorder %s3182_s14, 1 }
  0x14   : > { %s5651_s19 = scalar_select %p3267_p7, 1, 0 }
  0x15   : > { %s5652_s20 = scalar_select %p3271_p8, 1, 0 }
  0x16   : > { %s5653_s21 = scalar_select %p3275_p9, 1, 0 }
  0x17   : > { %p111_p11 = scmp.lt.s32.totalorder %s3182_s14, 3  ;;  %p2961_p1 = scmp.lt.s32.totalorder %s3182_s14, 2 }
  0x18   : > { %s133_s23 = sand.u32 1, %s3170_s11   ;;  %s31_s25 = sadd.s32 1, %s3178_s13 }
  0x19   : > { %p3282_p13 = pnand %p2824_p10, %p111_p11  ;;  %p3290_p0 = pnand %p2961_p1, %p70_p5 }
  0x1a   : > { %s2827_s26 = sshll.u32 %s133_s23, 5  ;;  %p33_p4 = scmp.ge.s32.totalorder %s31_s25, 2 }
  0x1b   : > { %p2948_p7 = pneg %p3282_p13  ;;  %s5656_s0 = sld [smem:[#allocation108_spill]] }
  0x1d   : > { %p2949_p2 = pnand %p2948_p7, %p3261_p3 }
  0x1f   : > { %p3055_p10 = pneg %p2949_p2 }
  0x21   : > { %s3053_s29 = scalar_lea.hbm %s5656_s0, 16 }
  0x22   : > { %p3054_p6 = scmp.ne.s32.totalorder %s5656_s0, %s3053_s29  ;;  %p3060_p5 = scmp.lt.u32.totalorder %s3053_s29, %s5656_s0 }
  0x24   : > { %p3056_p11 = pnand %p3055_p10, %p3054_p6 }
  0x26   : > { %p3057_p12 = pneg %p3056_p11 }
  0x28   : > { %p3062_p1 = pnand %p3060_p5, %p3057_p12 }
  0x2a   : > { %3065 = shalt.err (!%p3062_p1)
}
  0x2b   : > { %s3184_s6 = smov [#allocation5]   ;;  %s6020_s25 = smov (%p33_p4, %s31_s25), 0 }
  0x2c   : > { %2951 = dma.hbm_to_smem (!%p2949_p2), %s5656_s0, 16, %s3184_s6, [#allocation8]  }
  0x2d   : > { %5657 = sst [smem:[#allocation18_spill]] %s6020_s25  ;;  %s2938_s15 = sshll.u32 %s3178_s13, 9 }
  0x2e   : > { %s56_s16 = ssub.s32 %s3178_s13, %s6020_s25  ;;  %s5658_s1 = sld [smem:[#allocation109_spill]] }
  0x2f   : > { %p59_p7 = scmp.eq.s32.totalorder %s56_s16, 0  ;;  %s137_s30 = scalar_lea.vmem [#allocation9], %s2827_s26 }
  0x30   : > { %s147_s3 = sshll.u32 %s137_s30, 4  ;;  %s3326_s5 = scalar_lea.sflag [#allocation6], %s133_s23  ;;  %s3319_s3 = int_to_ptr.vmem [resolvable:$true] %s147_s3 }
  0x31   : > { %s3324_s4 = scalar_select %p59_p7, %s3170_s11, %s61_s17  }
  0x32   : > { %p3068_p2 = pneg %p3290_p0 }
  0x33   : > { %5659 = sst [smem:[#allocation19_spill]] %s3324_s4 }
  0x34   : > { %s3317_s29 = scalar_lea.hbm %s5658_s1, %s2938_s15  ;;  %s3071_s26 = scalar_lea.hbm %s5658_s1, 1024 }
  0x35   : > { %s3066_s6 = scalar_lea.hbm %s3317_s29, 512  ;;  %p3072_p10 = scmp.lt.u32.totalorder %s3317_s29, %s5658_s1 }
  0x36   : > { %p3067_p12 = scmp.ne.s32.totalorder %s3317_s29, %s3066_s6  ;;  %p3073_p11 = scmp.lt.u32.totalorder %s3071_s26, %s3066_s6 }
  0x37   : > { %p3075_p1 = scmp.lt.u32.totalorder %s3066_s6, %s3317_s29 }
  0x38   : > { %p3069_p4 = pnand %p3068_p2, %p3067_p12  ;;  %p3074_p5 = por %p3073_p11, %p3072_p10 }
  0x3a   : > { %p3070_p6 = pneg %p3069_p4  ;;  %p3076_p7 = por %p3075_p1, %p3074_p5 }
  0x3c   : > { %p3077_p9 = pnand %p3076_p7, %p3070_p6 }
  0x3e   : > { %3080 = shalt.err (!%p3077_p9)
}
  0x3f   : > { %s3081_s17 = scalar_lea.vmem %s3319_s3, 512  ;;  %s3185_s23 = smov [#allocation9]  }
  0x40   : > { %p3082_p12 = scmp.ne.s32.totalorder %s3319_s3, %s3081_s17  ;;  %s3086_s27 = sshll.u32 %s3185_s23, 4  ;;  %s3087_s27 = int_to_ptr.vmem [resolvable:$false] %s3086_s27 }
  0x41   : > { %s3088_s28 = scalar_lea.vmem %s3087_s27, 1024  ;;  %p3089_p3 = scmp.lt.s32.totalorder %s3319_s3, %s3087_s27 }
  0x42   : > { %p3084_p4 = pnand %p3082_p12, %p3068_p2  ;;  %p3090_p10 = scmp.lt.s32.totalorder %s3088_s28, %s3081_s17 }
  0x44   : > { %p3085_p8 = pneg %p3084_p4  ;;  %p3091_p11 = por %p3090_p10, %p3089_p3 }
  0x46   : > { %p3092_p5 = pnand %p3091_p11, %p3085_p8 }
  0x48   : > { %3095 = shalt.err (!%p3092_p5)
}
  0x49   : > { %s3186_s30 = smov 256   ;;  %s3187_s6 = smov 16  }
  0x4a   : > { %2955 = dma.hbm_to_vmem [thread:$0]  (!%p3290_p0), %s3317_s29, 512, %s3319_s3, %s3326_s5, %s3186_s30, %s3186_s30, %s3187_s6  }
  0x4b   : > { %159 = sbr.rel (%p3282_p13) target bundleno = 1159 (0x487), region = 28 }
  0x52   : > { %p5660_p9 = scmp.ne.s32.totalorder %s5650_s18, 0 }
  0x54   : > { %3149 = dma.done.wait (%p5660_p9), [#allocation8], 16  }
  0x55   : > { %3151 = vsyncadd (%p5660_p9), [#allocation8], 4294967280  ;;  %s3361_s7 = sand.u32 1, %s3166_s10   ;;  %p5661_p3 = scmp.ne.s32.totalorder %s5651_s19, 0 }
  0x56   : > { %s2832_s8 = sshll.u32 %s3361_s7, 5  ;;  %s166_s26 = scalar_lea.sflag [#allocation6], %s3361_s7 }
  0x57   : > { %s169_s15 = scalar_lea.vmem [#allocation9], %s2832_s8 }
  0x58   : > { %3153 = dma.done.wait (%p5661_p3), %s166_s26, 512  }
  0x59   : > { %3155 = vsyncadd (%p5661_p3), %s166_s26, 4294966784 }
  0x5a   : > { %174 = sfence }
  0x5b   : > { %v196_v0 = vlaneseq  ;;  %v208_v1 = vld [vmem:[%s169_s15] sm:$0xff]  ;;  %v209_v2 = vld [vmem:[%s169_s15 + $0x8] sm:$0xff]  ;;  %v210_v3 = vld [vmem:[%s169_s15 + $0x10] sm:$0xff]  ;;  %v5586_v7 = vmov 0.0   ;;  %v5662_v8 = vmov 0  ;;  %v3189_v10 = vmov -inf  }
  0x5c   : > { %v211_v4 = vld [vmem:[%s169_s15 + $0x18] sm:$0xff]  ;;  %v213_v5 = vadd.f32 %v210_v3, %v208_v1  ;;  %v252_v6 = vmax.f32 %v208_v1, %v210_v3  ;;  %202 = vst [vmem:[#allocation4] sm:$0xff] %v5586_v7  ;;  %203 = vst [vmem:[#allocation4 + $0x8] sm:$0xff] %v5586_v7  ;;  %v3190_v20 = vmov 1966171168   ;;  %s5562_s18 = smov 96  }
  0x5d   : > { %204 = vst [vmem:[#allocation4 + $0x10] sm:$0xff] %v5586_v7  ;;  %205 = vst [vmem:[#allocation4 + $0x18] sm:$0xff] %v5586_v7  ;;  %vm3375_vm0 = vcmp.lt.s32.totalorder %v196_v0, 256  ;;  %v220_v9 = vadd.f32 %v211_v4, %v209_v2  ;;  %v259_v13 = vmax.f32 %v209_v2, %v211_v4  ;;  %v231_v21 = vunpack.c.l.s4 %v3190_v20  ;;  %s5560_s19 = smov 112   ;;  %s5566_s22 = smov 64  }
  0x5e   : > { %206 = vst [vmem:[#allocation4 + $0x20] sm:$0xff] %v5586_v7  ;;  %207 = vst [vmem:[#allocation4 + $0x28] sm:$0xff] %v5586_v7  ;;  %v5663_v8 = vsel %vm3375_vm0, 4294967295, %v5662_v8  ;;  %v214_v11 = vrot.slane %v213_v5, 4  ;;  %v253_v12 = vrot.slane %v252_v6, 4  ;;  %v3384_v29 = vshrl.u32 %v196_v0, 7 }
  0x5f   : > { %5664 = vst [vmem:[#allocation20_spill] sm:$0xff] %v5663_v8  ;;  %201 = vst.msk [vmem:[#allocation3] sm:$0x3] %vm3375_vm0, %v3189_v10  ;;  %v221_v14 = vrot.slane %v220_v9, 4  ;;  %v260_v17 = vrot.slane %v259_v13, 4  ;;  %v232_v31 = vunpack.c.0.s8 %v231_v21  ;;  %s5564_s24 = smov 80  }
  0x60   : > { %200 = vst.msk [vmem:[#allocation2] sm:$0x3] %vm3375_vm0, %v5586_v7  ;;  %v215_v15 = vadd.f32 %v214_v11, %v213_v5  ;;  %v254_v16 = vmax.f32 %v252_v6, %v253_v12  ;;  %5665 = vst [vmem:[#allocation21_spill] sm:$0xff] %v3384_v29  ;;  %s5570_s29 = smov 32   ;;  %s5568_s3 = smov 48   ;;  %vm419_vm1 = vcmask 154648  }
  0x61   : > { %v222_v18 = vadd.f32 %v221_v14, %v220_v9  ;;  %v261_v23 = vmax.f32 %v259_v13, %v260_v17  ;;  %v3387_v39 = vsub.s32 %v232_v31, %v3384_v29  ;;  %s5572_s5 = smov 16   ;;  %s3198_s16 = smov 3   ;;  %vm593_vm2 = vcmask 1043456  }
  0x62   : > { %v216_v19 = vrot.slane %v215_v15, 2  ;;  %v255_v22 = vrot.slane %v254_v16, 2  ;;  %s2891_s17 = sld [smem:[#allocation5 + $0x40]]  ;;  %s3461_s23 = sld [smem:[#allocation5 + $0x32]]  ;;  %vm2472_vm3 = vcmask 1046528   ;;  %vm2485_vm4 = vcmask 1045504  }
  0x63   : > { %v223_v24 = vrot.slane %v222_v18, 2  ;;  %v262_v27 = vrot.slane %v261_v23, 2  ;;  %5666 = vst [vmem:[#allocation22_spill] sm:$0xff] %v3387_v39  ;;  %s2890_s27 = sld [smem:[#allocation5 + $0x39]]  ;;  %s2892_s28 = sld [smem:[#allocation5 + $0x47]]  ;;  %vm2498_vm5 = vcmask 1044480  }
  0x64   : > { %v217_v25 = vadd.f32 %v216_v19, %v215_v15  ;;  %v256_v26 = vmax.f32 %v254_v16, %v255_v22  ;;  %s2842_s30 = sld [smem:[#allocation5 + $0xf]]  ;;  %s3476_s6 = sld [smem:[#allocation5 + $0x1]]  ;;  %vm2674_vm6 = vcmask 130048   ;;  %vm2676_vm7 = vcmask 261120  }
  0x65   : > { %v224_v28 = vadd.f32 %v223_v24, %v222_v18  ;;  %v263_v33 = vmax.f32 %v261_v23, %v262_v27  ;;  %s5574_s8 = smov 127   ;;  %s3485_s26 = sld [smem:[#allocation5 + $0x2]]  ;;  %vm2678_vm8 = vcmask 392192   ;;  %vm2680_vm9 = vcmask 523264  }
  0x66   : > { %v218_v30 = vrot.slane %v217_v25, 1  ;;  %v257_v32 = vrot.slane %v256_v26, 1  ;;  %v251_v47 = vld [vmem:[#allocation3] sm:$0x3]  ;;  %s2841_s15 = sld [smem:[#allocation5 + $0x8]]  ;;  %s3565_s0 = sld [smem:[#allocation5 + $0x5]] }
  0x67   : > { %v225_v34 = vrot.slane %v224_v28, 1  ;;  %v264_v37 = vrot.slane %v263_v33, 1  ;;  %v212_v45 = vld [vmem:[#allocation2] sm:$0x3]  ;;  %s3574_s1 = sld [smem:[#allocation5 + $0xe]]  ;;  %s5580_s25 = smov 125  }
  0x68   : > { %v219_v35 = vadd.f32 %v218_v30, %v217_v25  ;;  %v258_v36 = vmax.f32 %v256_v26, %v257_v32  ;;  %s3578_s13 = sld [smem:[#allocation5 + $0x2a]]  ;;  %s3580_s4 = sld [smem:[#allocation5]]  ;;  %vm2682_vm10 = vcmask 654336   ;;  %vm2684_vm11 = vcmask 785408  }
  0x69   : > { %v226_v38 = vadd.f32 %v225_v34, %v224_v28  ;;  %v265_v40 = vmax.f32 %v263_v33, %v264_v37  ;;  %s3598_s11 = sld [smem:[#allocation5 + $0x23]]  ;;  %s3614_s10 = sld [smem:[#allocation5 + $0x24]]  ;;  %vm2686_vm12 = vcmask 916480  }
  0x6a   : > { %s5667_s14 = smov 125   ;;  %p6010_p13 = scmp.ne.s32.totalorder %s5652_s20, 0 }
  0x6b   : > { %v229_v41 = vcombine.low %v219_v35, %v226_v38  ;;  %v268_v42 = vcombine.low %v258_v36, %v265_v40 }
  0x6d   : > { %v236_v43 = vrot.slane %v229_v41, %v3387_v39  ;;  %v275_v44 = vrot.slane %v268_v42, %v3387_v39 }
  0x6f   : > { %v243_v46 = vrot.slane %v236_v43, %v3387_v39  ;;  %v282_v48 = vrot.slane %v275_v44, %v3387_v39 }
  0x71   : > { %v245_v49 = vadd.f32 %v243_v46, %v212_v45  ;;  %v284_v50 = vmax.f32 %v251_v47, %v282_v48 }
  0x73   : > { %250 = vst.msk [vmem:[#allocation2] sm:$0x3] %vm3375_vm0, %v245_v49  ;;  %285 = vst.msk [vmem:[#allocation3] sm:$0x3] %vm3375_vm0, %v284_v50 }
  0x7a   : > { %v3397_v51 = vld [vmem:[#allocation3] sm:$0x3]  ;;  %v289_v52 = vld [vmem:[#allocation2] sm:$0x3] }
  0x7b   : > { %427 = vrot.lane.b32.xlu0 %v3397_v51, %s5562_s18  ;;  %424 = vrot.lane.b32.xlu1 %v3397_v51, %s5560_s19  ;;  %v3411_v53 = vmul.f32 0.0625, %v289_v52  ;;  %v423_v9 = vrot.slane %v3397_v51, 1 }
  0x7d   : > { %v293_v11 = vrot.slane %v3411_v53, 1 }
  0x7f   : > { %433 = vrot.lane.b32.xlu0 %v3397_v51, %s5566_s22  ;;  %430 = vrot.lane.b32.xlu1 %v3397_v51, %s5564_s24 }
  0x83   : > { %439 = vrot.lane.b32.xlu0 %v3397_v51, %s5570_s29  ;;  %436 = vrot.lane.b32.xlu1 %v3397_v51, %s5568_s3 }
  0x87   : > { %442 = vrot.lane.b32.xlu1 %v3397_v51, %s5572_s5  ;;  %294 = vrot.lane.b32.xlu0 %v3411_v53, %s5560_s19  ;;  %s3517_s19 = sld [smem:[#allocation5 + $0x3]] }
  0x8b   : > { %300 = vrot.lane.b32.xlu1 %v3411_v53, %s5564_s24  ;;  %297 = vrot.lane.b32.xlu0 %v3411_v53, %s5562_s18  ;;  %s3533_s18 = sld [smem:[#allocation5 + $0xb]]  ;;  %s2871_s24 = sld [smem:[#allocation5 + $0x1a]] }
  0x8f   : > { %303 = vrot.lane.b32.xlu1 %v3411_v53, %s5566_s22  ;;  %306 = vrot.lane.b32.xlu0 %v3411_v53, %s5568_s3  ;;  %s3546_s22 = sld [smem:[#allocation5 + $0x6]]  ;;  %s3548_s3 = sld [smem:[#allocation5 + $0xd]] }
  0x93   : > { %309 = vrot.lane.b32.xlu1 %v3411_v53, %s5570_s29  ;;  %312 = vrot.lane.b32.xlu0 %v3411_v53, %s5572_s5  ;;  %s3552_s29 = sld [smem:[#allocation5 + $0x19]]  ;;  %s3554_s5 = sld [smem:[#allocation5 + $0x14]] }
  0xed   : > { %v428_v54 = vpop.permute.xlu0 %427  ;;  %v425_v55 = vpop.permute.xlu1 %424 }
  0xee   : > { %v445_v61 = vcombine.low %v3397_v51, %v425_v55  ;;  %v429_v14 = vrot.slane %v428_v54, 1  ;;  %v426_v22 = vrot.slane %v425_v55, 1 }
  0xf0   : > { %v455_v2 = vrot.slane %v445_v61, %v3387_v39  ;;  %v494_v42 = vcombine.low %v423_v9, %v426_v22 }
  0xf1   : > { %v434_v56 = vpop.permute.xlu0 %433  ;;  %v431_v57 = vpop.permute.xlu1 %430 }
  0xf2   : > { %v446_v58 = vcombine.low %v428_v54, %v431_v57  ;;  %v432_v15 = vrot.slane %v431_v57, 1  ;;  %v435_v26 = vrot.slane %v434_v56, 1 }
  0xf4   : > { %v462_v62 = vrot.slane %v446_v58, %v3387_v39  ;;  %v495_v36 = vcombine.low %v429_v14, %v432_v15  ;;  %v3464_v15 = vstv %s2891_s17  ;;  %s2843_s17 = sld [smem:[#allocation5 + $0x16]] }
  0xf5   : > { %v440_v59 = vpop.permute.xlu0 %439  ;;  %v437_v60 = vpop.permute.xlu1 %436 }
  0xf6   : > { %v447_v63 = vcombine.low %v434_v56, %v437_v60  ;;  %v477_v4 = vcombine.low %v455_v2, %v462_v62  ;;  %v441_v18 = vrot.slane %v440_v59, 1  ;;  %v438_v19 = vrot.slane %v437_v60, 1 }
  0xf7   : > { %v511_v52 = vrot.slane %v495_v36, %v3387_v39 }
  0xf8   : > { %v469_v5 = vrot.slane %v447_v63, %v3387_v39  ;;  %v485_v24 = vrot.slane %v477_v4, %v3387_v39  ;;  %v496_v37 = vcombine.low %v435_v26, %v438_v19 }
  0xf9   : > { %v443_v0 = vpop.permute.xlu1 %442  ;;  %v295_v1 = vpop.permute.xlu0 %294 }
  0xfa   : > { %v448_v3 = vcombine.low %v440_v59, %v443_v0  ;;  %v444_v10 = vrot.slane %v443_v0, 1  ;;  %v296_v20 = vrot.slane %v295_v1, 1  ;;  %v315_v28 = vcombine.low %v3411_v53, %v295_v1 }
  0xfb   : > { %v518_v53 = vrot.slane %v496_v37, %v3387_v39  ;;  %v504_v59 = vrot.slane %v494_v42, %v3387_v39 }
  0xfc   : > { %v476_v6 = vrot.slane %v448_v3, %v3387_v39  ;;  %v497_v27 = vcombine.low %v441_v18, %v444_v10  ;;  %v364_v38 = vcombine.low %v293_v11, %v296_v20  ;;  %v325_v44 = vrot.slane %v315_v28, %v3387_v39 }
  0xfd   : > { %v301_v12 = vpop.permute.xlu1 %300  ;;  %v298_v13 = vpop.permute.xlu0 %297  ;;  %v526_v4 = vcombine.low %v504_v59, %v511_v52  ;;  %v3474_v20 = vstv %s2890_s27  ;;  %v5592_v28 = vstv %s3476_s6  ;;  %s2850_s27 = sld [smem:[#allocation5 + $0x17]] }
  0xfe   : > { %v478_v16 = vcombine.low %v469_v5, %v476_v6  ;;  %v302_v17 = vrot.slane %v301_v12, 1  ;;  %v299_v21 = vrot.slane %v298_v13, 1  ;;  %v316_v23 = vcombine.low %v298_v13, %v301_v12 }
  0xff   : > { %v525_v43 = vrot.slane %v497_v27, %v3387_v39  ;;  %v374_v54 = vrot.slane %v364_v38, %v3387_v39  ;;  %v534_v12 = vrot.slane %v526_v4, %v3387_v39  ;;  %v3492_v27 = vstv %s2842_s30  ;;  %s2856_s30 = sld [smem:[#allocation5 + $0x11]] }
 0x100   : > { %v492_v25 = vrot.slane %v478_v16, %v3387_v39  ;;  %v365_v30 = vcombine.low %v299_v21, %v302_v17  ;;  %v332_v40 = vrot.slane %v316_v23, %v3387_v39  ;;  %v5593_v16 = vstv %s3461_s23 }
 0x101   : > { %v304_v31 = vpop.permute.xlu1 %303  ;;  %v307_v32 = vpop.permute.xlu0 %306  ;;  %v527_v60 = vcombine.low %v518_v53, %v525_v43  ;;  %v3515_v38 = vstv %s2843_s17  ;;  %s2855_s17 = sld [smem:[#allocation5 + $0xa]] }
 0x102   : > { %v305_v33 = vrot.slane %v304_v31, 1  ;;  %v308_v34 = vrot.slane %v307_v32, 1  ;;  %v493_v35 = vcombine.low %v485_v24, %v492_v25  ;;  %v317_v41 = vcombine.low %v304_v31, %v307_v32 }
 0x103   : > { %v381_v45 = vrot.slane %v365_v30, %v3387_v39  ;;  %v347_v55 = vcombine.low %v325_v44, %v332_v40  ;;  %v541_v10 = vrot.slane %v527_v60, %v3387_v39  ;;  %v3483_v24 = vstv %s2892_s28  ;;  %s2849_s28 = sld [smem:[#allocation5 + $0x10]] }
 0x104   : > { %543 = vrot.lane.b32.xlu0 %v493_v35, %s3198_s16  ;;  %v366_v48 = vcombine.low %v305_v33, %v308_v34  ;;  %v339_v56 = vrot.slane %v317_v41, %v3387_v39  ;;  %v5591_v33 = vstv %s3485_s26  ;;  %v3504_v34 = vstv %s2841_s15  ;;  %s5576_s15 = smov 126  }
 0x105   : > { %v310_v46 = vpop.permute.xlu1 %309  ;;  %v313_v47 = vpop.permute.xlu0 %312  ;;  %v396_v0 = vcombine.low %v374_v54, %v381_v45  ;;  %v355_v1 = vrot.slane %v347_v55, %v3387_v39  ;;  %v542_v13 = vcombine.low %v534_v12, %v541_v10  ;;  %v3525_v42 = vstv %s2850_s27  ;;  %s3539_s27 = sld [smem:[#allocation5 + $0x18]] }
 0x106   : > { %v311_v49 = vrot.slane %v310_v46, 1  ;;  %v314_v50 = vrot.slane %v313_v47, 1  ;;  %v318_v51 = vcombine.low %v310_v46, %v313_v47  ;;  %v388_v61 = vrot.slane %v366_v48, %v3387_v39 }
 0x107   : > { %v404_v6 = vrot.slane %v396_v0, %v3387_v39  ;;  %v3543_v46 = vstv %s2856_s30  ;;  %v5589_v47 = vstv %s3517_s19  ;;  %s3563_s30 = sld [smem:[#allocation5 + $0x12]]  ;;  %v3570_v52 = vstv %s2855_s17  ;;  %s3586_s17 = sld [smem:[#allocation5 + $0x1c]] }
 0x108   : > { %v346_v57 = vrot.slane %v318_v51, %v3387_v39  ;;  %v367_v58 = vcombine.low %v311_v49, %v314_v50  ;;  %v3584_v54 = vstv %s2871_s24  ;;  %s3612_s24 = sld [smem:[#allocation5 + $0x2b]] }
 0x109   : > { %v3527_v43 = vstv %s2849_s28  ;;  %s3541_s28 = sld [smem:[#allocation5 + $0x13]] }
 0x10a   : > { %v348_v62 = vcombine.low %v339_v56, %v346_v57  ;;  %v395_v63 = vrot.slane %v367_v58, %v3387_v39  ;;  %v3594_v57 = vstv %s3533_s18  ;;  %s3202_s18 = smov 124  }
 0x10b   : > { %v3605_v59 = vstv %s3539_s27  ;;  %s3880_s27 = sld [smem:[#allocation5 + $0x20]] }
 0x10c   : > { %v362_v2 = vrot.slane %v348_v62, %v3387_v39  ;;  %v397_v3 = vcombine.low %v388_v61, %v395_v63  ;;  %v1367_v61 = vstv %s3546_s22  ;;  %v1381_v62 = vstv %s3548_s3  ;;  %s2852_s22 = sld [smem:[#allocation5 + $0x25]] }
 0x10d   : > { %v3619_v63 = vstv %s3554_s5  ;;  %s3631_s3 = sld [smem:[#allocation5 + $0x1d]]  ;;  %s3204_s5 = smov 122  }
 0x10e   : > { %v363_v5 = vcombine.low %v355_v1, %v362_v2  ;;  %v411_v9 = vrot.slane %v397_v3, %v3387_v39 }
 0x10f   : > { %v3608_v60 = vstv %s3541_s28  ;;  %s3891_s28 = sld [smem:[#allocation5 + $0x28]] }
 0x110   : > { %413 = vrot.lane.b32.xlu1 %v363_v5, %s3198_s16  ;;  %v412_v11 = vcombine.low %v404_v6, %v411_v9 }
 0x112   : > { %415 = vrot.lane.b32.xlu0 %v412_v11, %s3198_s16 }
 0x114   : > { %545 = vrot.lane.b32.xlu1 %v542_v13, %s3198_s16  ;;  %s2848_s16 = sld [smem:[#allocation5 + $0x9]]  ;;  %v3660_v13 = vstv %s3552_s29  ;;  %s3768_s29 = sld [smem:[#allocation5 + $0x1f]] }
 0x11a   : > { %v3513_v37 = vstv %s2848_s16  ;;  %s3529_s16 = sld [smem:[#allocation5 + $0x4]] }
 0x120   : > { %v5588_v51 = vstv %s3529_s16 }
 0x176   : > { %v544_v14 = vpop.permute.xlu0 %543 }
 0x177   : > { %550 = vst.msk [vmem:[#allocation4 + $0x1b] sm:$0xff] %vm419_vm1, %v544_v14  ;;  %v3663_v14 = vstv %s3563_s30  ;;  %s5711_s30 = smov 127  }
 0x17e   : > { %v3467_v17 = vld [vmem:[#allocation4 + $0x18] sm:$0xff] }
 0x17f   : > { %v1635_v18 = vmul.f32 %v3464_v15, %v3467_v17  ;;  %v1601_v19 = vmul.f32 %v5593_v16, %v3467_v17  ;;  %v1615_v22 = vmul.f32 %v3474_v20, %v3467_v17  ;;  %v1655_v26 = vmul.f32 %v3483_v24, %v3467_v17 }
 0x181   : > { %1641 = vrot.lane.b32.xlu1 %v1635_v18, %s5574_s8  ;;  %1605 = vrot.lane.b32.xlu0 %v1601_v19, %s5574_s8  ;;  %v5590_v19 = vstv %s3565_s0 }
 0x182   : > { %v414_v21 = vpop.permute.xlu1 %413 }
 0x183   : > { %420 = vst.msk [vmem:[#allocation4 + $0x3] sm:$0xff] %vm419_vm1, %v414_v21 }
 0x184   : > { %v416_v23 = vpop.permute.xlu0 %415 }
 0x185   : > { %421 = vst.msk [vmem:[#allocation4 + $0xb] sm:$0xff] %vm419_vm1, %v416_v23  ;;  %1621 = vrot.lane.b32.xlu0 %v1615_v22, %s5574_s8  ;;  %v3676_v22 = vstv %s3574_s1  ;;  %v3679_v23 = vstv %s3578_s13  ;;  %s3742_s1 = sld [smem:[#allocation5 + $0x2c]]  ;;  %s3754_s13 = sld [smem:[#allocation5 + $0x2d]] }
 0x186   : > { %v546_v25 = vpop.permute.xlu1 %545  ;;  %5668 = vst [vmem:[#allocation23_spill] sm:$0xff] %v3676_v22  ;;  %5669 = vst [vmem:[#allocation24_spill] sm:$0xff] %v3679_v23 }
 0x187   : > { %551 = vst.msk [vmem:[#allocation4 + $0x23] sm:$0xff] %vm419_vm1, %v546_v25 }
 0x189   : > { %1661 = vrot.lane.b32.xlu0 %v1655_v26, %s5574_s8 }
 0x18a   : > { %v3496_v30 = vld [vmem:[#allocation4] sm:$0xff] }
 0x18b   : > { %v677_v31 = vmul.f32 %v3492_v27, %v3496_v30  ;;  %v643_v32 = vmul.f32 %v5592_v28, %v3496_v30  ;;  %v788_v35 = vmul.f32 %v5591_v33, %v3496_v30  ;;  %v657_v36 = vmul.f32 %v3504_v34, %v3496_v30 }
 0x18c   : > { %v802_v40 = vmul.f32 %v3513_v37, %v3496_v30  ;;  %v697_v41 = vmul.f32 %v3515_v38, %v3496_v30  ;;  %v842_v44 = vmul.f32 %v3525_v42, %v3496_v30  ;;  %v822_v45 = vmul.f32 %v3527_v43, %v3496_v30  ;;  %v3567_v50 = vld [vmem:[#allocation4 + $0x10] sm:$0xff]  ;;  %v3582_v53 = vld [vmem:[#allocation4 + $0x8] sm:$0xff] }
 0x18d   : > { %683 = vrot.lane.b32.xlu1 %v677_v31, %s5574_s8  ;;  %647 = vrot.lane.b32.xlu0 %v643_v32, %s5574_s8  ;;  %v967_v48 = vmul.f32 %v3543_v46, %v3496_v30  ;;  %v933_v49 = vmul.f32 %v5589_v47, %v3496_v30  ;;  %v1078_v55 = vmul.f32 %v5588_v51, %v3496_v30  ;;  %v3687_v32 = vstv %s3586_s17  ;;  %s3974_s17 = sld [smem:[#allocation5 + $0x29]] }
 0x18e   : > { %v947_v56 = vmul.f32 %v3570_v52, %v3496_v30  ;;  %v3602_v58 = vmul.f32 %v3584_v54, %v3567_v50  ;;  %v3622_v0 = vmul.f32 %v1367_v61, %v3582_v53  ;;  %v3626_v1 = vmul.f32 %v3608_v60, %v3567_v50  ;;  %5670 = vst [vmem:[#allocation25_spill] sm:$0xff] %v3687_v32 }
 0x18f   : > { %v3629_v2 = vmul.f32 %v1381_v62, %v3582_v53  ;;  %v3638_v4 = vmul.f32 %v3584_v54, %v3582_v53  ;;  %v3642_v5 = vmul.f32 %v3619_v63, %v3567_v50  ;;  %v3645_v6 = vmul.f32 %v1381_v62, %v3567_v50 }
 0x190   : > { %v1092_v9 = vmul.f32 %v3594_v57, %v3496_v30  ;;  %v987_v10 = vmul.f32 %v3605_v59, %v3496_v30  ;;  %v3657_v12 = vmul.f32 %v3619_v63, %v3582_v53  ;;  %v1132_v25 = vmul.f32 %v3660_v13, %v3496_v30 }
 0x191   : > { %792 = vrot.lane.b32.xlu1 %v788_v35, %s5576_s15  ;;  %663 = vrot.lane.b32.xlu0 %v657_v36, %s5574_s8  ;;  %v1112_v26 = vmul.f32 %v3663_v14, %v3496_v30  ;;  %v3693_v36 = vstv %s3598_s11  ;;  %s3203_s11 = smov 123   ;;  %v1382_v33 = vmul.f32 %v1381_v62, %v3496_v30  ;;  %v589_v62 = vmul.f32 %v3687_v32, %v3567_v50 }
 0x192   : > { %5672 = vst [vmem:[#allocation27_spill] sm:$0xff] %v3693_v36  ;;  %v3779_v8 = vmul.f32 %v3679_v23, %v3567_v50 }
 0x193   : > { %v597_v29 = vrot.slane %v589_v62, 4  ;;  %v5684_v62 = vstv %s3580_s4 }
 0x194   : > { %5681 = vst [vmem:[#allocation35_spill] sm:$0xff] %v3779_v8 }
 0x195   : > { %808 = vrot.lane.b32.xlu1 %v802_v40, %s5576_s15  ;;  %703 = vrot.lane.b32.xlu0 %v697_v41, %s5574_s8  ;;  %s3556_s8 = sld [smem:[#allocation5 + $0x1b]]  ;;  %v3696_v40 = vstv %s3612_s24  ;;  %v3699_v41 = vstv %s3614_s10  ;;  %s3749_s10 = sld [smem:[#allocation5 + $0x1e]] }
 0x196   : > { %v3740_v47 = vmul.f32 %v3696_v40, %v3567_v50  ;;  %v3761_v31 = vmul.f32 %v3699_v41, %v3582_v53  ;;  %s3986_s24 = sld [smem:[#allocation5 + $0x30]] }
 0x198   : > { %5679 = vst [vmem:[#allocation34_spill] sm:$0xff] %v3761_v31  ;;  %v5602_v39 = vrot.slane %v3761_v31, 4 }
 0x199   : > { %848 = vrot.lane.b32.xlu1 %v842_v44, %s5576_s15  ;;  %828 = vrot.lane.b32.xlu0 %v822_v45, %s5576_s15  ;;  %s3572_s15 = sld [smem:[#allocation5 + $0xc]]  ;;  %v3703_v44 = vstv %s2852_s22  ;;  %v3707_v45 = vmul.f32 %v3699_v41, %v3567_v50  ;;  %s2879_s22 = sld [smem:[#allocation5 + $0x22]] }
 0x19a   : > { %5673 = vst [vmem:[#allocation28_spill] sm:$0xff] %v3703_v44 }
 0x19b   : > { %v3634_v3 = vstv %s3556_s8  ;;  %s3827_s8 = sld [smem:[#allocation5 + $0x27]] }
 0x19c   : > { %v3653_v11 = vmul.f32 %v3634_v3, %v3582_v53  ;;  %v3667_v18 = vmul.f32 %v3634_v3, %v3567_v50 }
 0x19d   : > { %973 = vrot.lane.b32.xlu1 %v967_v48, %s5580_s25  ;;  %937 = vrot.lane.b32.xlu0 %v933_v49, %s5580_s25  ;;  %s3596_s25 = sld [smem:[#allocation5 + $0x7]]  ;;  %v3710_v48 = vstv %s3631_s3  ;;  %v1257_v49 = vmul.f32 %v3608_v60, %v3496_v30  ;;  %s2896_s3 = sld [smem:[#allocation5 + $0x33]] }
 0x19e   : > { %v719_v7 = vmul.f32 %v3710_v48, %v3567_v50 }
 0x19f   : > { %v3673_v21 = vstv %s3572_s15  ;;  %s3848_s15 = sld [smem:[#allocation5 + $0x2e]] }
 0x1a0   : > { %v1237_v51 = vmul.f32 %v3673_v21, %v3496_v30  ;;  %v726_v16 = vrot.slane %v719_v7, 4 }
 0x1a1   : > { %1082 = vrot.lane.b32.xlu1 %v1078_v55, %s3202_s18  ;;  %953 = vrot.lane.b32.xlu0 %v947_v56, %s5667_s14  ;;  %v3716_v55 = vmul.f32 %v3687_v32, %v3582_v53  ;;  %v3720_v56 = vmul.f32 %v3693_v36, %v3582_v53 }
 0x1a3   : > { %v3690_v35 = vstv %s3596_s25  ;;  %5674 = vst [vmem:[#allocation29_spill] sm:$0xff] %v3716_v55  ;;  %5675 = vst [vmem:[#allocation30_spill] sm:$0xff] %v3720_v56  ;;  %s3757_s25 = sld [smem:[#allocation5 + $0x26]] }
 0x1a4   : > { %5671 = vst [vmem:[#allocation26_spill] sm:$0xff] %v3690_v35 }
 0x1a5   : > { %1098 = vrot.lane.b32.xlu1 %v1092_v9, %s3202_s18  ;;  %993 = vrot.lane.b32.xlu0 %v987_v10, %s5667_s14  ;;  %v3724_v9 = vmul.f32 %v3710_v48, %v3582_v53  ;;  %v1223_v10 = vmul.f32 %v5590_v19, %v3496_v30  ;;  %v3816_v19 = vmul.f32 %v3703_v44, %v3567_v50 }
 0x1a7   : > { %5676 = vst [vmem:[#allocation31_spill] sm:$0xff] %v3724_v9  ;;  %v5680_v7 = vrot.slane %v3724_v9, 4  ;;  %v5705_v31 = vrot.slane %v3816_v19, 4 }
 0x1a9   : > { %1138 = vrot.lane.b32.xlu1 %v1132_v25, %s3202_s18  ;;  %1118 = vrot.lane.b32.xlu0 %v1112_v26, %s3202_s18  ;;  %v1368_v25 = vmul.f32 %v1367_v61, %v3496_v30  ;;  %v3732_v26 = vmul.f32 %v3679_v23, %v3582_v53  ;;  %v3747_v61 = vmul.f32 %v3693_v36, %v3567_v50 }
 0x1aa   : > { %v3774_v28 = vsel %vm593_vm2, %v5680_v7, %v726_v16  ;;  %v5683_v16 = vrot.slane %v3707_v45, 4  ;;  %v558_v7 = vmul.f32 %v5684_v62, %v3582_v53  ;;  %v564_v23 = vmul.f32 %v3690_v35, %v3582_v53 }
 0x1ab   : > { %5677 = vst [vmem:[#allocation32_spill] sm:$0xff] %v3732_v26  ;;  %5678 = vst [vmem:[#allocation33_spill] sm:$0xff] %v3747_v61  ;;  %v572_v36 = vmul.f32 %v3676_v22, %v3582_v53 }
 0x1ad   : > { %1263 = vrot.lane.b32.xlu1 %v1257_v49, %s3203_s11  ;;  %1227 = vrot.lane.b32.xlu0 %v1223_v10, %s3203_s11  ;;  %v1277_v49 = vmul.f32 %v3584_v54, %v3496_v30  ;;  %v3786_v10 = vmul.f32 %v3696_v40, %v3582_v53  ;;  %v3795_v54 = vsel %vm593_vm2, %v5602_v39, %v5683_v16  ;;  %v5686_v16 = vrot.slane %v3747_v61, 4 }
 0x1ae   : > { %v5687_v39 = vrot.slane %v3720_v56, 4  ;;  %v3830_v61 = vstv %s3742_s1  ;;  %v3837_v56 = vld [vmem:[#allocation4 + $0x20] sm:$0xff]  ;;  %s2897_s1 = sld [smem:[#allocation5 + $0x3a]] }
 0x1af   : > { %5682 = vst [vmem:[#allocation36_spill] sm:$0xff] %v3786_v10  ;;  %5692 = vst [vmem:[#allocation39_spill] sm:$0xff] %v3830_v61 }
 0x1b0   : > { %v615_v62 = vsel %vm593_vm2, %v5687_v39, %v5686_v16  ;;  %v3835_v16 = vstv %s3749_s10  ;;  %s2898_s10 = sld [smem:[#allocation5 + $0x41]] }
 0x1b1   : > { %1372 = vrot.lane.b32.xlu1 %v1368_v25, %s3204_s5  ;;  %1243 = vrot.lane.b32.xlu0 %v1237_v51, %s3203_s11  ;;  %v5685_v25 = vrot.slane %v3716_v55, 4  ;;  %v3825_v32 = vadd.f32 %v615_v62, %v564_v23  ;;  %v3846_v23 = vstv %s3757_s25  ;;  %v3902_v55 = vmul.f32 %v3830_v61, %v3582_v53  ;;  %s2899_s25 = sld [smem:[#allocation5 + $0x48]] }
 0x1b2   : > { %5694 = vst [vmem:[#allocation41_spill] sm:$0xff] %v3846_v23 }
 0x1b3   : > { %v598_v51 = vsel %vm593_vm2, %v5685_v25, %v597_v29  ;;  %v5689_v29 = vrot.slane %v3779_v8, 4  ;;  %v5690_v25 = vrot.slane %v3732_v26, 4  ;;  %5691 = vst [vmem:[#allocation38_spill] sm:$0xff] %v3825_v32  ;;  %v1402_v8 = vmul.f32 %v3619_v63, %v3496_v30  ;;  %v3882_v26 = vld [vmem:[#allocation4 + $0x28] sm:$0xff]  ;;  %5702 = vst [vmem:[#allocation46_spill] sm:$0xff] %v3902_v55 }
 0x1b4   : > { %v3818_v35 = vadd.f32 %v598_v51, %v558_v7  ;;  %v3843_v7 = vmul.f32 %v3830_v61, %v3567_v50  ;;  %v5697_v51 = vrot.slane %v3786_v10, 4  ;;  %v3878_v32 = vmul.f32 %v3703_v44, %v3582_v53 }
 0x1b5   : > { %v634_v22 = vsel %vm593_vm2, %v5690_v25, %v5689_v29  ;;  %1388 = vrot.lane.b32.xlu1 %v1382_v33, %s3204_s5  ;;  %1283 = vrot.lane.b32.xlu0 %v1277_v49, %s3203_s11  ;;  %v3859_v33 = vmul.f32 %v3846_v23, %v3567_v50  ;;  %v5696_v49 = vrot.slane %v3740_v47, 4  ;;  %v3869_v29 = vstv %s3768_s29  ;;  %s2901_s29 = sld [smem:[#allocation5 + $0x56]] }
 0x1b6   : > { %5688 = vst [vmem:[#allocation37_spill] sm:$0xff] %v3818_v35  ;;  %v3832_v39 = vadd.f32 %v634_v22, %v572_v36  ;;  %v3852_v22 = vmul.f32 %v3835_v16, %v3582_v53  ;;  %v3855_v36 = vstv %s3754_s13  ;;  %5699 = vst [vmem:[#allocation44_spill] sm:$0xff] %v3869_v29  ;;  %v1422_v25 = vmul.f32 %v3634_v3, %v3496_v30  ;;  %s2900_s13 = sld [smem:[#allocation5 + $0x4f]] }
 0x1b7   : > { %5695 = vst [vmem:[#allocation42_spill] sm:$0xff] %v3855_v36  ;;  %v3866_v62 = vsel %vm593_vm2, %v5697_v51, %v5696_v49  ;;  %5700 = vst [vmem:[#allocation45_spill] sm:$0xff] %v3878_v32  ;;  %v5701_v49 = vstv %s3461_s23  ;;  %v3889_v35 = vmul.f32 %v3855_v36, %v3567_v50  ;;  %v864_v3 = vmul.f32 %v3835_v16, %v3567_v50  ;;  %s3908_s23 = sld [smem:[#allocation5 + $0x21]] }
 0x1b8   : > { %5693 = vst [vmem:[#allocation40_spill] sm:$0xff] %v3832_v39  ;;  %5698 = vst [vmem:[#allocation43_spill] sm:$0xff] %v3866_v62  ;;  %v1602_v51 = vmul.f32 %v5701_v49, %v3837_v56  ;;  %v3906_v62 = vmul.f32 %v3869_v29, %v3582_v53  ;;  %v3915_v39 = vmul.f32 %v3846_v23, %v3582_v53  ;;  %v5706_v44 = vrot.slane %v3878_v32, 4 }
 0x1b9   : > { %1428 = vrot.lane.b32.xlu1 %v1422_v25, %s3204_s5  ;;  %1408 = vrot.lane.b32.xlu0 %v1402_v8, %s3204_s5  ;;  %v871_v25 = vrot.slane %v864_v3, 4  ;;  %v1009_v8 = vmul.f32 %v3869_v29, %v3567_v50  ;;  %v1617_v49 = vmul.f32 %v3474_v20, %v3882_v26  ;;  %v3929_v63 = vstv %s3827_s8  ;;  %s2902_s8 = sld [smem:[#allocation5 + $0x5d]] }
 0x1ba   : > { %5703 = vst [vmem:[#allocation47_spill] sm:$0xff] %v3906_v62  ;;  %5704 = vst [vmem:[#allocation48_spill] sm:$0xff] %v3915_v39  ;;  %v3925_v9 = vsel %vm593_vm2, %v5706_v44, %v5705_v31  ;;  %v5709_v29 = vrot.slane %v3852_v22, 4  ;;  %v3941_v31 = vmul.f32 %v3929_v63, %v3567_v50  ;;  %v3944_v44 = vstv %s3848_s15  ;;  %s2904_s15 = sld [smem:[#allocation5 + $0x3b]] }
 0x1bb   : > { %5707 = vst [vmem:[#allocation49_spill] sm:$0xff] %v3925_v9  ;;  %5708 = vst [vmem:[#allocation50_spill] sm:$0xff] %v3929_v63  ;;  %v1016_v10 = vrot.slane %v1009_v8, 4  ;;  %v5713_v3 = vrot.slane %v3843_v7, 4  ;;  %v5716_v61 = vrot.slane %v3906_v62, 4  ;;  %v5719_v9 = vrot.slane %v3915_v39, 4 }
 0x1bc   : > { %v3934_v23 = vsel %vm593_vm2, %v5709_v29, %v871_v25  ;;  %5712 = vst [vmem:[#allocation52_spill] sm:$0xff] %v3944_v44  ;;  %v5714_v29 = vrot.slane %v3902_v55, 4  ;;  %v3968_v55 = vmul.f32 %v3855_v36, %v3582_v53  ;;  %v3995_v8 = vmul.f32 %v3929_v63, %v3582_v53 }
 0x1bd   : > { %5710 = vst [vmem:[#allocation51_spill] sm:$0xff] %v3934_v23  ;;  %1607 = vrot.lane.b32.xlu1 %v1602_v51, %s5711_s30  ;;  %1625 = vrot.lane.b32.xlu0 %v1617_v49, %s5711_s30  ;;  %v3957_v51 = vsel %vm593_vm2, %v5716_v61, %v1016_v10  ;;  %v5718_v49 = vrot.slane %v3859_v33, 4  ;;  %v3978_v61 = vmul.f32 %v3944_v44, %v3567_v50  ;;  %v3981_v10 = vstv %s3880_s27  ;;  %s2908_s27 = sld [smem:[#allocation5 + $0x57]] }
 0x1be   : > { %v3951_v25 = vsel %vm593_vm2, %v5714_v29, %v5713_v3  ;;  %5717 = vst [vmem:[#allocation54_spill] sm:$0xff] %v3957_v51  ;;  %5721 = vst [vmem:[#allocation56_spill] sm:$0xff] %v3968_v55  ;;  %v1616_v3 = vmul.f32 %v3474_v20, %v3837_v56  ;;  %v1636_v29 = vmul.f32 %v3464_v15, %v3837_v56  ;;  %v5629_v51 = vrot.slane %v3995_v8, 4 }
 0x1bf   : > { %5715 = vst [vmem:[#allocation53_spill] sm:$0xff] %v3951_v25  ;;  %v3964_v23 = vsel %vm593_vm2, %v5719_v9, %v5718_v49  ;;  %5722 = vst [vmem:[#allocation57_spill] sm:$0xff] %v3981_v10  ;;  %v3984_v9 = vstv %s3891_s28  ;;  %v3991_v20 = vmul.f32 %v3981_v10, %v3582_v53  ;;  %v1637_v39 = vmul.f32 %v3464_v15, %v3882_v26  ;;  %s2905_s28 = sld [smem:[#allocation5 + $0x42]] }
 0x1c0   : > { %5720 = vst [vmem:[#allocation55_spill] sm:$0xff] %v3964_v23  ;;  %5723 = vst [vmem:[#allocation58_spill] sm:$0xff] %v3984_v9  ;;  %v1154_v49 = vmul.f32 %v3981_v10, %v3567_v50  ;;  %v4005_v23 = vstv %s3908_s23  ;;  %v1657_v36 = vmul.f32 %v3483_v24, %v3882_v26  ;;  %v4011_v63 = vmul.f32 %v3984_v9, %v3567_v50  ;;  %s2909_s23 = sld [smem:[#allocation5 + $0x5e]] }
 0x1c1   : > { %5724 = vst [vmem:[#allocation59_spill] sm:$0xff] %v3991_v20  ;;  %5725 = vst [vmem:[#allocation60_spill] sm:$0xff] %v3995_v8  ;;  %1623 = vrot.lane.b32.xlu1 %v1616_v3, %s5711_s30  ;;  %1643 = vrot.lane.b32.xlu0 %v1636_v29, %s5711_s30  ;;  %v5727_v29 = vrot.slane %v3889_v35, 4  ;;  %v5728_v15 = vrot.slane %v3968_v55, 4  ;;  %v4025_v32 = vmul.f32 %v3944_v44, %v3582_v53  ;;  %v5734_v10 = vrot.slane %v3941_v31, 4 }
 0x1c2   : > { %5726 = vst [vmem:[#allocation61_spill] sm:$0xff] %v4005_v23  ;;  %v1161_v25 = vrot.slane %v1154_v49, 4  ;;  %v4029_v3 = vmul.f32 %v4005_v23, %v3582_v53  ;;  %v1299_v55 = vmul.f32 %v4005_v23, %v3567_v50 }
 0x1c3   : > { %v4019_v62 = vsel %vm593_vm2, %v5728_v15, %v5727_v29  ;;  %5730 = vst [vmem:[#allocation63_spill] sm:$0xff] %v4025_v32  ;;  %v5732_v29 = vrot.slane %v3991_v20, 4  ;;  %v4046_v44 = vsel %vm593_vm2, %v5629_v51, %v5734_v10  ;;  %v4059_v15 = vstv %s3974_s17  ;;  %s2911_s17 = sld [smem:[#allocation5 + $0x3c]] }
 0x1c4   : > { %5729 = vst [vmem:[#allocation62_spill] sm:$0xff] %v4019_v62  ;;  %5731 = vst [vmem:[#allocation64_spill] sm:$0xff] %v4029_v3  ;;  %v1306_v62 = vrot.slane %v1299_v55, 4  ;;  %v5737_v10 = vrot.slane %v3978_v61, 4  ;;  %v5738_v51 = vrot.slane %v4025_v32, 4  ;;  %v1487_v55 = vstv %s3986_s24  ;;  %s2907_s24 = sld [smem:[#allocation5 + $0x50]] }
 0x1c5   : > { %1645 = vrot.lane.b32.xlu1 %v1637_v39, %s5711_s30  ;;  %1665 = vrot.lane.b32.xlu0 %v1657_v36, %s5711_s30  ;;  %v4038_v49 = vsel %vm593_vm2, %v5732_v29, %v1161_v25  ;;  %5735 = vst [vmem:[#allocation66_spill] sm:$0xff] %v4046_v44  ;;  %v5631_v39 = vrot.slane %v4029_v3, 4  ;;  %v4052_v36 = vmul.f32 %v3984_v9, %v3582_v53 }
 0x1c6   : > { %5733 = vst [vmem:[#allocation65_spill] sm:$0xff] %v4038_v49  ;;  %v1656_v25 = vmul.f32 %v3483_v24, %v3837_v56  ;;  %v659_v29 = vmul.f32 %v3504_v34, %v3567_v50  ;;  %v4066_v23 = vsel %vm593_vm2, %v5738_v51, %v5737_v10  ;;  %v4078_v44 = vmul.f32 %v1487_v55, %v3567_v50 }
 0x1c7   : > { %5736 = vst [vmem:[#allocation67_spill] sm:$0xff] %v4052_v36  ;;  %5739 = vst [vmem:[#allocation68_spill] sm:$0xff] %v4066_v23  ;;  %v4072_v9 = vsel %vm593_vm2, %v5631_v39, %v1306_v62  ;;  %v5634_v24 = vrot.slane %v4052_v36, 4  ;;  %v4080_v49 = vstv %s2879_s22  ;;  %v5742_v51 = vrot.slane %v4011_v63, 4  ;;  %s2915_s22 = sld [smem:[#allocation5 + $0x58]] }
 0x1c8   : > { %5740 = vst [vmem:[#allocation69_spill] sm:$0xff] %v4072_v9  ;;  %5741 = vst [vmem:[#allocation70_spill] sm:$0xff] %v4080_v49  ;;  %v4091_v62 = vmul.f32 %v4080_v49, %v3582_v53  ;;  %v5744_v39 = vstv %s3476_s6  ;;  %v4102_v32 = vmul.f32 %v4059_v15, %v3582_v53  ;;  %v1444_v36 = vmul.f32 %v4080_v49, %v3567_v50  ;;  %s5748_s6 = smov 126  }
 0x1c9   : > { %1663 = vrot.lane.b32.xlu1 %v1656_v25, %s5711_s30  ;;  %667 = vrot.lane.b32.xlu0 %v659_v29, %s5711_s30  ;;  %v4087_v10 = vsel %vm593_vm2, %v5634_v24, %v5742_v51  ;;  %v1463_v25 = vmul.f32 %v4059_v15, %v3496_v30  ;;  %v678_v29 = vmul.f32 %v3492_v27, %v3582_v53  ;;  %v5746_v20 = vrot.slane %v4078_v44, 4 }
 0x1ca   : > { %5743 = vst [vmem:[#allocation71_spill] sm:$0xff] %v4087_v10  ;;  %v644_v3 = vmul.f32 %v5744_v39, %v3582_v53  ;;  %v1489_v10 = vmul.f32 %v1487_v55, %v3582_v53  ;;  %v5640_v39 = vrot.slane %v4102_v32, 4  ;;  %v1488_v23 = vmul.f32 %v1487_v55, %v3496_v30 }
 0x1cb   : > { %v1469_v9 = vrot.slane %v1463_v25, 4  ;;  %v1451_v51 = vrot.slane %v1444_v36, 4  ;;  %v5745_v55 = vrot.slane %v4091_v62, 4 }
 0x1cc   : > { %v1495_v8 = vrot.slane %v1489_v10, 4  ;;  %v1494_v49 = vrot.slane %v1488_v23, 4  ;;  %v679_v10 = vmul.f32 %v3492_v27, %v3567_v50  ;;  %v804_v27 = vmul.f32 %v3513_v37, %v3567_v50 }
 0x1cd   : > { %685 = vrot.lane.b32.xlu0 %v678_v29, %s5711_s30  ;;  %649 = vrot.lane.b32.xlu1 %v644_v3, %s5711_s30  ;;  %v699_v29 = vmul.f32 %v3515_v38, %v3567_v50  ;;  %v658_v3 = vmul.f32 %v3504_v34, %v3582_v53  ;;  %v4120_v24 = vsel %vm593_vm2, %v1469_v9, %v5640_v39  ;;  %v5747_v9 = vstv %s3485_s26  ;;  %s2874_s26 = sld [smem:[#allocation5 + $0x2f]] }
 0x1ce   : > { %v4127_v25 = vsel %vm593_vm2, %v5745_v55, %v1451_v51  ;;  %v4132_v34 = vsel %vm593_vm2, %v1495_v8, %v5746_v20  ;;  %v4135_v36 = vsel %vm593_vm2, %v1494_v49, %v1495_v8  ;;  %v789_v23 = vmul.f32 %v5747_v9, %v3582_v53 }
 0x1cf   : > { %v803_v51 = vmul.f32 %v3513_v37, %v3582_v53  ;;  %v698_v20 = vmul.f32 %v3515_v38, %v3582_v53  ;;  %v824_v8 = vmul.f32 %v3527_v43, %v3567_v50  ;;  %v843_v49 = vmul.f32 %v3525_v42, %v3582_v53 }
 0x1d0   : > { %v823_v38 = vmul.f32 %v3527_v43, %v3582_v53  ;;  %v844_v37 = vmul.f32 %v3525_v42, %v3567_v50  ;;  %v5749_v55 = vstv %s3517_s19  ;;  %v989_v9 = vmul.f32 %v3605_v59, %v3567_v50  ;;  %s2894_s19 = sld [smem:[#allocation5 + $0x55]] }
 0x1d1   : > { %707 = vrot.lane.b32.xlu0 %v699_v29, %s5711_s30  ;;  %665 = vrot.lane.b32.xlu1 %v658_v3, %s5711_s30  ;;  %v949_v29 = vmul.f32 %v3570_v52, %v3567_v50  ;;  %v968_v3 = vmul.f32 %v3543_v46, %v3582_v53  ;;  %v934_v43 = vmul.f32 %v5749_v55, %v3582_v53 }
 0x1d2   : > { %v948_v42 = vmul.f32 %v3570_v52, %v3582_v53  ;;  %v988_v52 = vmul.f32 %v3605_v59, %v3582_v53  ;;  %v1239_v55 = vmul.f32 %v3673_v21, %v3567_v50 }
 0x1d5   : > { %794 = vrot.lane.b32.xlu0 %v789_v23, %s5748_s6  ;;  %687 = vrot.lane.b32.xlu1 %v679_v10, %s5711_s30  ;;  %v5750_v23 = vstv %s3529_s16  ;;  %s2895_s16 = sld [smem:[#allocation5 + $0x5c]] }
 0x1d6   : > { %v1079_v10 = vmul.f32 %v5750_v23, %v3582_v53  ;;  %v5755_v23 = vstv %s3565_s0  ;;  %s2893_s0 = sld [smem:[#allocation5 + $0x4e]] }
 0x1d9   : > { %810 = vrot.lane.b32.xlu0 %v803_v51, %s5748_s6  ;;  %705 = vrot.lane.b32.xlu1 %v698_v20, %s5711_s30  ;;  %v969_v51 = vmul.f32 %v3543_v46, %v3567_v50  ;;  %v1114_v46 = vmul.f32 %v3663_v14, %v3567_v50 }
 0x1dd   : > { %832 = vrot.lane.b32.xlu0 %v824_v8, %s5748_s6  ;;  %812 = vrot.lane.b32.xlu1 %v804_v27, %s5748_s6  ;;  %v1093_v8 = vmul.f32 %v3594_v57, %v3582_v53 }
 0x1e1   : > { %850 = vrot.lane.b32.xlu0 %v843_v49, %s5748_s6  ;;  %830 = vrot.lane.b32.xlu1 %v823_v38, %s5748_s6  ;;  %v1094_v49 = vmul.f32 %v3594_v57, %v3567_v50 }
 0x1e5   : > { %957 = vrot.lane.b32.xlu0 %v949_v29, %s5667_s14  ;;  %852 = vrot.lane.b32.xlu1 %v844_v37, %s5748_s6  ;;  %v1133_v29 = vmul.f32 %v3660_v13, %v3582_v53  ;;  %v1113_v37 = vmul.f32 %v3663_v14, %v3582_v53 }
 0x1e9   : > { %975 = vrot.lane.b32.xlu0 %v968_v3, %s5667_s14  ;;  %939 = vrot.lane.b32.xlu1 %v934_v43, %s5667_s14  ;;  %v1134_v43 = vmul.f32 %v3660_v13, %v3567_v50 }
 0x1ed   : > { %997 = vrot.lane.b32.xlu0 %v989_v9, %s5667_s14  ;;  %955 = vrot.lane.b32.xlu1 %v948_v42, %s5667_s14  ;;  %v1258_v42 = vmul.f32 %v3608_v60, %v3582_v53 }
 0x1f1   : > { %1084 = vrot.lane.b32.xlu0 %v1079_v10, %s3202_s18  ;;  %977 = vrot.lane.b32.xlu1 %v969_v51, %s5667_s14  ;;  %v1224_v10 = vmul.f32 %v5755_v23, %v3582_v53  ;;  %v4283_v23 = vstv %s2894_s19  ;;  %s4806_s19 = sld [smem:[#allocation5 + $0x3f]] }
 0x1f3   : > { %v4188_v20 = vpop.permute.xlu0 %1605  ;;  %v4204_v38 = vpop.permute.xlu1 %1641 }
 0x1f4   : > { %5751 = vst [vmem:[#allocation72_spill] sm:$0xff] %v4188_v20  ;;  %5753 = vst [vmem:[#allocation74_spill] sm:$0xff] %v4204_v38 }
 0x1f5   : > { %1100 = vrot.lane.b32.xlu0 %v1093_v8, %s3202_s18  ;;  %995 = vrot.lane.b32.xlu1 %v988_v52, %s5667_s14  ;;  %v1238_v8 = vmul.f32 %v3673_v21, %v3582_v53 }
 0x1f7   : > { %v4196_v27 = vpop.permute.xlu0 %1621 }
 0x1f8   : > { %5752 = vst [vmem:[#allocation73_spill] sm:$0xff] %v4196_v27 }
 0x1f9   : > { %1122 = vrot.lane.b32.xlu0 %v1114_v46, %s3202_s18  ;;  %1102 = vrot.lane.b32.xlu1 %v1094_v49, %s3202_s18 }
 0x1fb   : > { %v4206_v59 = vpop.permute.xlu0 %1661 }
 0x1fc   : > { %5754 = vst [vmem:[#allocation75_spill] sm:$0xff] %v4206_v59  ;;  %v5787_v59 = vld [vmem:[#allocation36_spill] sm:$0xff] }
 0x1fd   : > { %1140 = vrot.lane.b32.xlu0 %v1133_v29, %s3202_s18  ;;  %1120 = vrot.lane.b32.xlu1 %v1113_v37, %s3202_s18  ;;  %v1674_v29 = vstv %s2893_s0  ;;  %s4804_s0 = sld [smem:[#allocation5 + $0x5f]] }
 0x1ff   : > { %v4214_v57 = vpop.permute.xlu1 %683  ;;  %v4216_v3 = vpop.permute.xlu0 %647 }
 0x201   : > { %1247 = vrot.lane.b32.xlu0 %v1239_v55, %s3203_s11  ;;  %1142 = vrot.lane.b32.xlu1 %v1134_v43, %s3202_s18  ;;  %v1675_v43 = vmul.f32 %v1674_v29, %v3467_v17 }
 0x203   : > { %v4224_v9 = vpop.permute.xlu1 %792  ;;  %v4226_v14 = vpop.permute.xlu0 %663 }
 0x205   : > { %1265 = vrot.lane.b32.xlu0 %v1258_v42, %s3203_s11  ;;  %1229 = vrot.lane.b32.xlu1 %v1224_v10, %s3203_s11  ;;  %v4288_v10 = vmul.f32 %v4283_v23, %v3837_v56 }
 0x207   : > { %v4235_v51 = vpop.permute.xlu1 %808  ;;  %v4237_v13 = vpop.permute.xlu0 %703 }
 0x208   : > { %5756 = vst [vmem:[#allocation76_spill] sm:$0xff] %v4237_v13 }
 0x209   : > { %1287 = vrot.lane.b32.xlu0 %v3602_v58, %s3203_s11  ;;  %1245 = vrot.lane.b32.xlu1 %v1238_v8, %s3203_s11 }
 0x20b   : > { %v4244_v60 = vpop.permute.xlu1 %848  ;;  %v4246_v52 = vpop.permute.xlu0 %828 }
 0x20c   : > { %5757 = vst [vmem:[#allocation77_spill] sm:$0xff] %v4244_v60 }
 0x20d   : > { %1374 = vrot.lane.b32.xlu0 %v3622_v0, %s3204_s5  ;;  %1267 = vrot.lane.b32.xlu1 %v3626_v1, %s3203_s11  ;;  %v1676_v0 = vmul.f32 %v1674_v29, %v3837_v56  ;;  %v1677_v1 = vmul.f32 %v1674_v29, %v3882_v26 }
 0x20f   : > { %v4252_v46 = vpop.permute.xlu1 %973  ;;  %v4254_v49 = vpop.permute.xlu0 %937  ;;  %v1684_v55 = vrot.slane %v1677_v1, 4  ;;  %v5639_v1 = vrot.slane %v4288_v10, 4 }
 0x210   : > { %5758 = vst [vmem:[#allocation78_spill] sm:$0xff] %v4252_v46 }
 0x211   : > { %1390 = vrot.lane.b32.xlu0 %v3629_v2, %s3204_s5  ;;  %1285 = vrot.lane.b32.xlu1 %v3638_v4, %s3203_s11  ;;  %v1682_v4 = vrot.slane %v1676_v0, 4 }
 0x213   : > { %v4260_v58 = vpop.permute.xlu1 %1082  ;;  %v4262_v21 = vpop.permute.xlu0 %953 }
 0x215   : > { %1412 = vrot.lane.b32.xlu0 %v3642_v5, %s3204_s5  ;;  %1392 = vrot.lane.b32.xlu1 %v3645_v6, %s3204_s5  ;;  %v1685_v6 = vsel %vm593_vm2, %v1682_v4, %v1684_v55  ;;  %v5764_v55 = vrot.slane %v3740_v47, 4 }
 0x217   : > { %v4270_v2 = vpop.permute.xlu1 %1098  ;;  %v4272_v37 = vpop.permute.xlu0 %993 }
 0x218   : > { %5759 = vst [vmem:[#allocation79_spill] sm:$0xff] %v4272_v37 }
 0x219   : > { %1430 = vrot.lane.b32.xlu0 %v3653_v11, %s3204_s5  ;;  %1410 = vrot.lane.b32.xlu1 %v3657_v12, %s3204_s5  ;;  %v1681_v11 = vrot.slane %v1675_v43, 4  ;;  %v1696_v12 = vmul.f32 %v4283_v23, %v3467_v17 }
 0x21b   : > { %v4279_v42 = vpop.permute.xlu1 %1138  ;;  %v4281_v5 = vpop.permute.xlu0 %1118  ;;  %v1683_v0 = vsel %vm593_vm2, %v1681_v11, %v1682_v4  ;;  %v5767_v4 = vrot.slane %v3816_v19, 4 }
 0x21c   : > { %5760 = vst [vmem:[#allocation80_spill] sm:$0xff] %v4279_v42  ;;  %5761 = vst [vmem:[#allocation81_spill] sm:$0xff] %v4281_v5 }
 0x21d   : > { %1688 = vrot.lane.b32.xlu0 %v1685_v6, %s5711_s30  ;;  %1432 = vrot.lane.b32.xlu1 %v3667_v18, %s3204_s5  ;;  %v1702_v6 = vrot.slane %v1696_v12, 4  ;;  %v5770_v12 = vrot.slane %v3889_v35, 4  ;;  %v5775_v35 = vrot.slane %v3843_v7, 4 }
 0x21f   : > { %v4295_v8 = vpop.permute.xlu1 %1263  ;;  %v4297_v29 = vpop.permute.xlu0 %1227  ;;  %v1704_v17 = vsel %vm593_vm2, %v1702_v6, %v5639_v1  ;;  %v4349_v1 = vmul.f32 %v4059_v15, %v3567_v50 }
 0x220   : > { %5762 = vst [vmem:[#allocation82_spill] sm:$0xff] %v4295_v8  ;;  %5763 = vst [vmem:[#allocation83_spill] sm:$0xff] %v4297_v29 }
 0x221   : > { %778 = vrot.lane.b32.xlu0 %v5764_v55, %s5711_s30  ;;  %1686 = vrot.lane.b32.xlu1 %v1683_v0, %s5711_s30  ;;  %v5771_v0 = vrot.slane %v3707_v45, 4  ;;  %v4326_v55 = vstv %s2874_s26  ;;  %s4817_s26 = sld [smem:[#allocation5 + $0x31]] }
 0x223   : > { %v4305_v18 = vpop.permute.xlu1 %1372  ;;  %v4307_v43 = vpop.permute.xlu0 %1243 }
 0x224   : > { %5765 = vst [vmem:[#allocation84_spill] sm:$0xff] %v4305_v18  ;;  %5766 = vst [vmem:[#allocation85_spill] sm:$0xff] %v4307_v43 }
 0x225   : > { %898 = vrot.lane.b32.xlu0 %v5767_v4, %s5748_s6  ;;  %1707 = vrot.lane.b32.xlu1 %v1704_v17, %s5711_s30  ;;  %v4334_v17 = vmul.f32 %v4326_v55, %v3567_v50  ;;  %v5774_v4 = vrot.slane %v3941_v31, 4  ;;  %v5778_v31 = vrot.slane %v3859_v33, 4  ;;  %v5781_v50 = vrot.slane %v3978_v61, 4 }
 0x226   : > { %v5784_v33 = vrot.slane %v4011_v63, 4 }
 0x227   : > { %v4316_v47 = vpop.permute.xlu1 %1388  ;;  %v4318_v11 = vpop.permute.xlu0 %1283 }
 0x228   : > { %5768 = vst [vmem:[#allocation86_spill] sm:$0xff] %v4316_v47  ;;  %5769 = vst [vmem:[#allocation87_spill] sm:$0xff] %v4318_v11 }
 0x229   : > { %1068 = vrot.lane.b32.xlu0 %v5770_v12, %s5667_s14  ;;  %753 = vrot.lane.b32.xlu1 %v5771_v0, %s5711_s30  ;;  %v5642_v0 = vrot.slane %v4334_v17, 4 }
 0x22b   : > { %v4328_v6 = vpop.permute.xlu1 %1428  ;;  %v4330_v19 = vpop.permute.xlu0 %1408 }
 0x22c   : > { %5772 = vst [vmem:[#allocation88_spill] sm:$0xff] %v4328_v6  ;;  %5773 = vst [vmem:[#allocation89_spill] sm:$0xff] %v4330_v19  ;;  %v5789_v6 = vld [vmem:[#allocation31_spill] sm:$0xff]  ;;  %v5843_v19 = vld [vmem:[#allocation58_spill] sm:$0xff] }
 0x22d   : > { %1188 = vrot.lane.b32.xlu0 %v5774_v4, %s3202_s18  ;;  %923 = vrot.lane.b32.xlu1 %v5775_v35, %s5748_s6  ;;  %v5641_v35 = vrot.slane %v4349_v1, 4  ;;  %v5790_v11 = vrot.slane %v5789_v6, 4  ;;  %v5795_v6 = vrot.slane %v3852_v22, 4 }
 0x22f   : > { %v4342_v45 = vpop.permute.xlu1 %1607  ;;  %v4344_v12 = vpop.permute.xlu0 %1625 }
 0x230   : > { %5776 = vst [vmem:[#allocation90_spill] sm:$0xff] %v4342_v45  ;;  %5777 = vst [vmem:[#allocation91_spill] sm:$0xff] %v4344_v12 }
 0x231   : > { %1358 = vrot.lane.b32.xlu0 %v5642_v0, %s3203_s11  ;;  %1043 = vrot.lane.b32.xlu1 %v5778_v31, %s5667_s14  ;;  %v763_v31 = vmul.f32 %v3696_v40, %v3496_v30  ;;  %v862_v40 = vmul.f32 %v3835_v16, %v3496_v30  ;;  %v5791_v16 = vld [vmem:[#allocation28_spill] sm:$0xff] }
 0x233   : > { %v4357_v7 = vpop.permute.xlu1 %1623  ;;  %v4359_v4 = vpop.permute.xlu0 %1643 }
 0x234   : > { %5779 = vst [vmem:[#allocation92_spill] sm:$0xff] %v4357_v7  ;;  %5780 = vst [vmem:[#allocation93_spill] sm:$0xff] %v4359_v4 }
 0x235   : > { %1478 = vrot.lane.b32.xlu0 %v5641_v35, %s3204_s5  ;;  %1213 = vrot.lane.b32.xlu1 %v5781_v50, %s3202_s18  ;;  %v717_v35 = vmul.f32 %v3710_v48, %v3496_v30  ;;  %v769_v50 = vrot.slane %v763_v31, 4  ;;  %v883_v31 = vmul.f32 %v5791_v16, %v3496_v30  ;;  %v5798_v16 = vld [vmem:[#allocation43_spill] sm:$0xff] }
 0x237   : > { %v4368_v15 = vpop.permute.xlu1 %1645  ;;  %v4370_v39 = vpop.permute.xlu0 %1665  ;;  %v723_v63 = vrot.slane %v717_v35, 4  ;;  %v868_v35 = vrot.slane %v862_v40, 4  ;;  %v5796_v40 = vld [vmem:[#allocation45_spill] sm:$0xff] }
 0x238   : > { %5782 = vst [vmem:[#allocation94_spill] sm:$0xff] %v4368_v15  ;;  %5783 = vst [vmem:[#allocation95_spill] sm:$0xff] %v4370_v39 }
 0x239   : > { %730 = vrot.lane.b32.xlu0 %v3774_v28, %s5711_s30  ;;  %1333 = vrot.lane.b32.xlu1 %v5784_v33, %s3203_s11  ;;  %v5786_v28 = vrot.slane %v4078_v44, 4  ;;  %v738_v33 = vmul.f32 %v3699_v41, %v3496_v30  ;;  %v725_v44 = vsel %vm593_vm2, %v723_v63, %v5790_v11  ;;  %v870_v11 = vsel %vm593_vm2, %v868_v35, %v5795_v6  ;;  %v5801_v35 = vld [vmem:[#allocation53_spill] sm:$0xff] }
 0x23b   : > { %v4381_v0 = vpop.permute.xlu1 %1663  ;;  %v4383_v61 = vpop.permute.xlu0 %667  ;;  %v744_v41 = vrot.slane %v738_v33, 4 }
 0x23c   : > { %5785 = vst [vmem:[#allocation96_spill] sm:$0xff] %v4381_v0  ;;  %v5788_v0 = vrot.slane %v5787_v59, 4  ;;  %v5793_v59 = vld [vmem:[#allocation34_spill] sm:$0xff] }
 0x23d   : > { %751 = vrot.lane.b32.xlu0 %v3795_v54, %s5711_s30  ;;  %1503 = vrot.lane.b32.xlu1 %v5786_v28, %s3204_s5  ;;  %v5794_v37 = vrot.slane %v5793_v59, 4 }
 0x23e   : > { %v771_v54 = vsel %vm593_vm2, %v769_v50, %v5788_v0  ;;  %v889_v50 = vrot.slane %v883_v31, 4  ;;  %v5802_v31 = vld [vmem:[#allocation39_spill] sm:$0xff] }
 0x23f   : > { %v4394_v48 = vpop.permute.xlu1 %649  ;;  %v4396_v39 = vpop.permute.xlu0 %685  ;;  %v746_v0 = vsel %vm593_vm2, %v744_v41, %v5794_v37  ;;  %v5800_v41 = vld [vmem:[#allocation51_spill] sm:$0xff]  ;;  %v908_v59 = vmul.f32 %v5802_v31, %v3496_v30 }
 0x241   : > { %774 = vrot.lane.b32.xlu0 %v771_v54, %s5711_s30  ;;  %728 = vrot.lane.b32.xlu1 %v725_v44, %s5711_s30  ;;  %v5797_v54 = vrot.slane %v5796_v40, 4  ;;  %v914_v40 = vrot.slane %v908_v59, 4 }
 0x243   : > { %v4408_v28 = vpop.permute.xlu1 %665  ;;  %v4410_v42 = vpop.permute.xlu0 %707  ;;  %v891_v44 = vsel %vm593_vm2, %v889_v50, %v5797_v54  ;;  %v5804_v50 = vld [vmem:[#allocation54_spill] sm:$0xff]  ;;  %v5805_v54 = vld [vmem:[#allocation44_spill] sm:$0xff] }
 0x244   : > { %5792 = vst [vmem:[#allocation36_spill] sm:$0xff] %v4410_v42  ;;  %v5808_v42 = vld [vmem:[#allocation46_spill] sm:$0xff] }
 0x245   : > { %749 = vrot.lane.b32.xlu1 %v746_v0, %s5711_s30  ;;  %873 = vrot.lane.b32.xlu0 %v870_v11, %s5748_s6  ;;  %v5803_v11 = vld [vmem:[#allocation49_spill] sm:$0xff]  ;;  %v5809_v60 = vrot.slane %v5808_v42, 4  ;;  %v5814_v42 = vld [vmem:[#allocation47_spill] sm:$0xff] }
 0x246   : > { %v5815_v4 = vrot.slane %v5814_v42, 4  ;;  %v5820_v42 = vld [vmem:[#allocation48_spill] sm:$0xff] }
 0x247   : > { %v4420_v63 = vpop.permute.xlu1 %687  ;;  %v4422_v33 = vpop.permute.xlu0 %794  ;;  %v916_v13 = vsel %vm593_vm2, %v914_v40, %v5809_v60  ;;  %v5821_v12 = vrot.slane %v5820_v42, 4  ;;  %v5827_v42 = vld [vmem:[#allocation62_spill] sm:$0xff] }
 0x249   : > { %776 = vrot.lane.b32.xlu1 %v5798_v16, %s5711_s30  ;;  %894 = vrot.lane.b32.xlu0 %v891_v44, %s5748_s6  ;;  %v1007_v44 = vmul.f32 %v5805_v54, %v3496_v30  ;;  %v5806_v16 = vld [vmem:[#allocation42_spill] sm:$0xff]  ;;  %v5811_v54 = vld [vmem:[#allocation41_spill] sm:$0xff] }
 0x24b   : > { %v4430_v22 = vpop.permute.xlu1 %705  ;;  %v4432_v37 = vpop.permute.xlu0 %810  ;;  %v1013_v59 = vrot.slane %v1007_v44, 4 }
 0x24c   : > { %5799 = vst [vmem:[#allocation31_spill] sm:$0xff] %v4430_v22  ;;  %v1028_v22 = vmul.f32 %v5811_v54, %v3496_v30  ;;  %v5818_v54 = vld [vmem:[#allocation50_spill] sm:$0xff] }
 0x24d   : > { %875 = vrot.lane.b32.xlu1 %v5800_v41, %s5748_s6  ;;  %921 = vrot.lane.b32.xlu0 %v5801_v35, %s5748_s6  ;;  %v1053_v41 = vmul.f32 %v5806_v16, %v3496_v30  ;;  %v5812_v16 = vld [vmem:[#allocation57_spill] sm:$0xff]  ;;  %v1015_v60 = vsel %vm593_vm2, %v1013_v59, %v5815_v4  ;;  %v5822_v59 = vld [vmem:[#allocation59_spill] sm:$0xff] }
 0x24e   : > { %v1152_v15 = vmul.f32 %v5812_v16, %v3496_v30  ;;  %v1034_v44 = vrot.slane %v1028_v22, 4  ;;  %v1173_v16 = vmul.f32 %v5818_v54, %v3496_v30 }
 0x24f   : > { %v4440_v0 = vpop.permute.xlu1 %812  ;;  %v4442_v6 = vpop.permute.xlu0 %832 }
 0x250   : > { %v1036_v4 = vsel %vm593_vm2, %v1034_v44, %v5821_v12 }
 0x251   : > { %896 = vrot.lane.b32.xlu1 %v5803_v11, %s5748_s6  ;;  %1020 = vrot.lane.b32.xlu0 %v5804_v50, %s5667_s14  ;;  %v5810_v11 = vld [vmem:[#allocation55_spill] sm:$0xff]  ;;  %v1059_v50 = vrot.slane %v1053_v41, 4  ;;  %v1158_v41 = vrot.slane %v1152_v15, 4  ;;  %v1179_v15 = vrot.slane %v1173_v16, 4  ;;  %v5831_v16 = vld [vmem:[#allocation68_spill] sm:$0xff] }
 0x253   : > { %v4452_v35 = vpop.permute.xlu1 %830  ;;  %v4454_v31 = vpop.permute.xlu0 %850 }
 0x254   : > { %5807 = vst [vmem:[#allocation28_spill] sm:$0xff] %v4454_v31 }
 0x255   : > { %919 = vrot.lane.b32.xlu1 %v916_v13, %s5748_s6  ;;  %1041 = vrot.lane.b32.xlu0 %v5810_v11, %s5667_s14  ;;  %v5816_v13 = vld [vmem:[#allocation56_spill] sm:$0xff] }
 0x256   : > { %v5817_v40 = vrot.slane %v5816_v13, 4  ;;  %v5823_v13 = vrot.slane %v5822_v59, 4 }
 0x257   : > { %v4466_v38 = vpop.permute.xlu1 %852  ;;  %v4468_v31 = vpop.permute.xlu0 %957 }
 0x258   : > { %5813 = vst [vmem:[#allocation34_spill] sm:$0xff] %v4466_v38  ;;  %v1061_v11 = vsel %vm593_vm2, %v1059_v50, %v5817_v40  ;;  %v1160_v50 = vsel %vm593_vm2, %v1158_v41, %v5823_v13  ;;  %v5825_v40 = vld [vmem:[#allocation60_spill] sm:$0xff]  ;;  %v5830_v41 = vld [vmem:[#allocation65_spill] sm:$0xff] }
 0x259   : > { %1018 = vrot.lane.b32.xlu1 %v1015_v60, %s5667_s14  ;;  %1064 = vrot.lane.b32.xlu0 %v1061_v11, %s5667_s14  ;;  %v5826_v11 = vrot.slane %v5825_v40, 4  ;;  %v5835_v40 = vld [vmem:[#allocation66_spill] sm:$0xff] }
 0x25b   : > { %v4480_v38 = vpop.permute.xlu1 %939  ;;  %v4482_v7 = vpop.permute.xlu0 %975  ;;  %v1181_v54 = vsel %vm593_vm2, %v1179_v15, %v5826_v11  ;;  %v1344_v15 = vmul.f32 %v4326_v55, %v3582_v53  ;;  %v5836_v11 = vld [vmem:[#allocation69_spill] sm:$0xff] }
 0x25c   : > { %5819 = vst [vmem:[#allocation45_spill] sm:$0xff] %v4482_v7 }
 0x25d   : > { %1039 = vrot.lane.b32.xlu1 %v1036_v4, %s5667_s14  ;;  %1163 = vrot.lane.b32.xlu0 %v1160_v50, %s3202_s18  ;;  %v5832_v4 = vld [vmem:[#allocation52_spill] sm:$0xff]  ;;  %v1350_v27 = vrot.slane %v1344_v15, 4 }
 0x25e   : > { %v1198_v59 = vmul.f32 %v5832_v4, %v3496_v30 }
 0x25f   : > { %v4492_v22 = vpop.permute.xlu1 %955  ;;  %v4494_v60 = vpop.permute.xlu0 %997 }
 0x260   : > { %5824 = vst [vmem:[#allocation43_spill] sm:$0xff] %v4494_v60 }
 0x261   : > { %1066 = vrot.lane.b32.xlu1 %v5827_v42, %s5667_s14  ;;  %1184 = vrot.lane.b32.xlu0 %v1181_v54, %s3202_s18  ;;  %v1204_v54 = vrot.slane %v1198_v59, 4  ;;  %v5837_v42 = vld [vmem:[#allocation61_spill] sm:$0xff] }
 0x263   : > { %v4502_v12 = vpop.permute.xlu1 %977  ;;  %v4504_v44 = vpop.permute.xlu0 %1084 }
 0x264   : > { %5828 = vst [vmem:[#allocation51_spill] sm:$0xff] %v4502_v12  ;;  %5829 = vst [vmem:[#allocation53_spill] sm:$0xff] %v4504_v44  ;;  %v2049_v44 = vstv %s2911_s17  ;;  %s4962_s17 = sld [smem:[#allocation5 + $0x4a]] }
 0x265   : > { %1165 = vrot.lane.b32.xlu1 %v5830_v41, %s3202_s18  ;;  %1211 = vrot.lane.b32.xlu0 %v5831_v16, %s3202_s18  ;;  %v1297_v41 = vmul.f32 %v5837_v42, %v3496_v30  ;;  %v1343_v16 = vmul.f32 %v4326_v55, %v3496_v30  ;;  %v4536_v42 = vld [vmem:[#allocation4] sm:$0xff] }
 0x266   : > { %v1318_v30 = vmul.f32 %v4536_v42, %v5843_v19  ;;  %v5844_v55 = vld [vmem:[#allocation70_spill] sm:$0xff] }
 0x267   : > { %v4512_v13 = vpop.permute.xlu1 %995  ;;  %v4514_v50 = vpop.permute.xlu0 %1100  ;;  %v1303_v59 = vrot.slane %v1297_v41, 4  ;;  %v1442_v20 = vmul.f32 %v4536_v42, %v5844_v55  ;;  %v5851_v55 = vld [vmem:[#allocation67_spill] sm:$0xff] }
 0x268   : > { %5833 = vst [vmem:[#allocation39_spill] sm:$0xff] %v4512_v13  ;;  %5834 = vst [vmem:[#allocation49_spill] sm:$0xff] %v4514_v50  ;;  %v5840_v13 = vld [vmem:[#allocation63_spill] sm:$0xff]  ;;  %v1324_v41 = vrot.slane %v1318_v30, 4  ;;  %v5856_v30 = vrot.slane %v4334_v17, 4 }
 0x269   : > { %1186 = vrot.lane.b32.xlu1 %v5835_v40, %s3202_s18  ;;  %1310 = vrot.lane.b32.xlu0 %v5836_v11, %s3203_s11  ;;  %v5841_v45 = vrot.slane %v5840_v13, 4  ;;  %v5842_v40 = vld [vmem:[#allocation71_spill] sm:$0xff]  ;;  %v1349_v11 = vrot.slane %v1343_v16, 4  ;;  %v1448_v16 = vrot.slane %v1442_v20, 4 }
 0x26b   : > { %v4526_v4 = vpop.permute.xlu1 %1102  ;;  %v4528_v60 = vpop.permute.xlu0 %1122  ;;  %v1206_v53 = vsel %vm593_vm2, %v1204_v54, %v5841_v45  ;;  %v5847_v45 = vld [vmem:[#allocation64_spill] sm:$0xff] }
 0x26c   : > { %5838 = vst [vmem:[#allocation54_spill] sm:$0xff] %v4526_v4  ;;  %5839 = vst [vmem:[#allocation44_spill] sm:$0xff] %v4528_v60  ;;  %v5848_v15 = vrot.slane %v5847_v45, 4  ;;  %v5852_v60 = vrot.slane %v5851_v55, 4  ;;  %v5853_v45 = vrot.slane %v4091_v62, 4  ;;  %v5862_v55 = vrot.slane %v4102_v32, 4 }
 0x26d   : > { %1209 = vrot.lane.b32.xlu1 %v1206_v53, %s3202_s18  ;;  %1331 = vrot.lane.b32.xlu0 %v5842_v40, %s3203_s11  ;;  %v1351_v53 = vsel %vm593_vm2, %v1349_v11, %v1350_v27 }
 0x26e   : > { %v1305_v54 = vsel %vm593_vm2, %v1303_v59, %v5848_v15  ;;  %v1450_v59 = vsel %vm593_vm2, %v1448_v16, %v5853_v45  ;;  %v1353_v15 = vsel %vm593_vm2, %v1350_v27, %v5856_v30  ;;  %v4585_v27 = vld [vmem:[#allocation4 + $0x18] sm:$0xff]  ;;  %v5861_v16 = vrot.slane %v4349_v1, 4 }
 0x26f   : > { %v4542_v8 = vpop.permute.xlu1 %1120  ;;  %v4544_v13 = vpop.permute.xlu0 %1140 }
 0x270   : > { %5845 = vst [vmem:[#allocation42_spill] sm:$0xff] %v4542_v8  ;;  %5846 = vst [vmem:[#allocation46_spill] sm:$0xff] %v4544_v13  ;;  %v1326_v13 = vsel %vm593_vm2, %v1324_v41, %v5852_v60  ;;  %v1473_v45 = vsel %vm593_vm2, %v5862_v55, %v5861_v16  ;;  %v1745_v16 = vstv %s2896_s3  ;;  %s4826_s3 = sld [smem:[#allocation5 + $0x38]] }
 0x271   : > { %1308 = vrot.lane.b32.xlu1 %v1305_v54, %s3203_s11  ;;  %1354 = vrot.lane.b32.xlu0 %v1351_v53, %s3203_s11  ;;  %v1698_v54 = vmul.f32 %v4283_v23, %v3882_v26 }
 0x273   : > { %v4552_v19 = vpop.permute.xlu1 %1142  ;;  %v4554_v40 = vpop.permute.xlu0 %1247  ;;  %v1705_v53 = vrot.slane %v1698_v54, 4 }
 0x274   : > { %5849 = vst [vmem:[#allocation55_spill] sm:$0xff] %v4552_v19  ;;  %5850 = vst [vmem:[#allocation41_spill] sm:$0xff] %v4554_v40  ;;  %v1799_v19 = vstv %s2899_s25  ;;  %v4738_v40 = vld [vmem:[#allocation4 + $0x20] sm:$0xff]  ;;  %s4853_s25 = sld [smem:[#allocation5 + $0x5b]] }
 0x275   : > { %1329 = vrot.lane.b32.xlu1 %v1326_v13, %s3203_s11  ;;  %1453 = vrot.lane.b32.xlu0 %v1450_v59, %s3204_s5  ;;  %v1720_v13 = vstv %s2895_s16  ;;  %v5863_v59 = vrot.slane %v4288_v10, 4  ;;  %v2051_v4 = vmul.f32 %v4738_v40, %v2049_v44  ;;  %s4824_s16 = sld [smem:[#allocation5 + $0x4d]] }
 0x276   : > { %v1722_v41 = vmul.f32 %v1720_v13, %v3837_v56  ;;  %v1721_v23 = vmul.f32 %v4585_v27, %v1720_v13  ;;  %v1723_v1 = vmul.f32 %v1720_v13, %v3882_v26 }
 0x277   : > { %v4564_v11 = vpop.permute.xlu1 %1229  ;;  %v4566_v20 = vpop.permute.xlu0 %1265 }
 0x278   : > { %5854 = vst [vmem:[#allocation57_spill] sm:$0xff] %v4564_v11  ;;  %5855 = vst [vmem:[#allocation47_spill] sm:$0xff] %v4566_v20  ;;  %v1728_v30 = vrot.slane %v1722_v41, 4 }
 0x279   : > { %1356 = vrot.lane.b32.xlu1 %v1353_v15, %s3203_s11  ;;  %1474 = vrot.lane.b32.xlu0 %v4120_v24, %s3204_s5 }
 0x27b   : > { %v4576_v62 = vpop.permute.xlu1 %1245  ;;  %v4578_v60 = vpop.permute.xlu0 %1287 }
 0x27c   : > { %5857 = vst [vmem:[#allocation56_spill] sm:$0xff] %v4576_v62  ;;  %5858 = vst [vmem:[#allocation50_spill] sm:$0xff] %v4578_v60  ;;  %v1819_v60 = vstv %s2900_s13  ;;  %v1865_v62 = vstv %s2902_s8  ;;  %s4845_s13 = sld [smem:[#allocation5 + $0x51]] }
 0x27d   : > { %1455 = vrot.lane.b32.xlu1 %v4127_v25, %s3204_s5  ;;  %1501 = vrot.lane.b32.xlu0 %v4132_v34, %s3204_s5  ;;  %v1706_v25 = vsel %vm593_vm2, %v5863_v59, %v1705_v53  ;;  %v1727_v34 = vrot.slane %v1721_v23, 4  ;;  %v1730_v23 = vrot.slane %v1723_v1, 4  ;;  %v1759_v59 = vstv %s2897_s1  ;;  %s4831_s1 = sld [smem:[#allocation5 + $0x54]]  ;;  %s4859_s8 = sld [smem:[#allocation5 + $0x59]] }
 0x27e   : > { %v1761_v1 = vmul.f32 %v1759_v59, %v3837_v56 }
 0x27f   : > { %v4588_v17 = vpop.permute.xlu1 %1267  ;;  %v4590_v24 = vpop.permute.xlu0 %1374  ;;  %v1729_v32 = vsel %vm593_vm2, %v1727_v34, %v1728_v30 }
 0x280   : > { %5859 = vst [vmem:[#allocation48_spill] sm:$0xff] %v4588_v17  ;;  %5860 = vst [vmem:[#allocation59_spill] sm:$0xff] %v4590_v24 }
 0x281   : > { %1476 = vrot.lane.b32.xlu1 %v1473_v45, %s3204_s5  ;;  %1709 = vrot.lane.b32.xlu0 %v1706_v25, %s5711_s30  ;;  %v1731_v45 = vsel %vm593_vm2, %v1728_v30, %v1730_v23 }
 0x283   : > { %v4602_v15 = vpop.permute.xlu1 %1285  ;;  %v4604_v54 = vpop.permute.xlu0 %1390 }
 0x284   : > { %5864 = vst [vmem:[#allocation60_spill] sm:$0xff] %v4602_v15  ;;  %5865 = vst [vmem:[#allocation62_spill] sm:$0xff] %v4604_v54 }
 0x285   : > { %1499 = vrot.lane.b32.xlu1 %v4135_v36, %s3204_s5  ;;  %1732 = vrot.lane.b32.xlu0 %v1729_v32, %s5711_s30  ;;  %v1747_v36 = vmul.f32 %v1745_v16, %v3837_v56  ;;  %v1779_v32 = vstv %s2898_s10  ;;  %s4833_s10 = sld [smem:[#allocation5 + $0x3d]] }
 0x287   : > { %v4611_v10 = vpop.permute.xlu1 %1392  ;;  %v4613_v41 = vpop.permute.xlu0 %1412 }
 0x288   : > { %5866 = vst [vmem:[#allocation65_spill] sm:$0xff] %v4611_v10  ;;  %5867 = vst [vmem:[#allocation68_spill] sm:$0xff] %v4613_v41  ;;  %v1802_v10 = vmul.f32 %v1799_v19, %v3882_v26 }
 0x289   : > { %1711 = vrot.lane.b32.xlu1 %v1705_v53, %s5711_s30  ;;  %1736 = vrot.lane.b32.xlu0 %v1730_v23, %s5711_s30  ;;  %v1746_v53 = vmul.f32 %v4585_v27, %v1745_v16 }
 0x28b   : > { %v4617_v13 = vpop.permute.xlu1 %1410  ;;  %v4619_v55 = vpop.permute.xlu0 %1430 }
 0x28c   : > { %5868 = vst [vmem:[#allocation52_spill] sm:$0xff] %v4617_v13  ;;  %5869 = vst [vmem:[#allocation66_spill] sm:$0xff] %v4619_v55  ;;  %v1821_v55 = vmul.f32 %v1819_v60, %v3837_v56 }
 0x28d   : > { %1734 = vrot.lane.b32.xlu1 %v1731_v45, %s5711_s30  ;;  %1752 = vrot.lane.b32.xlu0 %v1747_v36, %s5748_s6  ;;  %v1760_v36 = vmul.f32 %v4585_v27, %v1759_v59  ;;  %v1780_v45 = vmul.f32 %v4585_v27, %v1779_v32  ;;  %s4722_s30 = sld [smem:[#allocation5 + $0x34]] }
 0x28e   : > { %v1827_v41 = vrot.slane %v1821_v55, 4  ;;  %v1822_v55 = vmul.f32 %v1819_v60, %v3882_v26 }
 0x28f   : > { %v4625_v25 = vpop.permute.xlu1 %1432  ;;  %v4627_v34 = vpop.permute.xlu0 %1688 }
 0x290   : > { %5870 = vst [vmem:[#allocation69_spill] sm:$0xff] %v4625_v25  ;;  %5871 = vst [vmem:[#allocation61_spill] sm:$0xff] %v4627_v34  ;;  %v1781_v34 = vmul.f32 %v1779_v32, %v3837_v56 }
 0x291   : > { %1750 = vrot.lane.b32.xlu1 %v1746_v53, %s5748_s6  ;;  %1768 = vrot.lane.b32.xlu0 %v1761_v1, %s5748_s6  ;;  %v1762_v53 = vmul.f32 %v1759_v59, %v3882_v26  ;;  %v1782_v1 = vmul.f32 %v1779_v32, %v3882_v26  ;;  %v1801_v59 = vmul.f32 %v1799_v19, %v3837_v56 }
 0x292   : > { %v1800_v32 = vmul.f32 %v4585_v27, %v1799_v19 }
 0x293   : > { %v4633_v30 = vpop.permute.xlu1 %1686  ;;  %v4635_v23 = vpop.permute.xlu0 %778 }
 0x294   : > { %5872 = vst [vmem:[#allocation63_spill] sm:$0xff] %v4633_v30 }
 0x295   : > { %1766 = vrot.lane.b32.xlu1 %v1760_v36, %s5748_s6  ;;  %1786 = vrot.lane.b32.xlu0 %v1780_v45, %s5748_s6  ;;  %v1820_v36 = vmul.f32 %v4585_v27, %v1819_v60  ;;  %v1868_v60 = vmul.f32 %v1865_v62, %v3882_v26 }
 0x297   : > { %v4641_v16 = vpop.permute.xlu1 %1707  ;;  %v4643_v25 = vpop.permute.xlu0 %898 }
 0x298   : > { %5873 = vst [vmem:[#allocation71_spill] sm:$0xff] %v4641_v16  ;;  %v1840_v16 = vstv %s2901_s29  ;;  %s4855_s29 = sld [smem:[#allocation5 + $0x44]] }
 0x299   : > { %1770 = vrot.lane.b32.xlu1 %v1762_v53, %s5748_s6  ;;  %1790 = vrot.lane.b32.xlu0 %v1782_v1, %s5748_s6  ;;  %v1842_v30 = vmul.f32 %v1840_v16, %v3837_v56  ;;  %v1826_v53 = vrot.slane %v1820_v36, 4  ;;  %v1841_v1 = vmul.f32 %v4585_v27, %v1840_v16  ;;  %v1843_v20 = vmul.f32 %v1840_v16, %v3882_v26 }
 0x29b   : > { %v4651_v15 = vpop.permute.xlu1 %753  ;;  %v4653_v45 = vpop.permute.xlu0 %1068  ;;  %v1828_v54 = vsel %vm593_vm2, %v1826_v53, %v1827_v41  ;;  %v1848_v24 = vrot.slane %v1842_v30, 4  ;;  %v1829_v53 = vrot.slane %v1822_v55, 4  ;;  %v1867_v30 = vmul.f32 %v1865_v62, %v3837_v56 }
 0x29c   : > { %5874 = vst [vmem:[#allocation58_spill] sm:$0xff] %v4653_v45  ;;  %v1850_v19 = vrot.slane %v1843_v20, 4  ;;  %v1866_v55 = vmul.f32 %v4585_v27, %v1865_v62  ;;  %v1904_v20 = vstv %s2904_s15  ;;  %s4861_s15 = sld [smem:[#allocation5 + $0x36]] }
 0x29d   : > { %1788 = vrot.lane.b32.xlu1 %v1781_v34, %s5748_s6  ;;  %1808 = vrot.lane.b32.xlu0 %v1801_v59, %s5748_s6  ;;  %v1847_v34 = vrot.slane %v1841_v1, 4  ;;  %v1830_v16 = vsel %vm593_vm2, %v1827_v41, %v1829_v53  ;;  %v1905_v62 = vmul.f32 %v4585_v27, %v1904_v20 }
 0x29e   : > { %v1872_v41 = vrot.slane %v1866_v55, 4 }
 0x29f   : > { %v4661_v13 = vpop.permute.xlu1 %923  ;;  %v4663_v17 = vpop.permute.xlu0 %1188  ;;  %v1849_v47 = vsel %vm593_vm2, %v1847_v34, %v1848_v24 }
 0x2a0   : > { %5875 = vst [vmem:[#allocation70_spill] sm:$0xff] %v4661_v13  ;;  %5876 = vst [vmem:[#allocation64_spill] sm:$0xff] %v4663_v17  ;;  %v2130_v13 = vstv %s2915_s22  ;;  %s5331_s22 = sld [smem:[#allocation5 + $0x37]] }
 0x2a1   : > { %1806 = vrot.lane.b32.xlu1 %v1800_v32, %s5748_s6  ;;  %1831 = vrot.lane.b32.xlu0 %v1828_v54, %s5748_s6  ;;  %v1873_v32 = vrot.slane %v1867_v30, 4 }
 0x2a3   : > { %v4670_v59 = vpop.permute.xlu1 %1043  ;;  %v4672_v36 = vpop.permute.xlu0 %1358 }
 0x2a4   : > { %5877 = vst [vmem:[#allocation67_spill] sm:$0xff] %v4672_v36  ;;  %v1875_v36 = vrot.slane %v1868_v60, 4  ;;  %v1874_v60 = vsel %vm593_vm2, %v1872_v41, %v1873_v32 }
 0x2a5   : > { %1810 = vrot.lane.b32.xlu1 %v1802_v10, %s5748_s6  ;;  %1852 = vrot.lane.b32.xlu0 %v1849_v47, %s5748_s6  ;;  %v1851_v47 = vsel %vm593_vm2, %v1848_v24, %v1850_v19 }
 0x2a7   : > { %v4681_v54 = vpop.permute.xlu1 %1213  ;;  %v4683_v1 = vpop.permute.xlu0 %1478 }
 0x2a8   : > { %5878 = vst [vmem:[#allocation97_spill] sm:$0xff] %v4681_v54  ;;  %5879 = vst [vmem:[#allocation98_spill] sm:$0xff] %v4683_v1  ;;  %v1876_v1 = vsel %vm593_vm2, %v1873_v32, %v1875_v36 }
 0x2a9   : > { %1833 = vrot.lane.b32.xlu1 %v1830_v16, %s5748_s6  ;;  %1856 = vrot.lane.b32.xlu0 %v1850_v19, %s5748_s6  ;;  %v1985_v16 = vstv %s2908_s27  ;;  %s4921_s27 = sld [smem:[#allocation5 + $0x49]] }
 0x2aa   : > { %v1987_v55 = vmul.f32 %v1985_v16, %v3837_v56  ;;  %v1986_v32 = vmul.f32 %v4585_v27, %v1985_v16  ;;  %v1988_v11 = vmul.f32 %v1985_v16, %v3882_v26  ;;  %v4741_v16 = vld [vmem:[#allocation4 + $0x28] sm:$0xff] }
 0x2ab   : > { %v4689_v34 = vpop.permute.xlu1 %1333  ;;  %v4691_v10 = vpop.permute.xlu0 %730  ;;  %v2052_v46 = vmul.f32 %v4741_v16, %v2049_v44 }
 0x2ac   : > { %5880 = vst [vmem:[#allocation99_spill] sm:$0xff] %v4689_v34  ;;  %v1993_v54 = vrot.slane %v1987_v55, 4 }
 0x2ad   : > { %1854 = vrot.lane.b32.xlu1 %v1851_v47, %s5748_s6  ;;  %1879 = vrot.lane.b32.xlu0 %v1876_v1, %s5748_s6  ;;  %v1907_v1 = vmul.f32 %v1904_v20, %v3882_v26  ;;  %v1924_v47 = vstv %s2905_s28  ;;  %s4943_s28 = sld [smem:[#allocation5 + $0x60]] }
 0x2ae   : > { %v1925_v5 = vmul.f32 %v4585_v27, %v1924_v47  ;;  %v1927_v55 = vmul.f32 %v1924_v47, %v3882_v26 }
 0x2af   : > { %v4697_v53 = vpop.permute.xlu1 %1503  ;;  %v4699_v30 = vpop.permute.xlu0 %751 }
 0x2b0   : > { %5881 = vst [vmem:[#allocation100_spill] sm:$0xff] %v4697_v53  ;;  %v1926_v53 = vmul.f32 %v1924_v47, %v3837_v56 }
 0x2b1   : > { %1877 = vrot.lane.b32.xlu1 %v1874_v60, %s5748_s6  ;;  %1911 = vrot.lane.b32.xlu0 %v1905_v62, %s5667_s14  ;;  %v1906_v62 = vmul.f32 %v1904_v20, %v3837_v56 }
 0x2b3   : > { %v4705_v24 = vpop.permute.xlu1 %728  ;;  %v4707_v19 = vpop.permute.xlu0 %774 }
 0x2b5   : > { %1881 = vrot.lane.b32.xlu1 %v1875_v36, %s5748_s6  ;;  %1915 = vrot.lane.b32.xlu0 %v1907_v1, %s5667_s14  ;;  %v1992_v36 = vrot.slane %v1986_v32, 4  ;;  %v1995_v32 = vrot.slane %v1988_v11, 4  ;;  %s2912_s6 = sld [smem:[#allocation5 + $0x43]] }
 0x2b7   : > { %v4714_v41 = vpop.permute.xlu1 %749  ;;  %v4716_v60 = vpop.permute.xlu0 %873  ;;  %v1994_v56 = vsel %vm593_vm2, %v1992_v36, %v1993_v54  ;;  %v1996_v11 = vsel %vm593_vm2, %v1993_v54, %v1995_v32 }
 0x2b9   : > { %1913 = vrot.lane.b32.xlu1 %v1906_v62, %s5667_s14  ;;  %1933 = vrot.lane.b32.xlu0 %v1926_v53, %s5667_s14  ;;  %v2010_v62 = vstv %s2909_s23  ;;  %s4952_s23 = sld [smem:[#allocation5 + $0x3e]] }
 0x2ba   : > { %v2012_v45 = vmul.f32 %v4738_v40, %v2010_v62  ;;  %v2013_v36 = vmul.f32 %v4741_v16, %v2010_v62 }
 0x2bb   : > { %v4724_v1 = vpop.permute.xlu1 %776  ;;  %v4726_v34 = vpop.permute.xlu0 %894 }
 0x2bc   : > { %v2018_v47 = vrot.slane %v2012_v45, 4  ;;  %v2020_v8 = vrot.slane %v2013_v36, 4  ;;  %v1964_v36 = vstv %s2907_s24  ;;  %s2926_s24 = sld [smem:[#allocation5 + $0x45]] }
 0x2bd   : > { %1931 = vrot.lane.b32.xlu1 %v1925_v5, %s5667_s14  ;;  %1997 = vrot.lane.b32.xlu0 %v1994_v56, %s5667_s14  ;;  %v1890_v5 = vstv %s4722_s30  ;;  %s4960_s30 = sld [smem:[#allocation5 + $0x52]] }
 0x2be   : > { %v1892_v26 = vmul.f32 %v4738_v40, %v1890_v5  ;;  %v1891_v17 = vmul.f32 %v4585_v27, %v1890_v5  ;;  %v2021_v12 = vsel %vm593_vm2, %v2018_v47, %v2020_v8  ;;  %v1966_v5 = vmul.f32 %v4738_v40, %v1964_v36 }
 0x2bf   : > { %v4733_v20 = vpop.permute.xlu1 %875  ;;  %v4735_v53 = vpop.permute.xlu0 %921 }
 0x2c1   : > { %1935 = vrot.lane.b32.xlu1 %v1927_v55, %s5667_s14  ;;  %2001 = vrot.lane.b32.xlu0 %v1995_v32, %s5667_s14  ;;  %v2011_v55 = vmul.f32 %v4585_v27, %v2010_v62  ;;  %v2050_v62 = vmul.f32 %v4585_v27, %v2049_v44  ;;  %v2131_v44 = vmul.f32 %v4585_v27, %v2130_v13 }
 0x2c3   : > { %v4747_v56 = vpop.permute.xlu1 %896  ;;  %v4749_v18 = vpop.permute.xlu0 %1020  ;;  %v2017_v45 = vrot.slane %v2011_v55, 4 }
 0x2c4   : > { %5882 = vst [vmem:[#allocation101_spill] sm:$0xff] %v4749_v18 }
 0x2c5   : > { %1999 = vrot.lane.b32.xlu1 %v1996_v11, %s5667_s14  ;;  %1897 = vrot.lane.b32.xlu0 %v1892_v26, %s5667_s14  ;;  %v2019_v26 = vsel %vm593_vm2, %v2017_v45, %v2018_v47  ;;  %v1967_v11 = vmul.f32 %v4741_v16, %v1964_v36  ;;  %v1965_v45 = vmul.f32 %v4585_v27, %v1964_v36 }
 0x2c7   : > { %v4756_v50 = vpop.permute.xlu1 %919  ;;  %v4758_v43 = vpop.permute.xlu0 %1041  ;;  %v1974_v47 = vrot.slane %v1967_v11, 4  ;;  %v4793_v11 = vmul.f32 %v4738_v40, %v2130_v13 }
 0x2c8   : > { %5883 = vst [vmem:[#allocation102_spill] sm:$0xff] %v4756_v50  ;;  %5884 = vst [vmem:[#allocation103_spill] sm:$0xff] %v4758_v43  ;;  %v1972_v43 = vrot.slane %v1966_v5, 4 }
 0x2c9   : > { %1895 = vrot.lane.b32.xlu1 %v1891_v17, %s5667_s14  ;;  %2024 = vrot.lane.b32.xlu0 %v2021_v12, %s5667_s14  ;;  %v5886_v12 = vld [vmem:[#allocation25_spill] sm:$0xff] }
 0x2ca   : > { %v587_v17 = vmul.f32 %v4536_v42, %v5886_v12  ;;  %v1975_v5 = vsel %vm593_vm2, %v1972_v43, %v1974_v47 }
 0x2cb   : > { %v4764_v54 = vpop.permute.xlu1 %1018  ;;  %v4766_v32 = vpop.permute.xlu0 %1064 }
 0x2cc   : > { %5885 = vst [vmem:[#allocation104_spill] sm:$0xff] %v4766_v32 }
 0x2cd   : > { %2022 = vrot.lane.b32.xlu1 %v2019_v26, %s5667_s14  ;;  %2056 = vrot.lane.b32.xlu0 %v2050_v62, %s3202_s18  ;;  %v594_v62 = vrot.slane %v587_v17, 4  ;;  %v5887_v26 = vld [vmem:[#allocation27_spill] sm:$0xff]  ;;  %v5892_v17 = vstv %s3580_s4  ;;  %s4815_s4 = sld [smem:[#allocation5 + $0x35]] }
 0x2ce   : > { %v605_v29 = vmul.f32 %v4536_v42, %v5887_v26  ;;  %v557_v26 = vmul.f32 %v4536_v42, %v5892_v17 }
 0x2cf   : > { %v4776_v55 = vpop.permute.xlu1 %1039  ;;  %v4778_v32 = vpop.permute.xlu0 %1163 }
 0x2d0   : > { %v611_v47 = vrot.slane %v605_v29, 4 }
 0x2d1   : > { %2026 = vrot.lane.b32.xlu1 %v2020_v8, %s5667_s14  ;;  %2060 = vrot.lane.b32.xlu0 %v2052_v46, %s3202_s18  ;;  %v5890_v8 = vld [vmem:[#allocation29_spill] sm:$0xff] }
 0x2d2   : > { %v5891_v46 = vrot.slane %v5890_v8, 4 }
 0x2d3   : > { %v4786_v12 = vpop.permute.xlu1 %1066  ;;  %v4788_v7 = vpop.permute.xlu0 %1184 }
 0x2d4   : > { %5888 = vst [vmem:[#allocation25_spill] sm:$0xff] %v4786_v12  ;;  %5889 = vst [vmem:[#allocation27_spill] sm:$0xff] %v4788_v7  ;;  %v596_v36 = vsel %vm593_vm2, %v594_v62, %v5891_v46  ;;  %v1971_v12 = vrot.slane %v1965_v45, 4  ;;  %v2069_v7 = vstv %s2912_s6  ;;  %v2138_v46 = vrot.slane %v4793_v11, 4  ;;  %v5895_v45 = vld [vmem:[#allocation30_spill] sm:$0xff]  ;;  %s2930_s6 = sld [smem:[#allocation5 + $0x61]] }
 0x2d5   : > { %2058 = vrot.lane.b32.xlu1 %v2051_v4, %s3202_s18  ;;  %1978 = vrot.lane.b32.xlu0 %v1975_v5, %s5667_s14  ;;  %v2071_v4 = vmul.f32 %v4738_v40, %v2069_v7  ;;  %v601_v62 = vadd.f32 %v596_v36, %v557_v26  ;;  %v5896_v17 = vrot.slane %v5895_v45, 4  ;;  %v2137_v36 = vrot.slane %v2131_v44, 4  ;;  %v4835_v26 = vld [vmem:[#allocation4 + $0x10] sm:$0xff] }
 0x2d6   : > { %v1973_v5 = vsel %vm593_vm2, %v1971_v12, %v1972_v43  ;;  %v5897_v12 = vld [vmem:[#allocation26_spill] sm:$0xff] }
 0x2d7   : > { %v4808_v50 = vpop.permute.xlu1 %1165  ;;  %v4810_v8 = vpop.permute.xlu0 %1211  ;;  %v613_v29 = vsel %vm593_vm2, %v611_v47, %v5896_v17  ;;  %v653_v43 = vadd.f32 %v4216_v3, %v601_v62  ;;  %v563_v11 = vmul.f32 %v4536_v42, %v5897_v12  ;;  %v565_v47 = vmul.f32 %v4835_v26, %v5897_v12 }
 0x2d8   : > { %5893 = vst [vmem:[#allocation29_spill] sm:$0xff] %v4808_v50  ;;  %5894 = vst [vmem:[#allocation105_spill] sm:$0xff] %v4810_v8  ;;  %v2070_v3 = vmul.f32 %v4585_v27, %v2069_v7  ;;  %v2133_v62 = vmul.f32 %v4741_v16, %v2130_v13  ;;  %v2139_v17 = vsel %vm593_vm2, %v2137_v36, %v2138_v46  ;;  %v5900_v8 = vld [vmem:[#allocation33_spill] sm:$0xff]  ;;  %v2155_v12 = vstv %s4804_s0  ;;  %s2928_s0 = sld [smem:[#allocation5 + $0x53]] }
 0x2d9   : > { %1976 = vrot.lane.b32.xlu1 %v1973_v5, %s5667_s14  ;;  %2078 = vrot.lane.b32.xlu0 %v2071_v4, %s3202_s18  ;;  %v619_v44 = vadd.f32 %v613_v29, %v563_v11  ;;  %v734_v45 = vadd.f32 %v4705_v24, %v653_v43  ;;  %v5901_v50 = vrot.slane %v5900_v8, 4  ;;  %v2072_v29 = vmul.f32 %v4741_v16, %v2069_v7 }
 0x2da   : > { %v4870_v43 = vmul.f32 %v4738_v40, %v2155_v12  ;;  %v4873_v11 = vstv %s4806_s19  ;;  %s2927_s19 = sld [smem:[#allocation5 + $0x4c]] }
 0x2db   : > { %v4839_v4 = vpop.permute.xlu1 %1186  ;;  %v4841_v5 = vpop.permute.xlu0 %1310  ;;  %v621_v18 = vadd.f32 %v5901_v50, %v565_v47  ;;  %v672_v13 = vadd.f32 %v4226_v14, %v619_v44  ;;  %v2140_v14 = vrot.slane %v2133_v62, 4  ;;  %5904 = vst [vmem:[#allocation107_spill] sm:$0xff] %v4873_v11  ;;  %v5905_v47 = vld [vmem:[#allocation24_spill] sm:$0xff]  ;;  %v2035_v62 = vstv %s4815_s4  ;;  %s6001_s4 = smov 16  }
 0x2dc   : > { %5898 = vst [vmem:[#allocation30_spill] sm:$0xff] %v4839_v4  ;;  %5899 = vst [vmem:[#allocation26_spill] sm:$0xff] %v4841_v5  ;;  %v4907_v44 = vstv %s4845_s13  ;;  %s6007_s13 = smov 112  }
 0x2dd   : > { %2076 = vrot.lane.b32.xlu1 %v2070_v3, %s3202_s18  ;;  %2142 = vrot.lane.b32.xlu0 %v2139_v17, %s3202_s18  ;;  %v674_v24 = vadd.f32 %v4383_v61, %v621_v18  ;;  %v758_v36 = vadd.f32 %v4714_v41, %v672_v13  ;;  %v798_v18 = vadd.f32 %v4224_v9, %v734_v45  ;;  %v4888_v17 = vstv %s4824_s16  ;;  %s6003_s16 = smov 48  }
 0x2de   : > { %v4878_v61 = vmul.f32 %v4741_v16, %v2155_v12  ;;  %v624_v3 = vmul.f32 %v4536_v42, %v5905_v47  ;;  %v4891_v41 = vstv %s4826_s3  ;;  %v4894_v9 = vstv %s4831_s1  ;;  %s6004_s3 = smov 64   ;;  %s6005_s1 = smov 80  }
 0x2df   : > { %v4864_v50 = vpop.permute.xlu1 %1209  ;;  %v4866_v8 = vpop.permute.xlu0 %1331  ;;  %v760_v7 = vadd.f32 %v4651_v15, %v674_v24  ;;  %v4897_v45 = vstv %s4833_s10  ;;  %v2141_v15 = vsel %vm593_vm2, %v2138_v46, %v2140_v14  ;;  %v2037_v24 = vmul.f32 %v4738_v40, %v2035_v62  ;;  %s6006_s10 = smov 96  }
 0x2e0   : > { %5902 = vst [vmem:[#allocation33_spill] sm:$0xff] %v4864_v50  ;;  %5903 = vst [vmem:[#allocation106_spill] sm:$0xff] %v4866_v8  ;;  %v5907_v8 = vld [vmem:[#allocation37_spill] sm:$0xff]  ;;  %v879_v5 = vadd.f32 %v4716_v60, %v798_v18  ;;  %v817_v11 = vadd.f32 %v4235_v51, %v758_v36  ;;  %v630_v4 = vrot.slane %v624_v3, 4  ;;  %v4925_v60 = vstv %s4855_s29  ;;  %v5908_v36 = vld [vmem:[#allocation23_spill] sm:$0xff]  ;;  %s2939_s29 = sshll.u32 %s3174_s12, 5 }
 0x2e1   : > { %2080 = vrot.lane.b32.xlu1 %v2072_v29, %s3202_s18  ;;  %2146 = vrot.lane.b32.xlu0 %v2140_v14, %s3202_s18  ;;  %v2163_v29 = vrot.slane %v4870_v43, 4  ;;  %v654_v50 = vadd.f32 %v4394_v48, %v5907_v8  ;;  %v819_v46 = vadd.f32 %v4440_v0, %v760_v7  ;;  %v2156_v14 = vmul.f32 %v4585_v27, %v2155_v12  ;;  %v5909_v18 = vld [vmem:[#allocation32_spill] sm:$0xff]  ;;  %s2715_s12 = scalar_lea.sflag [#allocation7], %s3361_s7 }
 0x2e2   : > { %v4919_v43 = vstv %s4853_s25  ;;  %v4928_v51 = vstv %s4859_s8  ;;  %v571_v0 = vmul.f32 %v4536_v42, %v5908_v36  ;;  %v5910_v3 = vrot.slane %v5909_v18, 4  ;;  %s2833_s25 = sshll.u32 %s3361_s7, 1 }
 0x2e3   : > { %v4899_v13 = vpop.permute.xlu1 %1308  ;;  %v4901_v47 = vpop.permute.xlu0 %1354  ;;  %v735_v48 = vadd.f32 %v4691_v10, %v654_v50  ;;  %v2036_v10 = vmul.f32 %v4585_v27, %v2035_v62  ;;  %v5912_v50 = vld [vmem:[#allocation40_spill] sm:$0xff]  ;;  %v903_v42 = vadd.f32 %v4726_v34, %v817_v11  ;;  %v943_v18 = vadd.f32 %v4254_v49, %v879_v5  ;;  %v5914_v11 = vld [vmem:[#allocation35_spill] sm:$0xff]  ;;  %s190_s8 = scalar_lea.vmem [#allocation10], %s2833_s25 }
 0x2e4   : > { %5906 = vst [vmem:[#allocation24_spill] sm:$0xff] %v4901_v47  ;;  %v632_v7 = vsel %vm593_vm2, %v630_v4, %v5910_v3  ;;  %v693_v8 = vadd.f32 %v4396_v39, %v5912_v50  ;;  %v5913_v4 = vrot.slane %v4878_v61, 4  ;;  %v905_v62 = vadd.f32 %v4643_v25, %v819_v46 }
 0x2e5   : > { %2144 = vrot.lane.b32.xlu1 %v2141_v15, %s3202_s18  ;;  %2042 = vrot.lane.b32.xlu0 %v2037_v24, %s3202_s18  ;;  %v5911_v15 = vld [vmem:[#allocation38_spill] sm:$0xff]  ;;  %v2162_v39 = vrot.slane %v2156_v14, 4  ;;  %v638_v49 = vadd.f32 %v632_v7, %v571_v0  ;;  %v799_v5 = vadd.f32 %v4422_v33, %v735_v48  ;;  %v5915_v25 = vrot.slane %v5914_v11, 4 }
 0x2e6   : > { %v673_v12 = vadd.f32 %v4408_v28, %v5911_v15  ;;  %v2166_v3 = vsel %vm593_vm2, %v2163_v29, %v5913_v4  ;;  %v573_v28 = vmul.f32 %v4835_v26, %v5908_v36  ;;  %v784_v34 = vadd.f32 %v4724_v1, %v693_v8 }
 0x2e7   : > { %v4938_v24 = vpop.permute.xlu1 %1329  ;;  %v4940_v47 = vpop.permute.xlu0 %1453  ;;  %v1024_v26 = vadd.f32 %v4764_v54, %v943_v18  ;;  %v2164_v14 = vsel %vm593_vm2, %v2162_v39, %v2163_v29  ;;  %v2111_v1 = vmul.f32 %v4738_v40, %v4907_v44  ;;  %v692_v33 = vadd.f32 %v4214_v57, %v638_v49 }
 0x2e8   : > { %v759_v15 = vadd.f32 %v4699_v30, %v673_v12  ;;  %v640_v30 = vadd.f32 %v5915_v25, %v573_v28  ;;  %v2195_v12 = vmul.f32 %v4585_v27, %v4897_v45  ;;  %v880_v54 = vadd.f32 %v4733_v20, %v799_v5  ;;  %v5920_v25 = vld [vmem:[#allocation70_spill] sm:$0xff] }
 0x2e9   : > { %2040 = vrot.lane.b32.xlu1 %v2036_v10, %s3202_s18  ;;  %2169 = vrot.lane.b32.xlu0 %v2166_v3, %s3202_s18  ;;  %v962_v48 = vadd.f32 %v4262_v21, %v903_v42  ;;  %v2112_v8 = vmul.f32 %v4741_v16, %v4907_v44  ;;  %v964_v29 = vadd.f32 %v4468_v31, %v905_v62  ;;  %v4989_v57 = vstv %s4921_s27 }
 0x2ea   : > { %v694_v0 = vadd.f32 %v4420_v63, %v640_v30  ;;  %v818_v7 = vadd.f32 %v4432_v37, %v759_v15  ;;  %v783_v20 = vadd.f32 %v4707_v19, %v692_v33  ;;  %v838_v21 = vadd.f32 %v4452_v35, %v784_v34 }
 0x2eb   : > { %v4969_v46 = vpop.permute.xlu1 %1356  ;;  %v4971_v36 = vpop.permute.xlu0 %1474  ;;  %v1048_v10 = vadd.f32 %v4776_v55, %v962_v48  ;;  %v1088_v63 = vadd.f32 %v4260_v58, %v1024_v26  ;;  %v2197_v18 = vmul.f32 %v4741_v16, %v4897_v45  ;;  %v5004_v19 = vstv %s4943_s28 }
 0x2ec   : > { %v785_v31 = vadd.f32 %v4635_v23, %v694_v0  ;;  %v904_v37 = vadd.f32 %v4747_v56, %v818_v7  ;;  %v944_v35 = vadd.f32 %v4480_v38, %v880_v54  ;;  %v2117_v55 = vrot.slane %v2111_v1, 4  ;;  %v5921_v1 = vld [vmem:[#allocation54_spill] sm:$0xff]  ;;  %v5922_v54 = vld [vmem:[#allocation45_spill] sm:$0xff] }
 0x2ed   : > { %2167 = vrot.lane.b32.xlu1 %v2164_v14, %s3202_s18  ;;  %2201 = vrot.lane.b32.xlu0 %v2195_v12, %s3203_s11  ;;  %v2119_v4 = vrot.slane %v2112_v8, 4  ;;  %v5008_v3 = vstv %s4952_s23  ;;  %v1050_v58 = vadd.f32 %v4670_v59, %v964_v29  ;;  %v5916_v23 = vrot.slane %v4878_v61, 4  ;;  %v5923_v8 = vld [vmem:[#allocation27_spill] sm:$0xff]  ;;  %s5502_s23 = scalar_lea.hbm %s5555_s2, %s2939_s29 }
 0x2ee   : > { %v2110_v56 = vmul.f32 %v4585_v27, %v4907_v44  ;;  %v5018_v28 = vstv %s4960_s30  ;;  %v5021_v62 = vstv %s4962_s17  ;;  %v929_v38 = vadd.f32 %v4735_v53, %v838_v21  ;;  %v5924_v29 = vld [vmem:[#allocation83_spill] sm:$0xff]  ;;  %s3207_s17 = smov [#allocation10]  }
 0x2ef   : > { %v4997_v50 = vpop.permute.xlu1 %1455  ;;  %v4999_v42 = vpop.permute.xlu0 %1501  ;;  %v837_v15 = vadd.f32 %v4246_v52, %v783_v20  ;;  %v1169_v59 = vadd.f32 %v4778_v32, %v1088_v63  ;;  %v1107_v39 = vadd.f32 %v4270_v2, %v1048_v10  ;;  %v839_v61 = vadd.f32 %v4442_v6, %v785_v31  ;;  %v5917_v52 = vld [vmem:[#allocation101_spill] sm:$0xff]  ;;  %v5918_v32 = vld [vmem:[#allocation102_spill] sm:$0xff]  ;;  %v5925_v20 = vld [vmem:[#allocation103_spill] sm:$0xff] }
 0x2f0   : > { %v963_v49 = vadd.f32 %v4492_v22, %v904_v37  ;;  %v2196_v44 = vmul.f32 %v4738_v40, %v4897_v45  ;;  %v5037_v53 = vmul.f32 %v4738_v40, %v4928_v51  ;;  %v1025_v26 = vadd.f32 %v5917_v52, %v944_v35  ;;  %v5926_v35 = vld [vmem:[#allocation78_spill] sm:$0xff] }
 0x2f1   : > { %2171 = vrot.lane.b32.xlu1 %v5916_v23, %s3202_s18  ;;  %2205 = vrot.lane.b32.xlu0 %v2197_v18, %s3203_s11  ;;  %v928_v11 = vadd.f32 %v5918_v32, %v837_v15  ;;  %v5919_v2 = vstv %s4817_s26  ;;  %v2120_v22 = vsel %vm593_vm2, %v2117_v55, %v2119_v4  ;;  %v930_v30 = vadd.f32 %v5920_v25, %v839_v61 }
 0x2f2   : > { %v5044_v6 = vmul.f32 %v4585_v27, %v5919_v2  ;;  %v5050_v14 = vmul.f32 %v4585_v27, %v4888_v17  ;;  %v2116_v45 = vrot.slane %v2110_v56, 4  ;;  %v2276_v12 = vmul.f32 %v4585_v27, %v4928_v51  ;;  %v5928_v56 = vld [vmem:[#allocation53_spill] sm:$0xff] }
 0x2f3   : > { %v5029_v34 = vpop.permute.xlu1 %1476  ;;  %v5031_v5 = vpop.permute.xlu0 %1709  ;;  %v1109_v33 = vadd.f32 %v5921_v1, %v1050_v58  ;;  %v983_v48 = vadd.f32 %v5922_v54, %v929_v38  ;;  %v1193_v0 = vadd.f32 %v5923_v8, %v1107_v39  ;;  %v1233_v7 = vadd.f32 %v5924_v29, %v1169_v59  ;;  %v5927_v58 = vld [vmem:[#allocation25_spill] sm:$0xff]  ;;  %v5929_v59 = vld [vmem:[#allocation51_spill] sm:$0xff]  ;;  %v5934_v54 = vld [vmem:[#allocation104_spill] sm:$0xff] }
 0x2f4   : > { %v1049_v21 = vadd.f32 %v5925_v20, %v963_v49  ;;  %v2118_v31 = vsel %vm593_vm2, %v2116_v45, %v2117_v55  ;;  %v2216_v37 = vmul.f32 %v4738_v40, %v4925_v60  ;;  %v2283_v18 = vrot.slane %v5037_v53, 4  ;;  %v5935_v8 = vld [vmem:[#allocation42_spill] sm:$0xff] }
 0x2f5   : > { %2203 = vrot.lane.b32.xlu1 %v2196_v44, %s3203_s11  ;;  %2123 = vrot.lane.b32.xlu0 %v2120_v22, %s3202_s18  ;;  %v982_v4 = vadd.f32 %v5926_v35, %v928_v11  ;;  %v1074_v23 = vadd.f32 %v5927_v58, %v983_v48  ;;  %v1089_v38 = vadd.f32 %v5928_v56, %v1025_v26  ;;  %v2282_v49 = vrot.slane %v2276_v12, 4  ;;  %v5930_v44 = vld [vmem:[#allocation64_spill] sm:$0xff]  ;;  %v5931_v26 = vld [vmem:[#allocation29_spill] sm:$0xff] }
 0x2f6   : > { %v1314_v15 = vadd.f32 %v4899_v13, %v1233_v7  ;;  %v984_v39 = vadd.f32 %v5929_v59, %v930_v30  ;;  %v5076_v61 = vmul.f32 %v4585_v27, %v4891_v41  ;;  %v5080_v55 = vmul.f32 %v4585_v27, %v4894_v9  ;;  %v5932_v13 = vld [vmem:[#allocation85_spill] sm:$0xff]  ;;  %v5936_v7 = vld [vmem:[#allocation84_spill] sm:$0xff] }
 0x2f7   : > { %v5061_v10 = vpop.permute.xlu1 %1499  ;;  %v5063_v63 = vpop.permute.xlu0 %1732  ;;  %v1195_v52 = vadd.f32 %v5930_v44, %v1109_v33  ;;  %v1170_v32 = vadd.f32 %v5931_v26, %v1089_v38  ;;  %v1252_v11 = vadd.f32 %v5932_v13, %v1193_v0  ;;  %v5089_v2 = vmul.f32 %v4738_v40, %v4888_v17  ;;  %v5933_v22 = vld [vmem:[#allocation49_spill] sm:$0xff] }
 0x2f8   : > { %v1108_v25 = vadd.f32 %v5933_v22, %v1049_v21  ;;  %v2215_v1 = vmul.f32 %v4585_v27, %v4925_v60  ;;  %v2284_v12 = vsel %vm593_vm2, %v2282_v49, %v2283_v18  ;;  %v2278_v33 = vmul.f32 %v4741_v16, %v4928_v51  ;;  %v5937_v21 = vld [vmem:[#allocation58_spill] sm:$0xff]  ;;  %v5939_v51 = vld [vmem:[#allocation41_spill] sm:$0xff] }
 0x2f9   : > { %2121 = vrot.lane.b32.xlu1 %v2118_v31, %s3202_s18  ;;  %2223 = vrot.lane.b32.xlu0 %v2216_v37, %s3203_s11  ;;  %v1073_v48 = vadd.f32 %v5934_v54, %v982_v4  ;;  %v1128_v0 = vadd.f32 %v5935_v8, %v1074_v23  ;;  %v1338_v29 = vadd.f32 %v4938_v24, %v1252_v11  ;;  %v5938_v37 = vld [vmem:[#allocation30_spill] sm:$0xff]  ;;  %v1552_v58 = vrot.slane %v5050_v14, 4  ;;  %v5940_v23 = vld [vmem:[#allocation57_spill] sm:$0xff]  ;;  %v5946_v8 = vld [vmem:[#allocation56_spill] sm:$0xff] }
 0x2fa   : > { %v1378_v20 = vadd.f32 %v5936_v7, %v1314_v15  ;;  %v1075_v31 = vadd.f32 %v5937_v21, %v984_v39  ;;  %v1194_v35 = vadd.f32 %v5938_v37, %v1108_v25  ;;  %v5112_v56 = vmul.f32 %v4585_v27, %v4919_v43  ;;  %v5941_v15 = vld [vmem:[#allocation107_spill] sm:$0xff]  ;;  %v5943_v13 = vld [vmem:[#allocation81_spill] sm:$0xff]  ;;  %v5944_v25 = vld [vmem:[#allocation86_spill] sm:$0xff] }
 0x2fb   : > { %v5092_v30 = vpop.permute.xlu1 %1711  ;;  %v5094_v45 = vpop.permute.xlu0 %1736  ;;  %v1254_v4 = vadd.f32 %v5939_v51, %v1195_v52  ;;  %v1234_v24 = vadd.f32 %v5940_v23, %v1170_v32  ;;  %v1569_v38 = vrot.slane %v5080_v55, 4  ;;  %v5121_v59 = vmul.f32 %v4585_v27, %v5941_v15  ;;  %v5942_v32 = vld [vmem:[#allocation105_spill] sm:$0xff] }
 0x2fc   : > { %v1553_v14 = vrot.slane %v5089_v2, 4  ;;  %v5126_v39 = vmul.f32 %v4738_v40, %v4894_v9  ;;  %v2217_v52 = vmul.f32 %v4741_v16, %v4925_v60  ;;  %v2285_v26 = vrot.slane %v2278_v33, 4  ;;  %v5948_v60 = vld [vmem:[#allocation99_spill] sm:$0xff] }
 0x2fd   : > { %2221 = vrot.lane.b32.xlu1 %v2215_v1, %s3203_s11  ;;  %2287 = vrot.lane.b32.xlu0 %v2284_v12, %s3203_s11  ;;  %v1219_v55 = vadd.f32 %v5942_v32, %v1128_v0  ;;  %v1127_v11 = vadd.f32 %v5943_v13, %v1073_v48  ;;  %v1459_v22 = vadd.f32 %v4940_v47, %v1378_v20  ;;  %v5945_v12 = vld [vmem:[#allocation44_spill] sm:$0xff]  ;;  %v5947_v21 = vstv %s4817_s26  ;;  %v5949_v48 = vld [vmem:[#allocation26_spill] sm:$0xff]  ;;  %v5950_v0 = vld [vmem:[#allocation33_spill] sm:$0xff]  ;;  %s6002_s26 = smov 32  }
 0x2fe   : > { %v1397_v1 = vadd.f32 %v5944_v25, %v1338_v29  ;;  %v1129_v54 = vadd.f32 %v5945_v12, %v1075_v31  ;;  %v1253_v7 = vadd.f32 %v5946_v8, %v1194_v35  ;;  %v1517_v37 = vmul.f32 %v4738_v40, %v5947_v21  ;;  %v5952_v13 = vld [vmem:[#allocation47_spill] sm:$0xff]  ;;  %v5953_v12 = vld [vmem:[#allocation97_spill] sm:$0xff]  ;;  %v5954_v21 = vld [vmem:[#allocation106_spill] sm:$0xff] }
 0x2ff   : > { %v5128_v49 = vpop.permute.xlu1 %1734  ;;  %v5130_v44 = vpop.permute.xlu0 %1752  ;;  %v1588_v51 = vrot.slane %v5112_v56, 4  ;;  %v1340_v33 = vadd.f32 %v5948_v60, %v1254_v4  ;;  %v1315_v47 = vadd.f32 %v5949_v48, %v1234_v24  ;;  %v1218_v20 = vadd.f32 %v5950_v0, %v1127_v11 }
 0x300   : > { %v1548_v29 = vmul.f32 %v4741_v16, %v4888_v17  ;;  %v1554_v31 = vsel %vm593_vm2, %v1552_v58, %v1553_v14  ;;  %v5156_v35 = vmul.f32 %v4738_v40, %v5941_v15  ;;  %v5951_v4 = vstv %s4861_s15  ;;  %s2729_s15 = sshll.u32 %s190_s8, 4  ;;  %s5504_s15 = int_to_ptr.vmem [resolvable:$true] %s2729_s15 }
 0x301   : > { %2225 = vrot.lane.b32.xlu1 %v2217_v52, %s3203_s11  ;;  %2291 = vrot.lane.b32.xlu0 %v2285_v26, %s3203_s11  ;;  %v2182_v24 = vmul.f32 %v4738_v40, %v5951_v4  ;;  %v5167_v32 = vmul.f32 %v4738_v40, %v5004_v19  ;;  %v1518_v17 = vadd.f32 %v5044_v6, %v1459_v22  ;;  %v1570_v48 = vrot.slane %v5126_v39, 4  ;;  %v5956_v22 = vld [vmem:[#allocation82_spill] sm:$0xff]  ;;  %s3096_s30 = scalar_lea.vmem %s5504_s15, 32 }
 0x302   : > { %v1273_v11 = vadd.f32 %v5952_v13, %v1219_v55  ;;  %v1483_v58 = vadd.f32 %v4971_v36, %v1397_v1  ;;  %v2286_v25 = vsel %vm593_vm2, %v2283_v18, %v2285_v26  ;;  %v1220_v8 = vadd.f32 %v5953_v12, %v1129_v54  ;;  %v5955_v55 = vld [vmem:[#allocation65_spill] sm:$0xff]  ;;  %v5957_v18 = vld [vmem:[#allocation59_spill] sm:$0xff]  ;;  %p3097_p8 = scmp.ne.s32.totalorder %s5504_s15, %s3096_s30 }
 0x303   : > { %v5158_v23 = vpop.permute.xlu1 %1750  ;;  %v5160_v52 = vpop.permute.xlu0 %1768  ;;  %v1339_v60 = vadd.f32 %v5954_v21, %v1253_v7  ;;  %v2301_v6 = vmul.f32 %v4585_v27, %v5004_v19  ;;  %v1399_v36 = vadd.f32 %v5955_v55, %v1340_v33  ;;  %v1272_v53 = vadd.f32 %v5956_v22, %v1218_v20  ;;  %v5959_v55 = vld [vmem:[#allocation48_spill] sm:$0xff] }
 0x304   : > { %v1364_v1 = vadd.f32 %v4969_v46, %v1273_v11  ;;  %v1379_v26 = vadd.f32 %v5957_v18, %v1315_v47  ;;  %v1555_v54 = vrot.slane %v1548_v29, 4  ;;  %v1523_v7 = vmul.f32 %v4738_v40, %v4891_v41  ;;  %v5958_v11 = vld [vmem:[#allocation62_spill] sm:$0xff]  ;;  %v5962_v22 = vld [vmem:[#allocation52_spill] sm:$0xff]  ;;  %p3098_p0 = pnand %p3097_p8, %p6010_p13 }
 0x305   : > { %2289 = vrot.lane.b32.xlu1 %v2286_v25, %s3203_s11  ;;  %2187 = vrot.lane.b32.xlu0 %v2182_v24, %s3203_s11  ;;  %v2181_v24 = vmul.f32 %v4585_v27, %v5951_v4  ;;  %v1946_v33 = vmul.f32 %v4738_v40, %v4989_v57  ;;  %v1559_v13 = vadd.f32 %v1554_v31, %v1518_v17  ;;  %v2308_v47 = vrot.slane %v5167_v32, 4  ;;  %v5960_v17 = vld [vmem:[#allocation98_spill] sm:$0xff] }
 0x306   : > { %v1525_v20 = vadd.f32 %v5076_v61, %v1483_v58  ;;  %v1460_v46 = vadd.f32 %v4997_v50, %v1379_v26  ;;  %v1571_v29 = vsel %vm593_vm2, %v1569_v38, %v1570_v48  ;;  %v1398_v25 = vadd.f32 %v5958_v11, %v1339_v60  ;;  %v5961_v58 = vld [vmem:[#allocation24_spill] sm:$0xff]  ;;  %p3099_p2 = pneg %p3098_p0 }
 0x307   : > { %v5188_v39 = vpop.permute.xlu1 %1766  ;;  %v5190_v0 = vpop.permute.xlu0 %1786  ;;  %v1565_v12 = vmul.f32 %v4741_v16, %v4894_v9  ;;  %v2307_v21 = vrot.slane %v2301_v6, 4  ;;  %v1274_v31 = vadd.f32 %v5959_v55, %v1220_v8  ;;  %v1485_v61 = vadd.f32 %v5960_v17, %v1399_v36 }
 0x308   : > { %v1363_v50 = vadd.f32 %v5961_v58, %v1272_v53  ;;  %v1418_v32 = vadd.f32 %v5962_v22, %v1364_v1  ;;  %v1484_v38 = vadd.f32 %v5029_v34, %v1398_v25  ;;  %v1524_v60 = vmul.f32 %v4741_v16, %v4891_v41  ;;  %v5963_v53 = vld [vmem:[#allocation72_spill] sm:$0xff] }
 0x309   : > { %2185 = vrot.lane.b32.xlu1 %v2181_v24, %s3203_s11  ;;  %1953 = vrot.lane.b32.xlu0 %v1946_v33, %s5667_s14  ;;  %v1945_v6 = vmul.f32 %v4585_v27, %v4989_v57  ;;  %v2303_v8 = vmul.f32 %v4741_v16, %v5004_v19  ;;  %v1577_v36 = vadd.f32 %v1571_v29, %v1525_v20  ;;  %v1572_v34 = vrot.slane %v1565_v12, 4  ;;  %v5964_v19 = vld [vmem:[#allocation67_spill] sm:$0xff]  ;;  %v5965_v20 = vld [vmem:[#allocation89_spill] sm:$0xff] }
 0x30a   : > { %v1519_v26 = vadd.f32 %v1517_v37, %v1460_v46  ;;  %v1611_v4 = vadd.f32 %v5963_v53, %v1559_v13  ;;  %v2309_v1 = vsel %vm593_vm2, %v2307_v21, %v2308_v47  ;;  %v1556_v41 = vsel %vm593_vm2, %v1553_v14, %v1555_v54  ;;  %v5969_v53 = vld [vmem:[#allocation90_spill] sm:$0xff] }
 0x30b   : > { %v5213_v18 = vpop.permute.xlu1 %1770  ;;  %v5215_v9 = vpop.permute.xlu0 %1790  ;;  %v1583_v24 = vmul.f32 %v4738_v40, %v4919_v43  ;;  %v5230_v33 = vmul.f32 %v4741_v16, %v4919_v43  ;;  %v1365_v37 = vadd.f32 %v5964_v19, %v1274_v31  ;;  %v1509_v13 = vadd.f32 %v4999_v42, %v1418_v32  ;;  %v5966_v42 = vld [vmem:[#allocation63_spill] sm:$0xff]  ;;  %v5967_v31 = vld [vmem:[#allocation73_spill] sm:$0xff] }
 0x30c   : > { %v1417_v2 = vadd.f32 %v5965_v20, %v1363_v50  ;;  %v1527_v46 = vadd.f32 %v1524_v60, %v1485_v61  ;;  %v1526_v14 = vadd.f32 %v1523_v7, %v1484_v38  ;;  %v1947_v43 = vmul.f32 %v4741_v16, %v4989_v57  ;;  %v5968_v50 = vld [vmem:[#allocation68_spill] sm:$0xff]  ;;  %v5972_v19 = vld [vmem:[#allocation91_spill] sm:$0xff] }
 0x30d   : > { %1951 = vrot.lane.b32.xlu1 %v1945_v6, %s5667_s14  ;;  %2312 = vrot.lane.b32.xlu0 %v2309_v1, %s3203_s11  ;;  %v2310_v11 = vrot.slane %v2303_v8, 4  ;;  %v5245_v25 = vmul.f32 %v4738_v40, %v5018_v28  ;;  %v1560_v12 = vadd.f32 %v1556_v41, %v1519_v26  ;;  %v1692_v55 = vadd.f32 %v5966_v42, %v1611_v4  ;;  %v5970_v1 = vld [vmem:[#allocation71_spill] sm:$0xff] }
 0x30e   : > { %v1508_v21 = vadd.f32 %v5061_v10, %v1417_v2  ;;  %v1630_v17 = vadd.f32 %v5967_v31, %v1577_v36  ;;  %v1573_v7 = vsel %vm593_vm2, %v1570_v48, %v1572_v34  ;;  %v1589_v61 = vrot.slane %v1583_v24, 4  ;;  %v5971_v24 = vld [vmem:[#allocation100_spill] sm:$0xff]  ;;  %v5975_v31 = vld [vmem:[#allocation93_spill] sm:$0xff] }
 0x30f   : > { %v5237_v54 = vpop.permute.xlu1 %1788  ;;  %v5239_v29 = vpop.permute.xlu0 %1808  ;;  %v1591_v58 = vrot.slane %v5230_v33, 4  ;;  %v2255_v57 = vmul.f32 %v4585_v27, %v5018_v28  ;;  %v1419_v22 = vadd.f32 %v5968_v50, %v1365_v37  ;;  %v1534_v10 = vadd.f32 %v5156_v35, %v1509_v13 }
 0x310   : > { %v1579_v32 = vadd.f32 %v1572_v34, %v1527_v46  ;;  %v1756_v38 = vadd.f32 %v5158_v23, %v1692_v55  ;;  %v1578_v60 = vadd.f32 %v1573_v7, %v1526_v14  ;;  %v2311_v8 = vsel %vm593_vm2, %v2308_v47, %v2310_v11  ;;  %v5286_v46 = vld [vmem:[#allocation4 + $0x18] sm:$0xff] }
 0x311   : > { %1955 = vrot.lane.b32.xlu1 %v1947_v43, %s5667_s14  ;;  %2316 = vrot.lane.b32.xlu0 %v2310_v11, %s3203_s11  ;;  %v2341_v36 = vmul.f32 %v4738_v40, %v5008_v3  ;;  %v2262_v26 = vrot.slane %v5245_v25, 4  ;;  %v1533_v27 = vadd.f32 %v5121_v59, %v1508_v21  ;;  %v1612_v4 = vadd.f32 %v5969_v53, %v1560_v12  ;;  %s5281_s14 = sld [smem:[#allocation5 + $0x5a]]  ;;  %v5974_v12 = vld [vmem:[#allocation61_spill] sm:$0xff] }
 0x312   : > { %v1716_v35 = vadd.f32 %v5970_v1, %v1630_v17  ;;  %v1532_v23 = vmul.f32 %v4741_v16, %v5941_v15  ;;  %v1590_v47 = vsel %vm593_vm2, %v1588_v51, %v1589_v61  ;;  %v1592_v34 = vsel %vm593_vm2, %v1589_v61, %v1591_v58  ;;  %v5973_v15 = vld [vmem:[#allocation92_spill] sm:$0xff] }
 0x313   : > { %v5259_v6 = vpop.permute.xlu1 %1806  ;;  %v1832_v48 = vpop.permute.xlu0 %1831  ;;  %v2261_v59 = vrot.slane %v2255_v57, 4  ;;  %v1510_v33 = vadd.f32 %v5971_v24, %v1419_v22  ;;  %v1632_v37 = vadd.f32 %v5972_v19, %v1579_v32  ;;  %v1597_v13 = vadd.f32 %v1592_v34, %v1534_v10  ;;  %v5976_v32 = vld [vmem:[#allocation74_spill] sm:$0xff] }
 0x314   : > { %v5268_v41 = vadd.f32 %v1832_v48, %v1756_v38  ;;  %v1775_v20 = vadd.f32 %v5188_v39, %v1716_v35  ;;  %v1631_v56 = vadd.f32 %v5973_v15, %v1578_v60  ;;  %v2340_v14 = vmul.f32 %v5286_v46, %v5008_v3 }
 0x315   : > { %2314 = vrot.lane.b32.xlu1 %v2311_v8, %s3203_s11  ;;  %2348 = vrot.lane.b32.xlu0 %v2341_v36, %s3204_s5  ;;  %v2263_v43 = vsel %vm593_vm2, %v2261_v59, %v2262_v26  ;;  %v2257_v11 = vmul.f32 %v4741_v16, %v5018_v28  ;;  %v1596_v25 = vadd.f32 %v1590_v47, %v1533_v27  ;;  %v2359_v47 = vstv %s2926_s24 }
 0x316   : > { %v1718_v39 = vadd.f32 %v5092_v30, %v1632_v37  ;;  %v1693_v21 = vadd.f32 %v5974_v12, %v1612_v4  ;;  %v1535_v55 = vadd.f32 %v1532_v23, %v1510_v33  ;;  %v1651_v17 = vadd.f32 %v5975_v31, %v1597_v13 }
 0x317   : > { %v5284_v2 = vpop.permute.xlu1 %1810  ;;  %v1853_v51 = vpop.permute.xlu0 %1852  ;;  %v1717_v28 = vadd.f32 %v5031_v5, %v1631_v56  ;;  %v2342_v50 = vmul.f32 %v4741_v16, %v5008_v3  ;;  %v2090_v22 = vmul.f32 %v5286_v46, %v5021_v62  ;;  %v2264_v10 = vrot.slane %v2257_v11, 4 }
 0x318   : > { %v1861_v42 = vadd.f32 %v1853_v51, %v1775_v20  ;;  %v1757_v7 = vadd.f32 %v5130_v44, %v1693_v21  ;;  %v1777_v61 = vadd.f32 %v5213_v18, %v1718_v39  ;;  %v1650_v38 = vadd.f32 %v5976_v32, %v1596_v25 }
 0x319   : > { %2346 = vrot.lane.b32.xlu1 %v2340_v14, %s3204_s5  ;;  %2266 = vrot.lane.b32.xlu0 %v2263_v43, %s3203_s11  ;;  %v1742_v60 = vadd.f32 %v5128_v49, %v1651_v17  ;;  %v1598_v5 = vadd.f32 %v1591_v58, %v1535_v55  ;;  %v1776_v48 = vadd.f32 %v5160_v52, %v1717_v28  ;;  %v2420_v8 = vstv %s5281_s14  ;;  %v5977_v52 = vld [vmem:[#allocation94_spill] sm:$0xff]  ;;  %s3100_s14 = sshll.u32 %s3207_s17, 4  ;;  %s3101_s14 = int_to_ptr.vmem [resolvable:$false] %s3100_s14 }
 0x31a   : > { %v2092_v53 = vmul.f32 %v4741_v16, %v5021_v62  ;;  %v2422_v49 = vmul.f32 %v4738_v40, %v2420_v8  ;;  %v1741_v4 = vadd.f32 %v5063_v63, %v1650_v38  ;;  %v2265_v23 = vsel %vm593_vm2, %v2262_v26, %v2264_v10  ;;  %s3102_s24 = scalar_lea.vmem %s3101_s14, 64  ;;  %p3103_p6 = scmp.lt.s32.totalorder %s5504_s15, %s3101_s14 }
 0x31b   : > { %v1834_v57 = vpop.permute.xlu1 %1833  ;;  %v1857_v30 = vpop.permute.xlu0 %1856  ;;  %v1796_v3 = vadd.f32 %v5237_v54, %v1742_v60  ;;  %v1652_v54 = vadd.f32 %v5977_v52, %v1598_v5  ;;  %v2421_v34 = vmul.f32 %v5286_v46, %v2420_v8  ;;  %v2091_v63 = vmul.f32 %v4738_v40, %v5021_v62  ;;  %p3104_p1 = scmp.lt.s32.totalorder %s3102_s24, %s3096_s30 }
 0x31c   : > { %v5307_v44 = vadd.f32 %v1834_v57, %v1757_v7  ;;  %v1863_v18 = vadd.f32 %v1857_v30, %v1777_v61  ;;  %v1795_v58 = vadd.f32 %v5190_v0, %v1741_v4  ;;  %v2361_v33 = vmul.f32 %v4738_v40, %v2359_v47 }
 0x31d   : > { %2350 = vrot.lane.b32.xlu1 %v2342_v50, %s3204_s5  ;;  %2096 = vrot.lane.b32.xlu0 %v2090_v22, %s3202_s18  ;;  %v1743_v26 = vadd.f32 %v5094_v45, %v1652_v54  ;;  %v2428_v13 = vrot.slane %v2422_v49, 4  ;;  %v2427_v20 = vrot.slane %v2421_v34, 4  ;;  %v2360_v62 = vmul.f32 %v5286_v46, %v2359_v47  ;;  %p3105_p7 = por %p3104_p1, %p3103_p6 }
 0x31e   : > { %v2423_v51 = vmul.f32 %v4741_v16, %v2420_v8  ;;  %v2362_v25 = vmul.f32 %v4741_v16, %v2359_v47  ;;  %v2445_v7 = vstv %s2930_s6  ;;  %v2399_v8 = vstv %s2928_s0 }
 0x31f   : > { %v1855_v36 = vpop.permute.xlu1 %1854  ;;  %v1880_v27 = vpop.permute.xlu0 %1879  ;;  %v1797_v0 = vadd.f32 %v5215_v9, %v1743_v26  ;;  %v2429_v43 = vsel %vm593_vm2, %v2427_v20, %v2428_v13  ;;  %v2447_v30 = vmul.f32 %v4738_v40, %v2445_v7  ;;  %v2446_v22 = vmul.f32 %v5286_v46, %v2445_v7  ;;  %p3106_p12 = pnand %p3105_p7, %p3099_p2 }
 0x320   : > { %v1862_v1 = vadd.f32 %v1855_v36, %v1776_v48  ;;  %v1887_v35 = vadd.f32 %v1880_v27, %v1796_v3  ;;  %v2430_v39 = vrot.slane %v2423_v51, 4  ;;  %v2448_v49 = vmul.f32 %v4741_v16, %v2445_v7 }
 0x321   : > { %2268 = vrot.lane.b32.xlu1 %v2265_v23, %s3203_s11  ;;  %2100 = vrot.lane.b32.xlu0 %v2092_v53, %s3202_s18  ;;  %v2453_v48 = vrot.slane %v2447_v30, 4  ;;  %v2452_v3 = vrot.slane %v2446_v22, 4  ;;  %v2401_v4 = vmul.f32 %v4738_v40, %v2399_v8  ;;  %v2402_v52 = vmul.f32 %v4741_v16, %v2399_v8 }
 0x322   : > { %v2431_v57 = vsel %vm593_vm2, %v2428_v13, %v2430_v39  ;;  %v2455_v34 = vrot.slane %v2448_v49, 4 }
 0x323   : > { %v1878_v59 = vpop.permute.xlu1 %1877  ;;  %v1912_v24 = vpop.permute.xlu0 %1911  ;;  %v2454_v23 = vsel %vm593_vm2, %v2452_v3, %v2453_v48 }
 0x324   : > { %v1886_v19 = vadd.f32 %v1878_v59, %v1795_v58  ;;  %v1920_v37 = vadd.f32 %v1912_v24, %v1861_v42  ;;  %v2325_v42 = vstv %s5331_s22  ;;  %v2407_v24 = vrot.slane %v2401_v4, 4 }
 0x325   : > { %2098 = vrot.lane.b32.xlu1 %v2091_v63, %s3202_s18  ;;  %2368 = vrot.lane.b32.xlu0 %v2361_v33, %s3204_s5  ;;  %s2920_s18 = sld [smem:[#allocation5 + $0x4b]]  ;;  %v2327_v17 = vmul.f32 %v4738_v40, %v2325_v42  ;;  %v2326_v38 = vmul.f32 %v5286_v46, %v2325_v42  ;;  %v2409_v63 = vrot.slane %v2402_v52, 4  ;;  %v2456_v13 = vsel %vm593_vm2, %v2453_v48, %v2455_v34  ;;  %v5377_v42 = vld [vmem:[#allocation4 + $0x28] sm:$0xff] }
 0x327   : > { %v1882_v15 = vpop.permute.xlu1 %1881  ;;  %v1916_v56 = vpop.permute.xlu0 %1915 }
 0x328   : > { %v1888_v45 = vadd.f32 %v1882_v15, %v1797_v0  ;;  %v1922_v14 = vadd.f32 %v1916_v56, %v1863_v18  ;;  %v2379_v0 = vstv %s2927_s19  ;;  %v5369_v56 = vld [vmem:[#allocation4 + $0x20] sm:$0xff] }
 0x329   : > { %2366 = vrot.lane.b32.xlu1 %v2360_v62, %s3204_s5  ;;  %2432 = vrot.lane.b32.xlu0 %v2429_v43, %s3204_s5  ;;  %v2381_v62 = vmul.f32 %v5369_v56, %v2379_v0 }
 0x32b   : > { %v1914_v9 = vpop.permute.xlu1 %1913  ;;  %v1934_v11 = vpop.permute.xlu0 %1933  ;;  %v2234_v50 = vstv %s2920_s18 }
 0x32c   : > { %v1921_v12 = vadd.f32 %v1914_v9, %v1862_v1  ;;  %v1941_v21 = vadd.f32 %v1934_v11, %v1887_v35  ;;  %v2236_v60 = vmul.f32 %v4738_v40, %v2234_v50  ;;  %v2235_v53 = vmul.f32 %v5286_v46, %v2234_v50 }
 0x32d   : > { %2370 = vrot.lane.b32.xlu1 %v2362_v25, %s3204_s5  ;;  %2436 = vrot.lane.b32.xlu0 %v2430_v39, %s3204_s5  ;;  %v2237_v47 = vmul.f32 %v4741_v16, %v2234_v50  ;;  %v2410_v16 = vsel %vm593_vm2, %v2407_v24, %v2409_v63  ;;  %v2380_v11 = vmul.f32 %v5286_v46, %v2379_v0 }
 0x32f   : > { %v1932_v55 = vpop.permute.xlu1 %1931  ;;  %v1998_v31 = vpop.permute.xlu0 %1997 }
 0x330   : > { %v1940_v61 = vadd.f32 %v1932_v55, %v1886_v19  ;;  %v2006_v28 = vadd.f32 %v1998_v31, %v1920_v37  ;;  %v2382_v55 = vmul.f32 %v5377_v42, %v2379_v0 }
 0x331   : > { %2434 = vrot.lane.b32.xlu1 %v2431_v57, %s3204_s5  ;;  %2332 = vrot.lane.b32.xlu0 %v2327_v17, %s3204_s5 }
 0x333   : > { %v1936_v10 = vpop.permute.xlu1 %1935  ;;  %v2002_v32 = vpop.permute.xlu0 %2001 }
 0x334   : > { %v1942_v18 = vadd.f32 %v1936_v10, %v1888_v45  ;;  %v2008_v5 = vadd.f32 %v2002_v32, %v1922_v14 }
 0x335   : > { %2330 = vrot.lane.b32.xlu1 %v2326_v38, %s3204_s5  ;;  %2243 = vrot.lane.b32.xlu0 %v2236_v60, %s3203_s11 }
 0x337   : > { %v2000_v36 = vpop.permute.xlu1 %1999  ;;  %v1898_v27 = vpop.permute.xlu0 %1897 }
 0x338   : > { %v2007_v1 = vadd.f32 %v2000_v36, %v1921_v12  ;;  %v1902_v35 = vadd.f32 %v1898_v27, %v5307_v44  ;;  %v2400_v44 = vmul.f32 %v5286_v46, %v2399_v8 }
 0x339   : > { %2241 = vrot.lane.b32.xlu1 %v2235_v53, %s3203_s11  ;;  %2457 = vrot.lane.b32.xlu0 %v2454_v23, %s3204_s5 }
 0x33b   : > { %v1896_v54 = vpop.permute.xlu1 %1895  ;;  %v2025_v58 = vpop.permute.xlu0 %2024 }
 0x33c   : > { %v1901_v59 = vadd.f32 %v1896_v54, %v5268_v41  ;;  %v2032_v40 = vadd.f32 %v2025_v58, %v1941_v21  ;;  %v2406_v41 = vrot.slane %v2400_v44, 4 }
 0x33d   : > { %2245 = vrot.lane.b32.xlu1 %v2237_v47, %s3203_s11  ;;  %2461 = vrot.lane.b32.xlu0 %v2455_v34, %s3204_s5  ;;  %s2836_s11 = sld [smem:[#allocation5 + $0x15]] }
 0x33e   : > { %v2408_v14 = vsel %vm593_vm2, %v2406_v41, %v2407_v24 }
 0x33f   : > { %v2023_v33 = vpop.permute.xlu1 %2022  ;;  %v2057_v26 = vpop.permute.xlu0 %2056 }
 0x340   : > { %v2031_v19 = vadd.f32 %v2023_v33, %v1940_v61  ;;  %v2065_v37 = vadd.f32 %v2057_v26, %v2006_v28 }
 0x341   : > { %2459 = vrot.lane.b32.xlu1 %v2456_v13, %s3204_s5  ;;  %2413 = vrot.lane.b32.xlu0 %v2410_v16, %s3204_s5 }
 0x343   : > { %v2027_v20 = vpop.permute.xlu1 %2026  ;;  %v2061_v15 = vpop.permute.xlu0 %2060 }
 0x344   : > { %v2033_v51 = vadd.f32 %v2027_v20, %v1942_v18  ;;  %v2067_v45 = vadd.f32 %v2061_v15, %v2008_v5 }
 0x345   : > { %2411 = vrot.lane.b32.xlu1 %v2408_v14, %s3204_s5  ;;  %2388 = vrot.lane.b32.xlu0 %v2381_v62, %s3204_s5 }
 0x347   : > { %v2059_v43 = vpop.permute.xlu1 %2058  ;;  %v1979_v9 = vpop.permute.xlu0 %1978 }
 0x348   : > { %v2066_v25 = vadd.f32 %v2059_v43, %v2007_v1  ;;  %v1983_v39 = vadd.f32 %v1979_v9, %v1902_v35 }
 0x349   : > { %2386 = vrot.lane.b32.xlu1 %v2380_v11, %s3204_s5 }
 0x34b   : > { %v1977_v12 = vpop.permute.xlu1 %1976  ;;  %v2079_v21 = vpop.permute.xlu0 %2078 }
 0x34c   : > { %v1982_v31 = vadd.f32 %v1977_v12, %v1901_v59  ;;  %v2086_v17 = vadd.f32 %v2079_v21, %v2032_v40 }
 0x34d   : > { %2390 = vrot.lane.b32.xlu1 %v2382_v55, %s3204_s5  ;;  %s2885_s5 = sld [smem:[#allocation5 + $0x46]] }
 0x34f   : > { %v2077_v7 = vpop.permute.xlu1 %2076  ;;  %v2143_v61 = vpop.permute.xlu0 %2142 }
 0x350   : > { %v2085_v28 = vadd.f32 %v2077_v7, %v2031_v19  ;;  %v2151_v57 = vadd.f32 %v2143_v61, %v2065_v37  ;;  %v578_v7 = vstv %s2836_s11  ;;  %v3050_v61 = vld [vmem:[#allocation4 + $0x8] sm:$0xff] }
 0x353   : > { %v2081_v30 = vpop.permute.xlu1 %2080  ;;  %v2147_v50 = vpop.permute.xlu0 %2146 }
 0x354   : > { %v2087_v22 = vadd.f32 %v2081_v30, %v2033_v51  ;;  %v2153_v10 = vadd.f32 %v2147_v50, %v2067_v45  ;;  %v3051_v50 = vld [vmem:[#allocation4] sm:$0xff] }
 0x357   : > { %v2145_v32 = vpop.permute.xlu1 %2144  ;;  %v2043_v38 = vpop.permute.xlu0 %2042 }
 0x358   : > { %v2152_v60 = vadd.f32 %v2145_v32, %v2066_v25  ;;  %v2047_v18 = vadd.f32 %v2043_v38, %v1983_v39  ;;  %v5979_v38 = vld [vmem:[#allocation76_spill] sm:$0xff] }
 0x35b   : > { %v2041_v5 = vpop.permute.xlu1 %2040  ;;  %v2170_v48 = vpop.permute.xlu0 %2169 }
 0x35c   : > { %v2046_v3 = vadd.f32 %v2041_v5, %v1982_v31  ;;  %v2177_v8 = vadd.f32 %v2170_v48, %v2086_v17  ;;  %v5980_v48 = vld [vmem:[#allocation28_spill] sm:$0xff] }
 0x35f   : > { %v2168_v36 = vpop.permute.xlu1 %2167  ;;  %v2202_v27 = vpop.permute.xlu0 %2201 }
 0x360   : > { %v2176_v53 = vadd.f32 %v2168_v36, %v2085_v28  ;;  %v2210_v49 = vadd.f32 %v2202_v27, %v2151_v57  ;;  %v580_v28 = vmul.f32 %v3050_v61, %v578_v7  ;;  %v5986_v61 = vld [vmem:[#allocation46_spill] sm:$0xff] }
 0x363   : > { %v2172_v4 = vpop.permute.xlu1 %2171  ;;  %v2206_v1 = vpop.permute.xlu0 %2205 }
 0x364   : > { %v2178_v35 = vadd.f32 %v2172_v4, %v2087_v22  ;;  %v2212_v23 = vadd.f32 %v2206_v1, %v2153_v10  ;;  %v579_v22 = vmul.f32 %v3051_v50, %v578_v7  ;;  %v5978_v10 = vld [vmem:[#allocation31_spill] sm:$0xff]  ;;  %v5981_v4 = vld [vmem:[#allocation77_spill] sm:$0xff] }
 0x365   : > { %v713_v32 = vadd.f32 %v5978_v10, %v580_v28 }
 0x367   : > { %v2204_v52 = vpop.permute.xlu1 %2203  ;;  %v2124_v54 = vpop.permute.xlu0 %2123 }
 0x368   : > { %v2211_v58 = vadd.f32 %v2204_v52, %v2152_v60  ;;  %v5381_v47 = vadd.f32 %v2124_v54, %v2047_v18  ;;  %v712_v60 = vadd.f32 %v5979_v38, %v579_v22  ;;  %v3052_v18 = vld [vmem:[#allocation4 + $0x10] sm:$0xff] }
 0x369   : > { %v581_v5 = vmul.f32 %v3052_v18, %v578_v7  ;;  %v5983_v52 = vld [vmem:[#allocation39_spill] sm:$0xff] }
 0x36a   : > { %v857_v1 = vadd.f32 %v5981_v4, %v712_v60  ;;  %v5990_v38 = vld [vmem:[#allocation87_spill] sm:$0xff] }
 0x36b   : > { %v2122_v34 = vpop.permute.xlu1 %2121  ;;  %v2224_v59 = vpop.permute.xlu0 %2223  ;;  %v5991_v18 = vld [vmem:[#allocation55_spill] sm:$0xff] }
 0x36c   : > { %v5383_v40 = vadd.f32 %v2122_v34, %v2046_v3  ;;  %v5385_v24 = vadd.f32 %v2224_v59, %v2177_v8  ;;  %v858_v3 = vadd.f32 %v5980_v48, %v713_v32  ;;  %v5992_v48 = vld [vmem:[#allocation66_spill] sm:$0xff] }
 0x36e   : > { %v1003_v54 = vadd.f32 %v5983_v52, %v858_v3 }
 0x36f   : > { %v2222_v63 = vpop.permute.xlu1 %2221  ;;  %v2288_v44 = vpop.permute.xlu0 %2287 }
 0x370   : > { %v5387_v33 = vadd.f32 %v2222_v63, %v2176_v53  ;;  %v2296_v26 = vadd.f32 %v2288_v44, %v2210_v49  ;;  %v5984_v44 = vld [vmem:[#allocation79_spill] sm:$0xff]  ;;  %v1148_v28 = vadd.f32 %v5986_v61, %v1003_v54 }
 0x373   : > { %v2226_v19 = vpop.permute.xlu1 %2225  ;;  %v2292_v37 = vpop.permute.xlu0 %2291 }
 0x374   : > { %v5389_v13 = vadd.f32 %v2226_v19, %v2178_v35  ;;  %v2298_v16 = vadd.f32 %v2292_v37, %v2212_v23  ;;  %v5982_v35 = vld [vmem:[#allocation36_spill] sm:$0xff]  ;;  %v1002_v19 = vadd.f32 %v5984_v44, %v857_v1  ;;  %v5985_v37 = vld [vmem:[#allocation34_spill] sm:$0xff] }
 0x375   : > { %v714_v23 = vadd.f32 %v5982_v35, %v581_v5  ;;  %v5993_v1 = vld [vmem:[#allocation88_spill] sm:$0xff] }
 0x377   : > { %v2290_v41 = vpop.permute.xlu1 %2289  ;;  %v5391_v0 = vpop.permute.xlu0 %2187  ;;  %v859_v7 = vadd.f32 %v5985_v37, %v714_v23  ;;  %v5994_v23 = vld [vmem:[#allocation50_spill] sm:$0xff] }
 0x378   : > { %v2297_v27 = vadd.f32 %v2290_v41, %v2211_v58  ;;  %v5988_v41 = vld [vmem:[#allocation43_spill] sm:$0xff] }
 0x37b   : > { %v5393_v20 = vpop.permute.xlu1 %2185  ;;  %v5395_v15 = vpop.permute.xlu0 %1953 }
 0x37f   : > { %v5397_v62 = vpop.permute.xlu1 %1951  ;;  %v5399_v51 = vpop.permute.xlu0 %2312 }
 0x383   : > { %v5401_v45 = vpop.permute.xlu1 %1955  ;;  %v5403_v14 = vpop.permute.xlu0 %2316 }
 0x387   : > { %v5405_v43 = vpop.permute.xlu1 %2314  ;;  %v2349_v9 = vpop.permute.xlu0 %2348 }
 0x388   : > { %v2356_v34 = vadd.f32 %v2349_v9, %v2297_v27 }
 0x38b   : > { %v2347_v11 = vpop.permute.xlu1 %2346  ;;  %v5407_v25 = vpop.permute.xlu0 %2266 }
 0x38c   : > { %v2355_v53 = vadd.f32 %v2347_v11, %v2296_v26  ;;  %v5987_v26 = vld [vmem:[#allocation80_spill] sm:$0xff]  ;;  %v1004_v11 = vadd.f32 %v5988_v41, %v859_v7 }
 0x38e   : > { %v1149_v5 = vadd.f32 %v5991_v18, %v1004_v11  ;;  %v2322_v11 = vadd.f32 %v5405_v43, %v5385_v24 }
 0x38f   : > { %v2351_v39 = vpop.permute.xlu1 %2350  ;;  %v5409_v12 = vpop.permute.xlu0 %2096 }
 0x390   : > { %v2357_v49 = vadd.f32 %v2351_v39, %v2298_v16  ;;  %v1147_v16 = vadd.f32 %v5987_v26, %v1002_v19  ;;  %v5989_v39 = vld [vmem:[#allocation60_spill] sm:$0xff]  ;;  %v1294_v52 = vadd.f32 %v5994_v23, %v1149_v5 }
 0x391   : > { %v1293_v10 = vadd.f32 %v5989_v39, %v1148_v28  ;;  %v2192_v28 = vadd.f32 %v5391_v0, %v5381_v47  ;;  %v5996_v26 = vld [vmem:[#allocation96_spill] sm:$0xff]  ;;  %v5997_v0 = vld [vmem:[#allocation75_spill] sm:$0xff] }
 0x392   : > { %v1292_v60 = vadd.f32 %v5990_v38, %v1147_v16 }
 0x393   : > { %v5411_v21 = vpop.permute.xlu1 %2268  ;;  %v5413_v55 = vpop.permute.xlu0 %2100  ;;  %v1438_v3 = vadd.f32 %v5992_v48, %v1293_v10 }
 0x394   : > { %v1437_v35 = vadd.f32 %v5993_v1, %v1292_v60  ;;  %v2273_v39 = vadd.f32 %v5411_v21, %v2192_v28 }
 0x397   : > { %v5415_v31 = vpop.permute.xlu1 %2098  ;;  %v5417_v17 = vpop.permute.xlu0 %2368 }
 0x39b   : > { %v2367_v57 = vpop.permute.xlu1 %2366  ;;  %v2433_v30 = vpop.permute.xlu0 %2432 }
 0x39c   : > { %v2441_v59 = vadd.f32 %v2433_v30, %v2355_v53  ;;  %v1537_v53 = vstv %s2885_s5 }
 0x39d   : > { %v1539_v54 = vmul.f32 %v5369_v56, %v1537_v53  ;;  %v1540_v61 = vmul.f32 %v5377_v42, %v1537_v53 }
 0x39e   : > { %v2473_v32 = vrot.slane %v2441_v59, 1 }
 0x39f   : > { %v2371_v8 = vpop.permute.xlu1 %2370  ;;  %v2437_v36 = vpop.permute.xlu0 %2436  ;;  %v1542_v59 = vadd.f32 %v1539_v54, %v1438_v3 }
 0x3a0   : > { %v2443_v63 = vadd.f32 %v2437_v36, %v2357_v49 }
 0x3a2   : > { %v2476_v9 = vrot.slane %v2443_v63, 1  ;;  %v5995_v63 = vld [vmem:[#allocation69_spill] sm:$0xff] }
 0x3a3   : > { %v2435_v50 = vpop.permute.xlu1 %2434  ;;  %v2333_v22 = vpop.permute.xlu0 %2332  ;;  %v1439_v44 = vadd.f32 %v5995_v63, %v1294_v52 }
 0x3a4   : > { %v2442_v58 = vadd.f32 %v2435_v50, %v2356_v34  ;;  %v1538_v34 = vmul.f32 %v5286_v46, %v1537_v53  ;;  %v2321_v50 = vadd.f32 %v5399_v51, %v5387_v33  ;;  %v1671_v46 = vadd.f32 %v5996_v26, %v1542_v59 }
 0x3a5   : > { %v1543_v56 = vadd.f32 %v1540_v61, %v1439_v44  ;;  %v2191_v33 = vadd.f32 %v5393_v20, %v5383_v40  ;;  %v2337_v51 = vadd.f32 %v2333_v22, %v2273_v39 }
 0x3a6   : > { %v2474_v30 = vrot.slane %v2442_v58, 1  ;;  %v1541_v7 = vadd.f32 %v1538_v34, %v1437_v35  ;;  %v2323_v58 = vadd.f32 %v5403_v14, %v5389_v13  ;;  %v2375_v42 = vadd.f32 %v2367_v57, %v2321_v50 }
 0x3a7   : > { %v2331_v36 = vpop.permute.xlu1 %2330  ;;  %v2244_v27 = vpop.permute.xlu0 %2243  ;;  %v1816_v47 = vadd.f32 %v5239_v29, %v1671_v46  ;;  %v2376_v13 = vadd.f32 %v5417_v17, %v2322_v11  ;;  %v2272_v43 = vadd.f32 %v5407_v25, %v2191_v33 }
 0x3a8   : > { %v2477_v49 = vsel %vm2472_vm3, %v2474_v30, %v2476_v9  ;;  %v2475_v4 = vsel %vm2472_vm3, %v2473_v32, %v2474_v30  ;;  %v2377_v10 = vadd.f32 %v2371_v8, %v2323_v58  ;;  %v1670_v32 = vadd.f32 %v5997_v0, %v1541_v7  ;;  %v5998_v8 = vld [vmem:[#allocation95_spill] sm:$0xff] }
 0x3a9   : > { %v1961_v24 = vadd.f32 %v5395_v15, %v1816_v47  ;;  %v1672_v29 = vadd.f32 %v5998_v8, %v1543_v56  ;;  %v2336_v20 = vadd.f32 %v2331_v36, %v2272_v43 }
 0x3aa   : > { %v1815_v30 = vadd.f32 %v5259_v6, %v1670_v32 }
 0x3ab   : > { %v2242_v19 = vpop.permute.xlu1 %2241  ;;  %v2458_v37 = vpop.permute.xlu0 %2457  ;;  %v2106_v40 = vadd.f32 %v5415_v31, %v1961_v24  ;;  %v1817_v15 = vadd.f32 %v5284_v2, %v1672_v29 }
 0x3ac   : > { %v2466_v14 = vadd.f32 %v2458_v37, %v2375_v42  ;;  %v1960_v18 = vadd.f32 %v5397_v62, %v1815_v30 }
 0x3ad   : > { %v2251_v53 = vadd.f32 %v2244_v27, %v2106_v40  ;;  %v1962_v62 = vadd.f32 %v5401_v45, %v1817_v15 }
 0x3ae   : > { %v2486_v17 = vrot.slane %v2466_v14, 2  ;;  %v2105_v25 = vadd.f32 %v5409_v12, %v1960_v18  ;;  %v6000_v14 = vmov 0.0  }
 0x3af   : > { %v2246_v16 = vpop.permute.xlu1 %2245  ;;  %v2462_v41 = vpop.permute.xlu0 %2461  ;;  %v2107_v59 = vadd.f32 %v5413_v55, %v1962_v62  ;;  %v3205_v55 = vmov 1983009808  }
 0x3b0   : > { %v2468_v9 = vadd.f32 %v2462_v41, %v2377_v10  ;;  %v2250_v31 = vadd.f32 %v2242_v19, %v2105_v25  ;;  %v2522_v26 = vunpack.c.l.s4 %v3205_v55  ;;  %v5999_v10 = vld [vmem:[#allocation21_spill] sm:$0xff] }
 0x3b1   : > { %v2252_v2 = vadd.f32 %v2246_v16, %v2107_v59  ;;  %v3206_v16 = vmov 1934713408  }
 0x3b2   : > { %v2489_v22 = vrot.slane %v2468_v9, 2  ;;  %v2537_v41 = vunpack.c.l.s4 %v3206_v16  ;;  %v2523_v39 = vunpack.c.0.s8 %v2522_v26 }
 0x3b3   : > { %v2460_v21 = vpop.permute.xlu1 %2459  ;;  %v2414_v57 = vpop.permute.xlu0 %2413 }
 0x3b4   : > { %v2467_v38 = vadd.f32 %v2460_v21, %v2376_v13  ;;  %v2418_v60 = vadd.f32 %v2414_v57, %v2337_v51  ;;  %v2538_v42 = vunpack.c.0.s8 %v2537_v41  ;;  %v2526_v47 = vsub.s32 %v2523_v39, %v5999_v10 }
 0x3b6   : > { %v2487_v5 = vrot.slane %v2467_v38, 2  ;;  %v2481_v6 = vadd.f32 %v2477_v49, %v2418_v60  ;;  %v2541_v0 = vsub.s32 %v2538_v42, %v5999_v10 }
 0x3b7   : > { %v2412_v48 = vpop.permute.xlu1 %2411  ;;  %v2389_v3 = vpop.permute.xlu0 %2388 }
 0x3b8   : > { %v2490_v1 = vsel %vm2485_vm4, %v2487_v5, %v2489_v22  ;;  %v2417_v35 = vadd.f32 %v2412_v48, %v2336_v20  ;;  %v2488_v23 = vsel %vm2485_vm4, %v2486_v17, %v2487_v5  ;;  %v2396_v54 = vadd.f32 %v2389_v3, %v2251_v53 }
 0x3b9   : > { %v2494_v52 = vadd.f32 %v2490_v1, %v2481_v6 }
 0x3ba   : > { %v2480_v36 = vadd.f32 %v2475_v4, %v2417_v35  ;;  %v2500_v12 = vrot.slane %v2396_v54, 3 }
 0x3bb   : > { %v2387_v34 = vpop.permute.xlu1 %2386 }
 0x3bc   : > { %v2493_v49 = vadd.f32 %v2488_v23, %v2480_v36  ;;  %v2395_v63 = vadd.f32 %v2387_v34, %v2250_v31 }
 0x3be   : > { %v2499_v44 = vrot.slane %v2395_v63, 3 }
 0x3bf   : > { %v2391_v37 = vpop.permute.xlu1 %2390 }
 0x3c0   : > { %v2501_v27 = vsel %vm2498_vm5, %v2499_v44, %v2500_v12  ;;  %v2397_v7 = vadd.f32 %v2391_v37, %v2252_v2 }
 0x3c1   : > { %v2506_v61 = vadd.f32 %v2501_v27, %v2493_v49 }
 0x3c2   : > { %v2502_v28 = vrot.slane %v2397_v7, 3 }
 0x3c3   : > { %v2931_v50 = vmul.f32 -1.442695, %v2506_v61 }
 0x3c4   : > { %v2503_v58 = vsel %vm2498_vm5, %v2500_v12, %v2502_v28 }
 0x3c5   : > { %3034 = vpow2.f32 %v2931_v50  ;;  %v2507_v45 = vadd.f32 %v2503_v58, %v2494_v52 }
 0x3c7   : > { %v2932_v4 = vmul.f32 -1.442695, %v2507_v45 }
 0x3c9   : > { %3036 = vpow2.f32 %v2932_v4 }
 0x3cf   : > { %v3035_v19 = vpop.eup %3034 }
 0x3d0   : > { %v2514_v56 = vadd.f32 1.0, %v3035_v19 }
 0x3d2   : > { %3038 = vrcp.f32 %v2514_v56 }
 0x3d3   : > { %v3037_v46 = vpop.eup %3036 }
 0x3d4   : > { %v2515_v11 = vadd.f32 1.0, %v3037_v46 }
 0x3d6   : > { %3040 = vrcp.f32 %v2515_v11  ;;  %v6008_v11 = vld [vmem:[#allocation22_spill] sm:$0xff] }
 0x3dc   : > { %v3039_v32 = vpop.eup %3038 }
 0x3dd   : > { %v2527_v33 = vrot.slane %v3039_v32, %v2526_v47  ;;  %v2520_v29 = vcombine.high %v3039_v32, %v6000_v14 }
 0x3df   : > { %v2542_v13 = vrot.slane %v2527_v33, %v2541_v0  ;;  %v2535_v24 = vcombine.high %v2527_v33, %v6000_v14  ;;  %v2534_v18 = vrot.slane %v2520_v29, %v2526_v47 }
 0x3e0   : > { %v3041_v51 = vpop.eup %3040 }
 0x3e1   : > { %v2565_v9 = vcombine.high %v2542_v13, %v6000_v14  ;;  %v2576_v30 = vrot.slane %v3041_v51, %v2526_v47  ;;  %v2549_v57 = vrot.slane %v2535_v24, %v2541_v0  ;;  %v2569_v40 = vcombine.high %v3041_v51, %v6000_v14 }
 0x3e2   : > { %v2557_v17 = vrot.slane %v2534_v18, %v2541_v0  ;;  %v2550_v15 = vcombine.high %v2534_v18, %v6000_v14 }
 0x3e3   : > { %2619 = vrot.lane.b32.xlu0 %v2565_v9, %s6001_s4  ;;  %v2591_v43 = vrot.slane %v2576_v30, %v2541_v0  ;;  %v2584_v8 = vcombine.high %v2576_v30, %v6000_v14  ;;  %v2566_v60 = vcombine.high %v2549_v57, %v6000_v14  ;;  %v2583_v22 = vrot.slane %v2569_v40, %v2526_v47 }
 0x3e4   : > { %v2567_v6 = vcombine.high %v2557_v17, %v6000_v14  ;;  %v2564_v48 = vrot.slane %v2550_v15, %v2541_v0 }
 0x3e5   : > { %v2614_v21 = vcombine.high %v2591_v43, %v6000_v14  ;;  %v2598_v38 = vrot.slane %v2584_v8, %v2541_v0  ;;  %v2606_v5 = vrot.slane %v2583_v22, %v2541_v0  ;;  %v2599_v3 = vcombine.high %v2583_v22, %v6000_v14 }
 0x3e6   : > { %v2568_v1 = vcombine.high %v2564_v48, %v6000_v14 }
 0x3e7   : > { %2647 = vrot.lane.b32.xlu1 %v2614_v21, %s6001_s4  ;;  %2623 = vrot.lane.b32.xlu0 %v2549_v57, %s6002_s26  ;;  %v2615_v20 = vcombine.high %v2598_v38, %v6000_v14  ;;  %v2616_v25 = vcombine.high %v2606_v5, %v6000_v14  ;;  %v2613_v53 = vrot.slane %v2599_v3, %v2541_v0 }
 0x3e9   : > { %v2617_v35 = vcombine.high %v2613_v53, %v6000_v14 }
 0x3eb   : > { %2651 = vrot.lane.b32.xlu1 %v2598_v38, %s6002_s26  ;;  %2627 = vrot.lane.b32.xlu0 %v2566_v60, %s6003_s16 }
 0x3ef   : > { %2655 = vrot.lane.b32.xlu1 %v2615_v20, %s6003_s16  ;;  %2631 = vrot.lane.b32.xlu0 %v2557_v17, %s6004_s3 }
 0x3f3   : > { %2659 = vrot.lane.b32.xlu1 %v2606_v5, %s6004_s3  ;;  %2635 = vrot.lane.b32.xlu0 %v2567_v6, %s6005_s1 }
 0x3f7   : > { %2663 = vrot.lane.b32.xlu1 %v2616_v25, %s6005_s1  ;;  %2639 = vrot.lane.b32.xlu0 %v2564_v48, %s6006_s10 }
 0x3fb   : > { %2667 = vrot.lane.b32.xlu1 %v2613_v53, %s6006_s10  ;;  %2643 = vrot.lane.b32.xlu0 %v2568_v1, %s6007_s13 }
 0x3ff   : > { %2671 = vrot.lane.b32.xlu1 %v2617_v35, %s6007_s13 }
 0x455   : > { %v2620_v23 = vpop.permute.xlu0 %2619 }
 0x456   : > { %v2675_v12 = vsel %vm2674_vm6, %v2542_v13, %v2620_v23 }
 0x459   : > { %v2648_v52 = vpop.permute.xlu1 %2647  ;;  %v2624_v62 = vpop.permute.xlu0 %2623 }
 0x45a   : > { %v2688_v44 = vsel %vm2674_vm6, %v2591_v43, %v2648_v52  ;;  %v2677_v37 = vsel %vm2676_vm7, %v2675_v12, %v2624_v62 }
 0x45d   : > { %v2652_v31 = vpop.permute.xlu1 %2651  ;;  %v2628_v36 = vpop.permute.xlu0 %2627 }
 0x45e   : > { %v2689_v27 = vsel %vm2676_vm7, %v2688_v44, %v2652_v31  ;;  %v2679_v61 = vsel %vm2678_vm8, %v2677_v37, %v2628_v36 }
 0x461   : > { %v2656_v54 = vpop.permute.xlu1 %2655  ;;  %v2632_v34 = vpop.permute.xlu0 %2631 }
 0x462   : > { %v2690_v28 = vsel %vm2678_vm8, %v2689_v27, %v2656_v54  ;;  %v2681_v50 = vsel %vm2680_vm9, %v2679_v61, %v2632_v34 }
 0x465   : > { %v2660_v59 = vpop.permute.xlu1 %2659  ;;  %v2636_v49 = vpop.permute.xlu0 %2635 }
 0x466   : > { %v2691_v58 = vsel %vm2680_vm9, %v2690_v28, %v2660_v59  ;;  %v2683_v4 = vsel %vm2682_vm10, %v2681_v50, %v2636_v49 }
 0x469   : > { %v2664_v63 = vpop.permute.xlu1 %2663  ;;  %v2640_v2 = vpop.permute.xlu0 %2639 }
 0x46a   : > { %v2692_v19 = vsel %vm2682_vm10, %v2691_v58, %v2664_v63  ;;  %v2685_v56 = vsel %vm2684_vm11, %v2683_v4, %v2640_v2 }
 0x46d   : > { %v2668_v7 = vpop.permute.xlu1 %2667  ;;  %v2644_v45 = vpop.permute.xlu0 %2643 }
 0x46e   : > { %v2693_v55 = vsel %vm2684_vm11, %v2692_v19, %v2668_v7  ;;  %v2687_v46 = vsel %vm2686_vm12, %v2685_v56, %v2644_v45 }
 0x471   : > { %v2672_v26 = vpop.permute.xlu1 %2671 }
 0x472   : > { %v2694_v16 = vsel %vm2686_vm12, %v2693_v55, %v2672_v26 }
 0x473   : > { %v2697_v41 = vcombine.low %v2687_v46, %v2694_v16 }
 0x475   : > { %v2704_v39 = vrot.slane %v2697_v41, %v6008_v11 }
 0x477   : > { %v2711_v42 = vrot.slane %v2704_v39, %v6008_v11 }
 0x479   : > { %2713 = vst.msk [vmem:[%s190_s8] sm:$0x3] %vm3375_vm0, %v2711_v42 }
 0x47a   : > { %3109 = shalt.err (!%p3106_p12)
}
 0x47b   : > { %s3110_s7 = scalar_lea.hbm %s5502_s23, 32  ;;  %s3114_s18 = scalar_lea.hbm %s5555_s2, 64 }
 0x47c   : > { %p3111_p4 = scmp.ne.s32.totalorder %s5502_s23, %s3110_s7  ;;  %p3115_p5 = scmp.lt.u32.totalorder %s5502_s23, %s5555_s2 }
 0x47d   : > { %p3116_p9 = scmp.lt.u32.totalorder %s3114_s18, %s3110_s7  ;;  %p3118_p8 = scmp.lt.u32.totalorder %s3110_s7, %s5502_s23 }
 0x47e   : > { %p3112_p10 = pnand %p3111_p4, %p6010_p13 }
 0x47f   : > { %p3117_p3 = por %p3116_p9, %p3115_p5 }
 0x480   : > { %p3113_p11 = pneg %p3112_p10 }
 0x481   : > { %p3119_p0 = por %p3118_p8, %p3117_p3 }
 0x483   : > { %p3120_p2 = pnand %p3119_p0, %p3113_p11 }
 0x485   : > { %3123 = shalt.err (!%p3120_p2)
}
 0x486   : > { %2946 = dma.vmem_to_hbm [thread:$0]  (%p6010_p13), %s5504_s15, 32, %s5502_s23, %s2715_s12  }
 0x487 PF: > { %s6011_s11 = sld [smem:[#allocation17_spill]]  ;;  %s2741_s5 = sand.u32 1, %s3162_s9  }
 0x488   : > { %p6012_p6 = scmp.ne.s32.totalorder %s5653_s21, 0  ;;  %s2742_s4 = scalar_lea.sflag [#allocation7], %s2741_s5 }
 0x48d   : > { %p6013_p1 = scmp.ge.s32.totalorder %s6011_s11, 2 }
 0x48f   : > { %p2957_p7 = pnand %p6013_p1, %p6012_p6 }
 0x491   : > { %3157 = dma.done.wait (!%p2957_p7), %s2742_s4, 32  }
 0x492   : > { %3159 = vsyncadd (!%p2957_p7), %s2742_s4, 4294967264  ;;  %s19_s14 = sadd.s32 1, %s6011_s11   ;;  %s6014_s9 = sld [smem:[#allocation14_spill]] }
 0x493   : > { %p16_p12 = scmp.ge.s32.totalorder %s19_s14, 4   ;;  %s6015_s10 = sld [smem:[#allocation15_spill]] }
 0x494   : > { %s6016_s11 = sld [smem:[#allocation19_spill]]  ;;  %s6017_s12 = sld [smem:[#allocation16_spill]] }
 0x495   : > { %s6018_s13 = sld [smem:[#allocation18_spill]]  ;;  %18 = sbr.rel (!%p16_p12) target bundleno = 10 (0xa), region = 87 }
 0x49c   :  { %2747 = vsyncpa [#allocation6], 1 }
 0x49d   :  { %2749 = vsyncpa [#allocation6 + $0x1], 1 }
 0x49e   :  { %2750 = vsyncpa [#allocation7], 1 }
 0x49f   :  { %2752 = vsyncpa [#allocation7 + $0x1], 1 }
 0x4a0   :  { %2753 = vsyncpa [#allocation8], 1 }
 0x4a1   :  { %2755 = vsyncpa [#allocation8 + $0x1], 1 }

</bundles_post_ra>
